<compile_context>
chip_gen: v7x
topology: tpu7x:2x2x1
jax: 0.10.0
libtpu: 0.0.40
codegen_flags: <defaults>
</compile_context>

<pallas_src>
import math

import jax
import jax.numpy as jnp
from jax import lax
from jax.experimental import pallas as pl
from jax.experimental.pallas import tpu as pltpu

# ---- small BERT config (stand-in for bert-base-uncased) ----
B, S, H = 2, 8, 128           # batch, seq len, hidden
BS = B * S                    # flattened batch*seq (matmul M dimension)
NUM_HEADS, HEAD_DIM = 4, 32
INTERMEDIATE = 256
NUM_LAYERS = 2
VOCAB = 64
LN_EPS = 1e-12
NEG_INF = -1e9
LOG2_S = 3                    # S == 8 (power of two, used for block-diag mask)


# ---------------- in-kernel helpers (f32 math) ----------------
def _layernorm(x, gamma, beta):
    mean = jnp.mean(x, axis=-1, keepdims=True)
    var = jnp.mean((x - mean) ** 2, axis=-1, keepdims=True)
    return (x - mean) * lax.rsqrt(var + LN_EPS) * gamma + beta


def _gelu(x):
    c = math.sqrt(2.0 / math.pi)
    return 0.5 * x * (1.0 + jnp.tanh(c * (x + 0.044715 * x * x * x)))


# ---------------- single fused Pallas kernel ----------------
def bert_fused_kernel(emb_ref, mask_ref, embg_ref, embb_ref,
                      wqkv_ref, bqkv_ref, wo_ref, bo_ref,
                      ln1g_ref, ln1b_ref, w1_ref, b1_ref, w2_ref, b2_ref,
                      ln2g_ref, ln2b_ref, poolw_ref, poolb_ref, o_ref):
    # embedding LayerNorm, activations stay (BS, H) f32 in vregs/VMEM
    x = _layernorm(emb_ref[...], embg_ref[...], embb_ref[...])        # (BS, H)

    # additive attention bias (block-diagonal over batch + key padding),
    # built once in-kernel from the (1, BS) mask -- no (B,S,S) DMA.
    row = lax.broadcasted_iota(jnp.int32, (BS, BS), 0)
    col = lax.broadcasted_iota(jnp.int32, (BS, BS), 1)
    same_batch = jnp.right_shift(row, LOG2_S) == jnp.right_shift(col, LOG2_S)
    key_ok = jnp.broadcast_to(mask_ref[...], (BS, BS)) > 0.5
    attn_bias = jnp.where(same_batch & key_ok, 0.0, NEG_INF).astype(jnp.float32)

    scale = 1.0 / math.sqrt(HEAD_DIM)

    for l in range(NUM_LAYERS):                       # static unrolled layer loop
        # ---- fused QKV projection: bf16 MXU, f32 accumulation ----
        qkv = jnp.dot(x.astype(jnp.bfloat16), wqkv_ref[l],
                      preferred_element_type=jnp.float32) + bqkv_ref[l]   # (BS, 3H)
        q = qkv[:, 0 * H:1 * H]                       # 128-lane-aligned slices (free)
        k = qkv[:, 1 * H:2 * H]
        v = qkv[:, 2 * H:3 * H]

        # ---- attention: concat-free, per-head output projected directly ----
        attn = jnp.zeros((BS, H), jnp.float32)
        for h in range(NUM_HEADS):                    # small static head loop
            sl = slice(h * HEAD_DIM, (h + 1) * HEAD_DIM)
            qh, kh, vh = q[:, sl], k[:, sl], v[:, sl]
            s = lax.dot_general(qh, kh, (((1,), (1,)), ((), ())),
                                preferred_element_type=jnp.float32) * scale
            s = s + attn_bias
            s = s - jnp.max(s, axis=-1, keepdims=True)
            p = jnp.exp(s)
            p = p * pl.reciprocal(jnp.sum(p, axis=-1, keepdims=True), approx=True)
            ctx = jnp.dot(p, vh, preferred_element_type=jnp.float32)      # (BS, HD)
            # per-head Wo slab (HD, H): lane-dense (BS, H) result, no concat
            attn = attn + jnp.dot(ctx.astype(jnp.bfloat16), wo_ref[l, h],
                                  preferred_element_type=jnp.float32)
        attn = attn + bo_ref[l]
        x = _layernorm(x + attn, ln1g_ref[l], ln1b_ref[l])

        # ---- FFN ----
        h1 = _gelu(jnp.dot(x.astype(jnp.bfloat16), w1_ref[l],
                           preferred_element_type=jnp.float32) + b1_ref[l])
        h2 = jnp.dot(h1.astype(jnp.bfloat16), w2_ref[l],
                     preferred_element_type=jnp.float32) + b2_ref[l]
        x = _layernorm(x + h2, ln2g_ref[l], ln2b_ref[l])

    # ---- pooler: tanh(dense([CLS])) ; CLS = row b*S of the flattened batch ----
    cls = jnp.concatenate([x[b * S:b * S + 1, :] for b in range(B)], axis=0)  # (B, H)
    o_ref[...] = jnp.tanh(
        jnp.dot(cls.astype(jnp.bfloat16), poolw_ref[...],
                preferred_element_type=jnp.float32) + poolb_ref[...])


# ---------------- wrapper: one launch, everything VMEM-resident ----------------
def bert_forward(emb, mask, p):
    args = (emb, mask, p["emb_ln_g"], p["emb_ln_b"],
            p["wqkv"], p["bqkv"], p["wo"], p["bo"],
            p["ln1g"], p["ln1b"], p["w1"], p["b1"], p["w2"], p["b2"],
            p["ln2g"], p["ln2b"], p["pool_w"], p["pool_b"])
    vmem_spec = pl.BlockSpec(memory_space=pltpu.MemorySpace.VMEM)
    return pl.pallas_call(
        bert_fused_kernel,
        out_shape=jax.ShapeDtypeStruct((B, H), jnp.float32),
        in_specs=[vmem_spec] * len(args),
        out_specs=vmem_spec,
    )(*args)


# ---------------- deterministic parameter init ----------------
def init_params(key):
    keys = iter(jax.random.split(key, 32))
    std = 0.02

    def dense(shape, dtype=jnp.bfloat16):
        return (jax.random.normal(next(keys), shape, jnp.float32) * std).astype(dtype)

    wqkv, bqkv, wo, bo = [], [], [], []
    ln1g, ln1b, w1, b1, w2, b2, ln2g, ln2b = ([] for _ in range(8))
    for _ in range(NUM_LAYERS):
        wqkv.append(dense((H, 3 * H)))
        bqkv.append(jnp.zeros((1, 3 * H), jnp.float32))
        wo.append(dense((NUM_HEADS, HEAD_DIM, H)))      # per-head output proj
        bo.append(jnp.zeros((1, H), jnp.float32))
        ln1g.append(jnp.ones((1, H), jnp.float32))
        ln1b.append(jnp.zeros((1, H), jnp.float32))
        w1.append(dense((H, INTERMEDIATE)))
        b1.append(jnp.zeros((1, INTERMEDIATE), jnp.float32))
        w2.append(dense((INTERMEDIATE, H)))
        b2.append(jnp.zeros((1, H), jnp.float32))
        ln2g.append(jnp.ones((1, H), jnp.float32))
        ln2b.append(jnp.zeros((1, H), jnp.float32))

    return {
        "word_emb": dense((VOCAB, H), jnp.float32),
        "pos_emb": dense((S, H), jnp.float32),
        "type_emb": dense((2, H), jnp.float32),
        "emb_ln_g": jnp.ones((1, H), jnp.float32),
        "emb_ln_b": jnp.zeros((1, H), jnp.float32),
        "wqkv": jnp.stack(wqkv), "bqkv": jnp.stack(bqkv),
        "wo": jnp.stack(wo), "bo": jnp.stack(bo),
        "ln1g": jnp.stack(ln1g), "ln1b": jnp.stack(ln1b),
        "w1": jnp.stack(w1), "b1": jnp.stack(b1),
        "w2": jnp.stack(w2), "b2": jnp.stack(b2),
        "ln2g": jnp.stack(ln2g), "ln2b": jnp.stack(ln2b),
        "pool_w": dense((H, H)),
        "pool_b": jnp.zeros((1, H), jnp.float32),
    }


def title_feature_extractor(token_ids, attention_mask, params):
    """Returns the BERT pooler_output: tanh(dense(hidden[:, 0])) in float32."""
    # embeddings (gather = JAX glue); LayerNorm happens inside the fused kernel
    tok_e = jnp.take(params["word_emb"], token_ids, axis=0)          # (B,S,H)
    pos_e = params["pos_emb"][None, :, :]                            # (1,S,H)
    typ_e = params["type_emb"][0][None, None, :]                     # (1,1,H)
    emb = (tok_e + pos_e + typ_e).astype(jnp.float32).reshape(BS, H)
    mask_flat = attention_mask.astype(jnp.float32).reshape(1, BS)
    return bert_forward(emb, mask_flat, params)


if __name__ == "__main__":
    key = jax.random.PRNGKey(0)
    k_tok, k_par = jax.random.split(key)

    # synthesized "tokenized titles": token ids + padding mask (padding=True)
    token_ids = jax.random.randint(k_tok, (B, S), 0, VOCAB)
    lengths = jnp.array([S, 5], dtype=jnp.int32)
    attention_mask = (jnp.arange(S)[None, :] < lengths[:, None]).astype(jnp.float32)

    params = init_params(k_par)

    out = title_feature_extractor(token_ids, attention_mask, params)
    out = jax.block_until_ready(out)
    assert out.shape == (B, H) and out.dtype == jnp.float32
    assert bool(jnp.all(jnp.isfinite(out)))
    print("KERNEL_OK")
</pallas_src>

<mosaic_0001>
module attributes {stable_mosaic.version = 11 : i64} {
  func.func @bert_fused_kernel(%arg0: memref<16x128xf32, #tpu.memory_space<vmem>>, %arg1: memref<1x16xf32, #tpu.memory_space<vmem>>, %arg2: memref<1x128xf32, #tpu.memory_space<vmem>>, %arg3: memref<1x128xf32, #tpu.memory_space<vmem>>, %arg4: memref<2x128x384xbf16, #tpu.memory_space<vmem>>, %arg5: memref<2x1x384xf32, #tpu.memory_space<vmem>>, %arg6: memref<2x4x32x128xbf16, #tpu.memory_space<vmem>>, %arg7: memref<2x1x128xf32, #tpu.memory_space<vmem>>, %arg8: memref<2x1x128xf32, #tpu.memory_space<vmem>>, %arg9: memref<2x1x128xf32, #tpu.memory_space<vmem>>, %arg10: memref<2x128x256xbf16, #tpu.memory_space<vmem>>, %arg11: memref<2x1x256xf32, #tpu.memory_space<vmem>>, %arg12: memref<2x256x128xbf16, #tpu.memory_space<vmem>>, %arg13: memref<2x1x128xf32, #tpu.memory_space<vmem>>, %arg14: memref<2x1x128xf32, #tpu.memory_space<vmem>>, %arg15: memref<2x1x128xf32, #tpu.memory_space<vmem>>, %arg16: memref<128x128xbf16, #tpu.memory_space<vmem>>, %arg17: memref<1x128xf32, #tpu.memory_space<vmem>>, %arg18: memref<2x128xf32, #tpu.memory_space<vmem>>) attributes {dimension_semantics = [], scalar_prefetch = 0 : i64, scratch_operands = 0 : i64, tpu.core_type = #tpu.core_type<tc>} {
    %c0 = arith.constant 0 : index
    %c0_0 = arith.constant 0 : index
    %0 = vector.load %arg0[%c0, %c0_0] : memref<16x128xf32, #tpu.memory_space<vmem>>, vector<16x128xf32>
    %c0_1 = arith.constant 0 : index
    %c0_2 = arith.constant 0 : index
    %1 = vector.load %arg2[%c0_1, %c0_2] : memref<1x128xf32, #tpu.memory_space<vmem>>, vector<1x128xf32>
    %c0_3 = arith.constant 0 : index
    %c0_4 = arith.constant 0 : index
    %2 = vector.load %arg3[%c0_3, %c0_4] : memref<1x128xf32, #tpu.memory_space<vmem>>, vector<1x128xf32>
    %cst = arith.constant dense<0.000000e+00> : vector<16xf32>
    %3 = vector.multi_reduction <add>, %0, %cst [1] : vector<16x128xf32> to vector<16xf32>
    %4 = vector.shape_cast %3 : vector<16xf32> to vector<16x1xf32>
    %cst_5 = arith.constant 1.280000e+02 : f32
    %5 = vector.broadcast %cst_5 : f32 to vector<16x1xf32>
    %6 = arith.divf %4, %5 : vector<16x1xf32>
    %7 = vector.broadcast %6 : vector<16x1xf32> to vector<16x128xf32>
    %8 = arith.subf %0, %7 : vector<16x128xf32>
    %9 = arith.mulf %8, %8 : vector<16x128xf32>
    %cst_6 = arith.constant dense<0.000000e+00> : vector<16xf32>
    %10 = vector.multi_reduction <add>, %9, %cst_6 [1] : vector<16x128xf32> to vector<16xf32>
    %11 = vector.shape_cast %10 : vector<16xf32> to vector<16x1xf32>
    %cst_7 = arith.constant 1.280000e+02 : f32
    %12 = vector.broadcast %cst_7 : f32 to vector<16x1xf32>
    %13 = arith.divf %11, %12 : vector<16x1xf32>
    %14 = vector.broadcast %6 : vector<16x1xf32> to vector<16x128xf32>
    %15 = arith.subf %0, %14 : vector<16x128xf32>
    %cst_8 = arith.constant 9.99999996E-13 : f32
    %16 = vector.broadcast %cst_8 : f32 to vector<16x1xf32>
    %17 = arith.addf %13, %16 : vector<16x1xf32>
    %18 = math.rsqrt %17 : vector<16x1xf32>
    %19 = vector.broadcast %18 : vector<16x1xf32> to vector<16x128xf32>
    %20 = arith.mulf %15, %19 : vector<16x128xf32>
    %21 = vector.broadcast %1 : vector<1x128xf32> to vector<16x128xf32>
    %22 = arith.mulf %20, %21 : vector<16x128xf32>
    %23 = vector.broadcast %2 : vector<1x128xf32> to vector<16x128xf32>
    %24 = arith.addf %22, %23 : vector<16x128xf32>
    %25 = tpu.iota {dimensions = array<i32: 0>} : vector<16x16xi32>
    %26 = tpu.iota {dimensions = array<i32: 1>} : vector<16x16xi32>
    %c3_i32 = arith.constant 3 : i32
    %27 = vector.broadcast %c3_i32 : i32 to vector<16x16xi32>
    %28 = arith.shrsi %25, %27 : vector<16x16xi32>
    %c3_i32_9 = arith.constant 3 : i32
    %29 = vector.broadcast %c3_i32_9 : i32 to vector<16x16xi32>
    %30 = arith.shrsi %26, %29 : vector<16x16xi32>
    %31 = arith.cmpi eq, %28, %30 : vector<16x16xi32>
    %c0_10 = arith.constant 0 : index
    %c0_11 = arith.constant 0 : index
    %32 = vector.load %arg1[%c0_10, %c0_11] : memref<1x16xf32, #tpu.memory_space<vmem>>, vector<1x16xf32>
    %33 = vector.shape_cast %32 : vector<1x16xf32> to vector<1x16xf32>
    %34 = vector.broadcast %33 : vector<1x16xf32> to vector<16x16xf32>
    %cst_12 = arith.constant 5.000000e-01 : f32
    %35 = vector.broadcast %cst_12 : f32 to vector<16x16xf32>
    %36 = arith.cmpf ogt, %34, %35 : vector<16x16xf32>
    %37 = arith.andi %31, %36 : vector<16x16xi1>
    %cst_13 = arith.constant 0.000000e+00 : f32
    %cst_14 = arith.constant -1.000000e+09 : f32
    %38 = vector.broadcast %cst_13 : f32 to vector<16x16xf32>
    %39 = vector.broadcast %cst_14 : f32 to vector<16x16xf32>
    %40 = arith.select %37, %38, %39 : vector<16x16xi1>, vector<16x16xf32>
    %41 = arith.truncf %24 : vector<16x128xf32> to vector<16x128xbf16>
    %c0_15 = arith.constant 0 : index
    %c0_16 = arith.constant 0 : index
    %c0_17 = arith.constant 0 : index
    %42 = vector.load %arg4[%c0_15, %c0_16, %c0_17] : memref<2x128x384xbf16, #tpu.memory_space<vmem>>, vector<1x128x384xbf16>
    %43 = vector.shape_cast %42 : vector<1x128x384xbf16> to vector<128x384xbf16>
    %cst_18 = arith.constant dense<0.000000e+00> : vector<16x384xf32>
    %44 = tpu.matmul %41, %43, %cst_18 {dimension_numbers = #tpu.dot_dimension_numbers<[1], [0], [0], [1], [0, 0, 1, 1], [], []>} : vector<16x128xbf16>, vector<128x384xbf16>, vector<16x384xf32> -> vector<16x384xf32>
    %c0_19 = arith.constant 0 : index
    %c0_20 = arith.constant 0 : index
    %c0_21 = arith.constant 0 : index
    %45 = vector.load %arg5[%c0_19, %c0_20, %c0_21] : memref<2x1x384xf32, #tpu.memory_space<vmem>>, vector<1x1x384xf32>
    %46 = vector.shape_cast %45 : vector<1x1x384xf32> to vector<1x384xf32>
    %47 = vector.broadcast %46 : vector<1x384xf32> to vector<16x384xf32>
    %48 = arith.addf %44, %47 : vector<16x384xf32>
    %49 = vector.extract_strided_slice %48 {offsets = [0, 0], sizes = [16, 128], strides = [1, 1]} : vector<16x384xf32> to vector<16x128xf32>
    %50 = vector.extract_strided_slice %48 {offsets = [0, 128], sizes = [16, 128], strides = [1, 1]} : vector<16x384xf32> to vector<16x128xf32>
    %51 = vector.extract_strided_slice %48 {offsets = [0, 256], sizes = [16, 128], strides = [1, 1]} : vector<16x384xf32> to vector<16x128xf32>
    %cst_22 = arith.constant 0.000000e+00 : f32
    %52 = vector.broadcast %cst_22 : f32 to vector<16x128xf32>
    %53 = vector.extract_strided_slice %49 {offsets = [0, 0], sizes = [16, 32], strides = [1, 1]} : vector<16x128xf32> to vector<16x32xf32>
    %54 = vector.extract_strided_slice %50 {offsets = [0, 0], sizes = [16, 32], strides = [1, 1]} : vector<16x128xf32> to vector<16x32xf32>
    %55 = vector.extract_strided_slice %51 {offsets = [0, 0], sizes = [16, 32], strides = [1, 1]} : vector<16x128xf32> to vector<16x32xf32>
    %cst_23 = arith.constant dense<0.000000e+00> : vector<16x16xf32>
    %56 = tpu.matmul %53, %54, %cst_23 {dimension_numbers = #tpu.dot_dimension_numbers<[1], [1], [0], [0], [0, 0, 1, 0], [], []>} : vector<16x32xf32>, vector<16x32xf32>, vector<16x16xf32> -> vector<16x16xf32>
    %cst_24 = arith.constant 0.176776692 : f32
    %57 = vector.broadcast %cst_24 : f32 to vector<16x16xf32>
    %58 = arith.mulf %56, %57 : vector<16x16xf32>
    %59 = arith.addf %58, %40 : vector<16x16xf32>
    %cst_25 = arith.constant dense<0xFF800000> : vector<16xf32>
    %60 = vector.multi_reduction <maximumf>, %59, %cst_25 [1] : vector<16x16xf32> to vector<16xf32>
    %61 = vector.shape_cast %60 : vector<16xf32> to vector<16x1xf32>
    %62 = vector.broadcast %61 : vector<16x1xf32> to vector<16x16xf32>
    %63 = arith.subf %59, %62 : vector<16x16xf32>
    %64 = math.exp %63 : vector<16x16xf32>
    %cst_26 = arith.constant dense<0.000000e+00> : vector<16xf32>
    %65 = vector.multi_reduction <add>, %64, %cst_26 [1] : vector<16x16xf32> to vector<16xf32>
    %66 = vector.shape_cast %65 : vector<16xf32> to vector<16x1xf32>
    %67 = tpu.reciprocal %66 {approx = true} : vector<16x1xf32> -> vector<16x1xf32>
    %68 = vector.broadcast %67 : vector<16x1xf32> to vector<16x16xf32>
    %69 = arith.mulf %64, %68 : vector<16x16xf32>
    %cst_27 = arith.constant dense<0.000000e+00> : vector<16x32xf32>
    %70 = tpu.matmul %69, %55, %cst_27 {dimension_numbers = #tpu.dot_dimension_numbers<[1], [0], [0], [1], [0, 0, 1, 1], [], []>} : vector<16x16xf32>, vector<16x32xf32>, vector<16x32xf32> -> vector<16x32xf32>
    %71 = arith.truncf %70 : vector<16x32xf32> to vector<16x32xbf16>
    %c0_28 = arith.constant 0 : index
    %c0_29 = arith.constant 0 : index
    %c0_30 = arith.constant 0 : index
    %c0_31 = arith.constant 0 : index
    %72 = vector.load %arg6[%c0_28, %c0_29, %c0_30, %c0_31] : memref<2x4x32x128xbf16, #tpu.memory_space<vmem>>, vector<1x1x32x128xbf16>
    %73 = vector.shape_cast %72 : vector<1x1x32x128xbf16> to vector<32x128xbf16>
    %cst_32 = arith.constant dense<0.000000e+00> : vector<16x128xf32>
    %74 = tpu.matmul %71, %73, %cst_32 {dimension_numbers = #tpu.dot_dimension_numbers<[1], [0], [0], [1], [0, 0, 1, 1], [], []>} : vector<16x32xbf16>, vector<32x128xbf16>, vector<16x128xf32> -> vector<16x128xf32>
    %75 = arith.addf %52, %74 : vector<16x128xf32>
    %76 = vector.extract_strided_slice %49 {offsets = [0, 32], sizes = [16, 32], strides = [1, 1]} : vector<16x128xf32> to vector<16x32xf32>
    %77 = vector.extract_strided_slice %50 {offsets = [0, 32], sizes = [16, 32], strides = [1, 1]} : vector<16x128xf32> to vector<16x32xf32>
    %78 = vector.extract_strided_slice %51 {offsets = [0, 32], sizes = [16, 32], strides = [1, 1]} : vector<16x128xf32> to vector<16x32xf32>
    %cst_33 = arith.constant dense<0.000000e+00> : vector<16x16xf32>
    %79 = tpu.matmul %76, %77, %cst_33 {dimension_numbers = #tpu.dot_dimension_numbers<[1], [1], [0], [0], [0, 0, 1, 0], [], []>} : vector<16x32xf32>, vector<16x32xf32>, vector<16x16xf32> -> vector<16x16xf32>
    %cst_34 = arith.constant 0.176776692 : f32
    %80 = vector.broadcast %cst_34 : f32 to vector<16x16xf32>
    %81 = arith.mulf %79, %80 : vector<16x16xf32>
    %82 = arith.addf %81, %40 : vector<16x16xf32>
    %cst_35 = arith.constant dense<0xFF800000> : vector<16xf32>
    %83 = vector.multi_reduction <maximumf>, %82, %cst_35 [1] : vector<16x16xf32> to vector<16xf32>
    %84 = vector.shape_cast %83 : vector<16xf32> to vector<16x1xf32>
    %85 = vector.broadcast %84 : vector<16x1xf32> to vector<16x16xf32>
    %86 = arith.subf %82, %85 : vector<16x16xf32>
    %87 = math.exp %86 : vector<16x16xf32>
    %cst_36 = arith.constant dense<0.000000e+00> : vector<16xf32>
    %88 = vector.multi_reduction <add>, %87, %cst_36 [1] : vector<16x16xf32> to vector<16xf32>
    %89 = vector.shape_cast %88 : vector<16xf32> to vector<16x1xf32>
    %90 = tpu.reciprocal %89 {approx = true} : vector<16x1xf32> -> vector<16x1xf32>
    %91 = vector.broadcast %90 : vector<16x1xf32> to vector<16x16xf32>
    %92 = arith.mulf %87, %91 : vector<16x16xf32>
    %cst_37 = arith.constant dense<0.000000e+00> : vector<16x32xf32>
    %93 = tpu.matmul %92, %78, %cst_37 {dimension_numbers = #tpu.dot_dimension_numbers<[1], [0], [0], [1], [0, 0, 1, 1], [], []>} : vector<16x16xf32>, vector<16x32xf32>, vector<16x32xf32> -> vector<16x32xf32>
    %94 = arith.truncf %93 : vector<16x32xf32> to vector<16x32xbf16>
    %c0_38 = arith.constant 0 : index
    %c1 = arith.constant 1 : index
    %c0_39 = arith.constant 0 : index
    %c0_40 = arith.constant 0 : index
    %95 = vector.load %arg6[%c0_38, %c1, %c0_39, %c0_40] : memref<2x4x32x128xbf16, #tpu.memory_space<vmem>>, vector<1x1x32x128xbf16>
    %96 = vector.shape_cast %95 : vector<1x1x32x128xbf16> to vector<32x128xbf16>
    %cst_41 = arith.constant dense<0.000000e+00> : vector<16x128xf32>
    %97 = tpu.matmul %94, %96, %cst_41 {dimension_numbers = #tpu.dot_dimension_numbers<[1], [0], [0], [1], [0, 0, 1, 1], [], []>} : vector<16x32xbf16>, vector<32x128xbf16>, vector<16x128xf32> -> vector<16x128xf32>
    %98 = arith.addf %75, %97 : vector<16x128xf32>
    %99 = vector.extract_strided_slice %49 {offsets = [0, 64], sizes = [16, 32], strides = [1, 1]} : vector<16x128xf32> to vector<16x32xf32>
    %100 = vector.extract_strided_slice %50 {offsets = [0, 64], sizes = [16, 32], strides = [1, 1]} : vector<16x128xf32> to vector<16x32xf32>
    %101 = vector.extract_strided_slice %51 {offsets = [0, 64], sizes = [16, 32], strides = [1, 1]} : vector<16x128xf32> to vector<16x32xf32>
    %cst_42 = arith.constant dense<0.000000e+00> : vector<16x16xf32>
    %102 = tpu.matmul %99, %100, %cst_42 {dimension_numbers = #tpu.dot_dimension_numbers<[1], [1], [0], [0], [0, 0, 1, 0], [], []>} : vector<16x32xf32>, vector<16x32xf32>, vector<16x16xf32> -> vector<16x16xf32>
    %cst_43 = arith.constant 0.176776692 : f32
    %103 = vector.broadcast %cst_43 : f32 to vector<16x16xf32>
    %104 = arith.mulf %102, %103 : vector<16x16xf32>
    %105 = arith.addf %104, %40 : vector<16x16xf32>
    %cst_44 = arith.constant dense<0xFF800000> : vector<16xf32>
    %106 = vector.multi_reduction <maximumf>, %105, %cst_44 [1] : vector<16x16xf32> to vector<16xf32>
    %107 = vector.shape_cast %106 : vector<16xf32> to vector<16x1xf32>
    %108 = vector.broadcast %107 : vector<16x1xf32> to vector<16x16xf32>
    %109 = arith.subf %105, %108 : vector<16x16xf32>
    %110 = math.exp %109 : vector<16x16xf32>
    %cst_45 = arith.constant dense<0.000000e+00> : vector<16xf32>
    %111 = vector.multi_reduction <add>, %110, %cst_45 [1] : vector<16x16xf32> to vector<16xf32>
    %112 = vector.shape_cast %111 : vector<16xf32> to vector<16x1xf32>
    %113 = tpu.reciprocal %112 {approx = true} : vector<16x1xf32> -> vector<16x1xf32>
    %114 = vector.broadcast %113 : vector<16x1xf32> to vector<16x16xf32>
    %115 = arith.mulf %110, %114 : vector<16x16xf32>
    %cst_46 = arith.constant dense<0.000000e+00> : vector<16x32xf32>
    %116 = tpu.matmul %115, %101, %cst_46 {dimension_numbers = #tpu.dot_dimension_numbers<[1], [0], [0], [1], [0, 0, 1, 1], [], []>} : vector<16x16xf32>, vector<16x32xf32>, vector<16x32xf32> -> vector<16x32xf32>
    %117 = arith.truncf %116 : vector<16x32xf32> to vector<16x32xbf16>
    %c0_47 = arith.constant 0 : index
    %c2 = arith.constant 2 : index
    %c0_48 = arith.constant 0 : index
    %c0_49 = arith.constant 0 : index
    %118 = vector.load %arg6[%c0_47, %c2, %c0_48, %c0_49] : memref<2x4x32x128xbf16, #tpu.memory_space<vmem>>, vector<1x1x32x128xbf16>
    %119 = vector.shape_cast %118 : vector<1x1x32x128xbf16> to vector<32x128xbf16>
    %cst_50 = arith.constant dense<0.000000e+00> : vector<16x128xf32>
    %120 = tpu.matmul %117, %119, %cst_50 {dimension_numbers = #tpu.dot_dimension_numbers<[1], [0], [0], [1], [0, 0, 1, 1], [], []>} : vector<16x32xbf16>, vector<32x128xbf16>, vector<16x128xf32> -> vector<16x128xf32>
    %121 = arith.addf %98, %120 : vector<16x128xf32>
    %122 = vector.extract_strided_slice %49 {offsets = [0, 96], sizes = [16, 32], strides = [1, 1]} : vector<16x128xf32> to vector<16x32xf32>
    %123 = vector.extract_strided_slice %50 {offsets = [0, 96], sizes = [16, 32], strides = [1, 1]} : vector<16x128xf32> to vector<16x32xf32>
    %124 = vector.extract_strided_slice %51 {offsets = [0, 96], sizes = [16, 32], strides = [1, 1]} : vector<16x128xf32> to vector<16x32xf32>
    %cst_51 = arith.constant dense<0.000000e+00> : vector<16x16xf32>
    %125 = tpu.matmul %122, %123, %cst_51 {dimension_numbers = #tpu.dot_dimension_numbers<[1], [1], [0], [0], [0, 0, 1, 0], [], []>} : vector<16x32xf32>, vector<16x32xf32>, vector<16x16xf32> -> vector<16x16xf32>
    %cst_52 = arith.constant 0.176776692 : f32
    %126 = vector.broadcast %cst_52 : f32 to vector<16x16xf32>
    %127 = arith.mulf %125, %126 : vector<16x16xf32>
    %128 = arith.addf %127, %40 : vector<16x16xf32>
    %cst_53 = arith.constant dense<0xFF800000> : vector<16xf32>
    %129 = vector.multi_reduction <maximumf>, %128, %cst_53 [1] : vector<16x16xf32> to vector<16xf32>
    %130 = vector.shape_cast %129 : vector<16xf32> to vector<16x1xf32>
    %131 = vector.broadcast %130 : vector<16x1xf32> to vector<16x16xf32>
    %132 = arith.subf %128, %131 : vector<16x16xf32>
    %133 = math.exp %132 : vector<16x16xf32>
    %cst_54 = arith.constant dense<0.000000e+00> : vector<16xf32>
    %134 = vector.multi_reduction <add>, %133, %cst_54 [1] : vector<16x16xf32> to vector<16xf32>
    %135 = vector.shape_cast %134 : vector<16xf32> to vector<16x1xf32>
    %136 = tpu.reciprocal %135 {approx = true} : vector<16x1xf32> -> vector<16x1xf32>
    %137 = vector.broadcast %136 : vector<16x1xf32> to vector<16x16xf32>
    %138 = arith.mulf %133, %137 : vector<16x16xf32>
    %cst_55 = arith.constant dense<0.000000e+00> : vector<16x32xf32>
    %139 = tpu.matmul %138, %124, %cst_55 {dimension_numbers = #tpu.dot_dimension_numbers<[1], [0], [0], [1], [0, 0, 1, 1], [], []>} : vector<16x16xf32>, vector<16x32xf32>, vector<16x32xf32> -> vector<16x32xf32>
    %140 = arith.truncf %139 : vector<16x32xf32> to vector<16x32xbf16>
    %c0_56 = arith.constant 0 : index
    %c3 = arith.constant 3 : index
    %c0_57 = arith.constant 0 : index
    %c0_58 = arith.constant 0 : index
    %141 = vector.load %arg6[%c0_56, %c3, %c0_57, %c0_58] : memref<2x4x32x128xbf16, #tpu.memory_space<vmem>>, vector<1x1x32x128xbf16>
    %142 = vector.shape_cast %141 : vector<1x1x32x128xbf16> to vector<32x128xbf16>
    %cst_59 = arith.constant dense<0.000000e+00> : vector<16x128xf32>
    %143 = tpu.matmul %140, %142, %cst_59 {dimension_numbers = #tpu.dot_dimension_numbers<[1], [0], [0], [1], [0, 0, 1, 1], [], []>} : vector<16x32xbf16>, vector<32x128xbf16>, vector<16x128xf32> -> vector<16x128xf32>
    %144 = arith.addf %121, %143 : vector<16x128xf32>
    %c0_60 = arith.constant 0 : index
    %c0_61 = arith.constant 0 : index
    %c0_62 = arith.constant 0 : index
    %145 = vector.load %arg7[%c0_60, %c0_61, %c0_62] : memref<2x1x128xf32, #tpu.memory_space<vmem>>, vector<1x1x128xf32>
    %146 = vector.shape_cast %145 : vector<1x1x128xf32> to vector<1x128xf32>
    %147 = vector.broadcast %146 : vector<1x128xf32> to vector<16x128xf32>
    %148 = arith.addf %144, %147 : vector<16x128xf32>
    %149 = arith.addf %24, %148 : vector<16x128xf32>
    %c0_63 = arith.constant 0 : index
    %c0_64 = arith.constant 0 : index
    %c0_65 = arith.constant 0 : index
    %150 = vector.load %arg8[%c0_63, %c0_64, %c0_65] : memref<2x1x128xf32, #tpu.memory_space<vmem>>, vector<1x1x128xf32>
    %151 = vector.shape_cast %150 : vector<1x1x128xf32> to vector<1x128xf32>
    %c0_66 = arith.constant 0 : index
    %c0_67 = arith.constant 0 : index
    %c0_68 = arith.constant 0 : index
    %152 = vector.load %arg9[%c0_66, %c0_67, %c0_68] : memref<2x1x128xf32, #tpu.memory_space<vmem>>, vector<1x1x128xf32>
    %153 = vector.shape_cast %152 : vector<1x1x128xf32> to vector<1x128xf32>
    %cst_69 = arith.constant dense<0.000000e+00> : vector<16xf32>
    %154 = vector.multi_reduction <add>, %149, %cst_69 [1] : vector<16x128xf32> to vector<16xf32>
    %155 = vector.shape_cast %154 : vector<16xf32> to vector<16x1xf32>
    %cst_70 = arith.constant 1.280000e+02 : f32
    %156 = vector.broadcast %cst_70 : f32 to vector<16x1xf32>
    %157 = arith.divf %155, %156 : vector<16x1xf32>
    %158 = vector.broadcast %157 : vector<16x1xf32> to vector<16x128xf32>
    %159 = arith.subf %149, %158 : vector<16x128xf32>
    %160 = arith.mulf %159, %159 : vector<16x128xf32>
    %cst_71 = arith.constant dense<0.000000e+00> : vector<16xf32>
    %161 = vector.multi_reduction <add>, %160, %cst_71 [1] : vector<16x128xf32> to vector<16xf32>
    %162 = vector.shape_cast %161 : vector<16xf32> to vector<16x1xf32>
    %cst_72 = arith.constant 1.280000e+02 : f32
    %163 = vector.broadcast %cst_72 : f32 to vector<16x1xf32>
    %164 = arith.divf %162, %163 : vector<16x1xf32>
    %165 = vector.broadcast %157 : vector<16x1xf32> to vector<16x128xf32>
    %166 = arith.subf %149, %165 : vector<16x128xf32>
    %cst_73 = arith.constant 9.99999996E-13 : f32
    %167 = vector.broadcast %cst_73 : f32 to vector<16x1xf32>
    %168 = arith.addf %164, %167 : vector<16x1xf32>
    %169 = math.rsqrt %168 : vector<16x1xf32>
    %170 = vector.broadcast %169 : vector<16x1xf32> to vector<16x128xf32>
    %171 = arith.mulf %166, %170 : vector<16x128xf32>
    %172 = vector.broadcast %151 : vector<1x128xf32> to vector<16x128xf32>
    %173 = arith.mulf %171, %172 : vector<16x128xf32>
    %174 = vector.broadcast %153 : vector<1x128xf32> to vector<16x128xf32>
    %175 = arith.addf %173, %174 : vector<16x128xf32>
    %176 = arith.truncf %175 : vector<16x128xf32> to vector<16x128xbf16>
    %c0_74 = arith.constant 0 : index
    %c0_75 = arith.constant 0 : index
    %c0_76 = arith.constant 0 : index
    %177 = vector.load %arg10[%c0_74, %c0_75, %c0_76] : memref<2x128x256xbf16, #tpu.memory_space<vmem>>, vector<1x128x256xbf16>
    %178 = vector.shape_cast %177 : vector<1x128x256xbf16> to vector<128x256xbf16>
    %cst_77 = arith.constant dense<0.000000e+00> : vector<16x256xf32>
    %179 = tpu.matmul %176, %178, %cst_77 {dimension_numbers = #tpu.dot_dimension_numbers<[1], [0], [0], [1], [0, 0, 1, 1], [], []>} : vector<16x128xbf16>, vector<128x256xbf16>, vector<16x256xf32> -> vector<16x256xf32>
    %c0_78 = arith.constant 0 : index
    %c0_79 = arith.constant 0 : index
    %c0_80 = arith.constant 0 : index
    %180 = vector.load %arg11[%c0_78, %c0_79, %c0_80] : memref<2x1x256xf32, #tpu.memory_space<vmem>>, vector<1x1x256xf32>
    %181 = vector.shape_cast %180 : vector<1x1x256xf32> to vector<1x256xf32>
    %182 = vector.broadcast %181 : vector<1x256xf32> to vector<16x256xf32>
    %183 = arith.addf %179, %182 : vector<16x256xf32>
    %cst_81 = arith.constant 5.000000e-01 : f32
    %184 = vector.broadcast %cst_81 : f32 to vector<16x256xf32>
    %185 = arith.mulf %184, %183 : vector<16x256xf32>
    %cst_82 = arith.constant 4.471500e-02 : f32
    %186 = vector.broadcast %cst_82 : f32 to vector<16x256xf32>
    %187 = arith.mulf %186, %183 : vector<16x256xf32>
    %188 = arith.mulf %187, %183 : vector<16x256xf32>
    %189 = arith.mulf %188, %183 : vector<16x256xf32>
    %190 = arith.addf %183, %189 : vector<16x256xf32>
    %cst_83 = arith.constant 0.797884583 : f32
    %191 = vector.broadcast %cst_83 : f32 to vector<16x256xf32>
    %192 = arith.mulf %191, %190 : vector<16x256xf32>
    %193 = math.tanh %192 : vector<16x256xf32>
    %cst_84 = arith.constant 1.000000e+00 : f32
    %194 = vector.broadcast %cst_84 : f32 to vector<16x256xf32>
    %195 = arith.addf %194, %193 : vector<16x256xf32>
    %196 = arith.mulf %185, %195 : vector<16x256xf32>
    %197 = arith.truncf %196 : vector<16x256xf32> to vector<16x256xbf16>
    %c0_85 = arith.constant 0 : index
    %c0_86 = arith.constant 0 : index
    %c0_87 = arith.constant 0 : index
    %198 = vector.load %arg12[%c0_85, %c0_86, %c0_87] : memref<2x256x128xbf16, #tpu.memory_space<vmem>>, vector<1x256x128xbf16>
    %199 = vector.shape_cast %198 : vector<1x256x128xbf16> to vector<256x128xbf16>
    %cst_88 = arith.constant dense<0.000000e+00> : vector<16x128xf32>
    %200 = tpu.matmul %197, %199, %cst_88 {dimension_numbers = #tpu.dot_dimension_numbers<[1], [0], [0], [1], [0, 0, 1, 1], [], []>} : vector<16x256xbf16>, vector<256x128xbf16>, vector<16x128xf32> -> vector<16x128xf32>
    %c0_89 = arith.constant 0 : index
    %c0_90 = arith.constant 0 : index
    %c0_91 = arith.constant 0 : index
    %201 = vector.load %arg13[%c0_89, %c0_90, %c0_91] : memref<2x1x128xf32, #tpu.memory_space<vmem>>, vector<1x1x128xf32>
    %202 = vector.shape_cast %201 : vector<1x1x128xf32> to vector<1x128xf32>
    %203 = vector.broadcast %202 : vector<1x128xf32> to vector<16x128xf32>
    %204 = arith.addf %200, %203 : vector<16x128xf32>
    %205 = arith.addf %175, %204 : vector<16x128xf32>
    %c0_92 = arith.constant 0 : index
    %c0_93 = arith.constant 0 : index
    %c0_94 = arith.constant 0 : index
    %206 = vector.load %arg14[%c0_92, %c0_93, %c0_94] : memref<2x1x128xf32, #tpu.memory_space<vmem>>, vector<1x1x128xf32>
    %207 = vector.shape_cast %206 : vector<1x1x128xf32> to vector<1x128xf32>
    %c0_95 = arith.constant 0 : index
    %c0_96 = arith.constant 0 : index
    %c0_97 = arith.constant 0 : index
    %208 = vector.load %arg15[%c0_95, %c0_96, %c0_97] : memref<2x1x128xf32, #tpu.memory_space<vmem>>, vector<1x1x128xf32>
    %209 = vector.shape_cast %208 : vector<1x1x128xf32> to vector<1x128xf32>
    %cst_98 = arith.constant dense<0.000000e+00> : vector<16xf32>
    %210 = vector.multi_reduction <add>, %205, %cst_98 [1] : vector<16x128xf32> to vector<16xf32>
    %211 = vector.shape_cast %210 : vector<16xf32> to vector<16x1xf32>
    %cst_99 = arith.constant 1.280000e+02 : f32
    %212 = vector.broadcast %cst_99 : f32 to vector<16x1xf32>
    %213 = arith.divf %211, %212 : vector<16x1xf32>
    %214 = vector.broadcast %213 : vector<16x1xf32> to vector<16x128xf32>
    %215 = arith.subf %205, %214 : vector<16x128xf32>
    %216 = arith.mulf %215, %215 : vector<16x128xf32>
    %cst_100 = arith.constant dense<0.000000e+00> : vector<16xf32>
    %217 = vector.multi_reduction <add>, %216, %cst_100 [1] : vector<16x128xf32> to vector<16xf32>
    %218 = vector.shape_cast %217 : vector<16xf32> to vector<16x1xf32>
    %cst_101 = arith.constant 1.280000e+02 : f32
    %219 = vector.broadcast %cst_101 : f32 to vector<16x1xf32>
    %220 = arith.divf %218, %219 : vector<16x1xf32>
    %221 = vector.broadcast %213 : vector<16x1xf32> to vector<16x128xf32>
    %222 = arith.subf %205, %221 : vector<16x128xf32>
    %cst_102 = arith.constant 9.99999996E-13 : f32
    %223 = vector.broadcast %cst_102 : f32 to vector<16x1xf32>
    %224 = arith.addf %220, %223 : vector<16x1xf32>
    %225 = math.rsqrt %224 : vector<16x1xf32>
    %226 = vector.broadcast %225 : vector<16x1xf32> to vector<16x128xf32>
    %227 = arith.mulf %222, %226 : vector<16x128xf32>
    %228 = vector.broadcast %207 : vector<1x128xf32> to vector<16x128xf32>
    %229 = arith.mulf %227, %228 : vector<16x128xf32>
    %230 = vector.broadcast %209 : vector<1x128xf32> to vector<16x128xf32>
    %231 = arith.addf %229, %230 : vector<16x128xf32>
    %232 = arith.truncf %231 : vector<16x128xf32> to vector<16x128xbf16>
    %c1_103 = arith.constant 1 : index
    %c0_104 = arith.constant 0 : index
    %c0_105 = arith.constant 0 : index
    %233 = vector.load %arg4[%c1_103, %c0_104, %c0_105] : memref<2x128x384xbf16, #tpu.memory_space<vmem>>, vector<1x128x384xbf16>
    %234 = vector.shape_cast %233 : vector<1x128x384xbf16> to vector<128x384xbf16>
    %cst_106 = arith.constant dense<0.000000e+00> : vector<16x384xf32>
    %235 = tpu.matmul %232, %234, %cst_106 {dimension_numbers = #tpu.dot_dimension_numbers<[1], [0], [0], [1], [0, 0, 1, 1], [], []>} : vector<16x128xbf16>, vector<128x384xbf16>, vector<16x384xf32> -> vector<16x384xf32>
    %c1_107 = arith.constant 1 : index
    %c0_108 = arith.constant 0 : index
    %c0_109 = arith.constant 0 : index
    %236 = vector.load %arg5[%c1_107, %c0_108, %c0_109] : memref<2x1x384xf32, #tpu.memory_space<vmem>>, vector<1x1x384xf32>
    %237 = vector.shape_cast %236 : vector<1x1x384xf32> to vector<1x384xf32>
    %238 = vector.broadcast %237 : vector<1x384xf32> to vector<16x384xf32>
    %239 = arith.addf %235, %238 : vector<16x384xf32>
    %240 = vector.extract_strided_slice %239 {offsets = [0, 0], sizes = [16, 128], strides = [1, 1]} : vector<16x384xf32> to vector<16x128xf32>
    %241 = vector.extract_strided_slice %239 {offsets = [0, 128], sizes = [16, 128], strides = [1, 1]} : vector<16x384xf32> to vector<16x128xf32>
    %242 = vector.extract_strided_slice %239 {offsets = [0, 256], sizes = [16, 128], strides = [1, 1]} : vector<16x384xf32> to vector<16x128xf32>
    %cst_110 = arith.constant 0.000000e+00 : f32
    %243 = vector.broadcast %cst_110 : f32 to vector<16x128xf32>
    %244 = vector.extract_strided_slice %240 {offsets = [0, 0], sizes = [16, 32], strides = [1, 1]} : vector<16x128xf32> to vector<16x32xf32>
    %245 = vector.extract_strided_slice %241 {offsets = [0, 0], sizes = [16, 32], strides = [1, 1]} : vector<16x128xf32> to vector<16x32xf32>
    %246 = vector.extract_strided_slice %242 {offsets = [0, 0], sizes = [16, 32], strides = [1, 1]} : vector<16x128xf32> to vector<16x32xf32>
    %cst_111 = arith.constant dense<0.000000e+00> : vector<16x16xf32>
    %247 = tpu.matmul %244, %245, %cst_111 {dimension_numbers = #tpu.dot_dimension_numbers<[1], [1], [0], [0], [0, 0, 1, 0], [], []>} : vector<16x32xf32>, vector<16x32xf32>, vector<16x16xf32> -> vector<16x16xf32>
    %cst_112 = arith.constant 0.176776692 : f32
    %248 = vector.broadcast %cst_112 : f32 to vector<16x16xf32>
    %249 = arith.mulf %247, %248 : vector<16x16xf32>
    %250 = arith.addf %249, %40 : vector<16x16xf32>
    %cst_113 = arith.constant dense<0xFF800000> : vector<16xf32>
    %251 = vector.multi_reduction <maximumf>, %250, %cst_113 [1] : vector<16x16xf32> to vector<16xf32>
    %252 = vector.shape_cast %251 : vector<16xf32> to vector<16x1xf32>
    %253 = vector.broadcast %252 : vector<16x1xf32> to vector<16x16xf32>
    %254 = arith.subf %250, %253 : vector<16x16xf32>
    %255 = math.exp %254 : vector<16x16xf32>
    %cst_114 = arith.constant dense<0.000000e+00> : vector<16xf32>
    %256 = vector.multi_reduction <add>, %255, %cst_114 [1] : vector<16x16xf32> to vector<16xf32>
    %257 = vector.shape_cast %256 : vector<16xf32> to vector<16x1xf32>
    %258 = tpu.reciprocal %257 {approx = true} : vector<16x1xf32> -> vector<16x1xf32>
    %259 = vector.broadcast %258 : vector<16x1xf32> to vector<16x16xf32>
    %260 = arith.mulf %255, %259 : vector<16x16xf32>
    %cst_115 = arith.constant dense<0.000000e+00> : vector<16x32xf32>
    %261 = tpu.matmul %260, %246, %cst_115 {dimension_numbers = #tpu.dot_dimension_numbers<[1], [0], [0], [1], [0, 0, 1, 1], [], []>} : vector<16x16xf32>, vector<16x32xf32>, vector<16x32xf32> -> vector<16x32xf32>
    %262 = arith.truncf %261 : vector<16x32xf32> to vector<16x32xbf16>
    %c1_116 = arith.constant 1 : index
    %c0_117 = arith.constant 0 : index
    %c0_118 = arith.constant 0 : index
    %c0_119 = arith.constant 0 : index
    %263 = vector.load %arg6[%c1_116, %c0_117, %c0_118, %c0_119] : memref<2x4x32x128xbf16, #tpu.memory_space<vmem>>, vector<1x1x32x128xbf16>
    %264 = vector.shape_cast %263 : vector<1x1x32x128xbf16> to vector<32x128xbf16>
    %cst_120 = arith.constant dense<0.000000e+00> : vector<16x128xf32>
    %265 = tpu.matmul %262, %264, %cst_120 {dimension_numbers = #tpu.dot_dimension_numbers<[1], [0], [0], [1], [0, 0, 1, 1], [], []>} : vector<16x32xbf16>, vector<32x128xbf16>, vector<16x128xf32> -> vector<16x128xf32>
    %266 = arith.addf %243, %265 : vector<16x128xf32>
    %267 = vector.extract_strided_slice %240 {offsets = [0, 32], sizes = [16, 32], strides = [1, 1]} : vector<16x128xf32> to vector<16x32xf32>
    %268 = vector.extract_strided_slice %241 {offsets = [0, 32], sizes = [16, 32], strides = [1, 1]} : vector<16x128xf32> to vector<16x32xf32>
    %269 = vector.extract_strided_slice %242 {offsets = [0, 32], sizes = [16, 32], strides = [1, 1]} : vector<16x128xf32> to vector<16x32xf32>
    %cst_121 = arith.constant dense<0.000000e+00> : vector<16x16xf32>
    %270 = tpu.matmul %267, %268, %cst_121 {dimension_numbers = #tpu.dot_dimension_numbers<[1], [1], [0], [0], [0, 0, 1, 0], [], []>} : vector<16x32xf32>, vector<16x32xf32>, vector<16x16xf32> -> vector<16x16xf32>
    %cst_122 = arith.constant 0.176776692 : f32
    %271 = vector.broadcast %cst_122 : f32 to vector<16x16xf32>
    %272 = arith.mulf %270, %271 : vector<16x16xf32>
    %273 = arith.addf %272, %40 : vector<16x16xf32>
    %cst_123 = arith.constant dense<0xFF800000> : vector<16xf32>
    %274 = vector.multi_reduction <maximumf>, %273, %cst_123 [1] : vector<16x16xf32> to vector<16xf32>
    %275 = vector.shape_cast %274 : vector<16xf32> to vector<16x1xf32>
    %276 = vector.broadcast %275 : vector<16x1xf32> to vector<16x16xf32>
    %277 = arith.subf %273, %276 : vector<16x16xf32>
    %278 = math.exp %277 : vector<16x16xf32>
    %cst_124 = arith.constant dense<0.000000e+00> : vector<16xf32>
    %279 = vector.multi_reduction <add>, %278, %cst_124 [1] : vector<16x16xf32> to vector<16xf32>
    %280 = vector.shape_cast %279 : vector<16xf32> to vector<16x1xf32>
    %281 = tpu.reciprocal %280 {approx = true} : vector<16x1xf32> -> vector<16x1xf32>
    %282 = vector.broadcast %281 : vector<16x1xf32> to vector<16x16xf32>
    %283 = arith.mulf %278, %282 : vector<16x16xf32>
    %cst_125 = arith.constant dense<0.000000e+00> : vector<16x32xf32>
    %284 = tpu.matmul %283, %269, %cst_125 {dimension_numbers = #tpu.dot_dimension_numbers<[1], [0], [0], [1], [0, 0, 1, 1], [], []>} : vector<16x16xf32>, vector<16x32xf32>, vector<16x32xf32> -> vector<16x32xf32>
    %285 = arith.truncf %284 : vector<16x32xf32> to vector<16x32xbf16>
    %c1_126 = arith.constant 1 : index
    %c1_127 = arith.constant 1 : index
    %c0_128 = arith.constant 0 : index
    %c0_129 = arith.constant 0 : index
    %286 = vector.load %arg6[%c1_126, %c1_127, %c0_128, %c0_129] : memref<2x4x32x128xbf16, #tpu.memory_space<vmem>>, vector<1x1x32x128xbf16>
    %287 = vector.shape_cast %286 : vector<1x1x32x128xbf16> to vector<32x128xbf16>
    %cst_130 = arith.constant dense<0.000000e+00> : vector<16x128xf32>
    %288 = tpu.matmul %285, %287, %cst_130 {dimension_numbers = #tpu.dot_dimension_numbers<[1], [0], [0], [1], [0, 0, 1, 1], [], []>} : vector<16x32xbf16>, vector<32x128xbf16>, vector<16x128xf32> -> vector<16x128xf32>
    %289 = arith.addf %266, %288 : vector<16x128xf32>
    %290 = vector.extract_strided_slice %240 {offsets = [0, 64], sizes = [16, 32], strides = [1, 1]} : vector<16x128xf32> to vector<16x32xf32>
    %291 = vector.extract_strided_slice %241 {offsets = [0, 64], sizes = [16, 32], strides = [1, 1]} : vector<16x128xf32> to vector<16x32xf32>
    %292 = vector.extract_strided_slice %242 {offsets = [0, 64], sizes = [16, 32], strides = [1, 1]} : vector<16x128xf32> to vector<16x32xf32>
    %cst_131 = arith.constant dense<0.000000e+00> : vector<16x16xf32>
    %293 = tpu.matmul %290, %291, %cst_131 {dimension_numbers = #tpu.dot_dimension_numbers<[1], [1], [0], [0], [0, 0, 1, 0], [], []>} : vector<16x32xf32>, vector<16x32xf32>, vector<16x16xf32> -> vector<16x16xf32>
    %cst_132 = arith.constant 0.176776692 : f32
    %294 = vector.broadcast %cst_132 : f32 to vector<16x16xf32>
    %295 = arith.mulf %293, %294 : vector<16x16xf32>
    %296 = arith.addf %295, %40 : vector<16x16xf32>
    %cst_133 = arith.constant dense<0xFF800000> : vector<16xf32>
    %297 = vector.multi_reduction <maximumf>, %296, %cst_133 [1] : vector<16x16xf32> to vector<16xf32>
    %298 = vector.shape_cast %297 : vector<16xf32> to vector<16x1xf32>
    %299 = vector.broadcast %298 : vector<16x1xf32> to vector<16x16xf32>
    %300 = arith.subf %296, %299 : vector<16x16xf32>
    %301 = math.exp %300 : vector<16x16xf32>
    %cst_134 = arith.constant dense<0.000000e+00> : vector<16xf32>
    %302 = vector.multi_reduction <add>, %301, %cst_134 [1] : vector<16x16xf32> to vector<16xf32>
    %303 = vector.shape_cast %302 : vector<16xf32> to vector<16x1xf32>
    %304 = tpu.reciprocal %303 {approx = true} : vector<16x1xf32> -> vector<16x1xf32>
    %305 = vector.broadcast %304 : vector<16x1xf32> to vector<16x16xf32>
    %306 = arith.mulf %301, %305 : vector<16x16xf32>
    %cst_135 = arith.constant dense<0.000000e+00> : vector<16x32xf32>
    %307 = tpu.matmul %306, %292, %cst_135 {dimension_numbers = #tpu.dot_dimension_numbers<[1], [0], [0], [1], [0, 0, 1, 1], [], []>} : vector<16x16xf32>, vector<16x32xf32>, vector<16x32xf32> -> vector<16x32xf32>
    %308 = arith.truncf %307 : vector<16x32xf32> to vector<16x32xbf16>
    %c1_136 = arith.constant 1 : index
    %c2_137 = arith.constant 2 : index
    %c0_138 = arith.constant 0 : index
    %c0_139 = arith.constant 0 : index
    %309 = vector.load %arg6[%c1_136, %c2_137, %c0_138, %c0_139] : memref<2x4x32x128xbf16, #tpu.memory_space<vmem>>, vector<1x1x32x128xbf16>
    %310 = vector.shape_cast %309 : vector<1x1x32x128xbf16> to vector<32x128xbf16>
    %cst_140 = arith.constant dense<0.000000e+00> : vector<16x128xf32>
    %311 = tpu.matmul %308, %310, %cst_140 {dimension_numbers = #tpu.dot_dimension_numbers<[1], [0], [0], [1], [0, 0, 1, 1], [], []>} : vector<16x32xbf16>, vector<32x128xbf16>, vector<16x128xf32> -> vector<16x128xf32>
    %312 = arith.addf %289, %311 : vector<16x128xf32>
    %313 = vector.extract_strided_slice %240 {offsets = [0, 96], sizes = [16, 32], strides = [1, 1]} : vector<16x128xf32> to vector<16x32xf32>
    %314 = vector.extract_strided_slice %241 {offsets = [0, 96], sizes = [16, 32], strides = [1, 1]} : vector<16x128xf32> to vector<16x32xf32>
    %315 = vector.extract_strided_slice %242 {offsets = [0, 96], sizes = [16, 32], strides = [1, 1]} : vector<16x128xf32> to vector<16x32xf32>
    %cst_141 = arith.constant dense<0.000000e+00> : vector<16x16xf32>
    %316 = tpu.matmul %313, %314, %cst_141 {dimension_numbers = #tpu.dot_dimension_numbers<[1], [1], [0], [0], [0, 0, 1, 0], [], []>} : vector<16x32xf32>, vector<16x32xf32>, vector<16x16xf32> -> vector<16x16xf32>
    %cst_142 = arith.constant 0.176776692 : f32
    %317 = vector.broadcast %cst_142 : f32 to vector<16x16xf32>
    %318 = arith.mulf %316, %317 : vector<16x16xf32>
    %319 = arith.addf %318, %40 : vector<16x16xf32>
    %cst_143 = arith.constant dense<0xFF800000> : vector<16xf32>
    %320 = vector.multi_reduction <maximumf>, %319, %cst_143 [1] : vector<16x16xf32> to vector<16xf32>
    %321 = vector.shape_cast %320 : vector<16xf32> to vector<16x1xf32>
    %322 = vector.broadcast %321 : vector<16x1xf32> to vector<16x16xf32>
    %323 = arith.subf %319, %322 : vector<16x16xf32>
    %324 = math.exp %323 : vector<16x16xf32>
    %cst_144 = arith.constant dense<0.000000e+00> : vector<16xf32>
    %325 = vector.multi_reduction <add>, %324, %cst_144 [1] : vector<16x16xf32> to vector<16xf32>
    %326 = vector.shape_cast %325 : vector<16xf32> to vector<16x1xf32>
    %327 = tpu.reciprocal %326 {approx = true} : vector<16x1xf32> -> vector<16x1xf32>
    %328 = vector.broadcast %327 : vector<16x1xf32> to vector<16x16xf32>
    %329 = arith.mulf %324, %328 : vector<16x16xf32>
    %cst_145 = arith.constant dense<0.000000e+00> : vector<16x32xf32>
    %330 = tpu.matmul %329, %315, %cst_145 {dimension_numbers = #tpu.dot_dimension_numbers<[1], [0], [0], [1], [0, 0, 1, 1], [], []>} : vector<16x16xf32>, vector<16x32xf32>, vector<16x32xf32> -> vector<16x32xf32>
    %331 = arith.truncf %330 : vector<16x32xf32> to vector<16x32xbf16>
    %c1_146 = arith.constant 1 : index
    %c3_147 = arith.constant 3 : index
    %c0_148 = arith.constant 0 : index
    %c0_149 = arith.constant 0 : index
    %332 = vector.load %arg6[%c1_146, %c3_147, %c0_148, %c0_149] : memref<2x4x32x128xbf16, #tpu.memory_space<vmem>>, vector<1x1x32x128xbf16>
    %333 = vector.shape_cast %332 : vector<1x1x32x128xbf16> to vector<32x128xbf16>
    %cst_150 = arith.constant dense<0.000000e+00> : vector<16x128xf32>
    %334 = tpu.matmul %331, %333, %cst_150 {dimension_numbers = #tpu.dot_dimension_numbers<[1], [0], [0], [1], [0, 0, 1, 1], [], []>} : vector<16x32xbf16>, vector<32x128xbf16>, vector<16x128xf32> -> vector<16x128xf32>
    %335 = arith.addf %312, %334 : vector<16x128xf32>
    %c1_151 = arith.constant 1 : index
    %c0_152 = arith.constant 0 : index
    %c0_153 = arith.constant 0 : index
    %336 = vector.load %arg7[%c1_151, %c0_152, %c0_153] : memref<2x1x128xf32, #tpu.memory_space<vmem>>, vector<1x1x128xf32>
    %337 = vector.shape_cast %336 : vector<1x1x128xf32> to vector<1x128xf32>
    %338 = vector.broadcast %337 : vector<1x128xf32> to vector<16x128xf32>
    %339 = arith.addf %335, %338 : vector<16x128xf32>
    %340 = arith.addf %231, %339 : vector<16x128xf32>
    %c1_154 = arith.constant 1 : index
    %c0_155 = arith.constant 0 : index
    %c0_156 = arith.constant 0 : index
    %341 = vector.load %arg8[%c1_154, %c0_155, %c0_156] : memref<2x1x128xf32, #tpu.memory_space<vmem>>, vector<1x1x128xf32>
    %342 = vector.shape_cast %341 : vector<1x1x128xf32> to vector<1x128xf32>
    %c1_157 = arith.constant 1 : index
    %c0_158 = arith.constant 0 : index
    %c0_159 = arith.constant 0 : index
    %343 = vector.load %arg9[%c1_157, %c0_158, %c0_159] : memref<2x1x128xf32, #tpu.memory_space<vmem>>, vector<1x1x128xf32>
    %344 = vector.shape_cast %343 : vector<1x1x128xf32> to vector<1x128xf32>
    %cst_160 = arith.constant dense<0.000000e+00> : vector<16xf32>
    %345 = vector.multi_reduction <add>, %340, %cst_160 [1] : vector<16x128xf32> to vector<16xf32>
    %346 = vector.shape_cast %345 : vector<16xf32> to vector<16x1xf32>
    %cst_161 = arith.constant 1.280000e+02 : f32
    %347 = vector.broadcast %cst_161 : f32 to vector<16x1xf32>
    %348 = arith.divf %346, %347 : vector<16x1xf32>
    %349 = vector.broadcast %348 : vector<16x1xf32> to vector<16x128xf32>
    %350 = arith.subf %340, %349 : vector<16x128xf32>
    %351 = arith.mulf %350, %350 : vector<16x128xf32>
    %cst_162 = arith.constant dense<0.000000e+00> : vector<16xf32>
    %352 = vector.multi_reduction <add>, %351, %cst_162 [1] : vector<16x128xf32> to vector<16xf32>
    %353 = vector.shape_cast %352 : vector<16xf32> to vector<16x1xf32>
    %cst_163 = arith.constant 1.280000e+02 : f32
    %354 = vector.broadcast %cst_163 : f32 to vector<16x1xf32>
    %355 = arith.divf %353, %354 : vector<16x1xf32>
    %356 = vector.broadcast %348 : vector<16x1xf32> to vector<16x128xf32>
    %357 = arith.subf %340, %356 : vector<16x128xf32>
    %cst_164 = arith.constant 9.99999996E-13 : f32
    %358 = vector.broadcast %cst_164 : f32 to vector<16x1xf32>
    %359 = arith.addf %355, %358 : vector<16x1xf32>
    %360 = math.rsqrt %359 : vector<16x1xf32>
    %361 = vector.broadcast %360 : vector<16x1xf32> to vector<16x128xf32>
    %362 = arith.mulf %357, %361 : vector<16x128xf32>
    %363 = vector.broadcast %342 : vector<1x128xf32> to vector<16x128xf32>
    %364 = arith.mulf %362, %363 : vector<16x128xf32>
    %365 = vector.broadcast %344 : vector<1x128xf32> to vector<16x128xf32>
    %366 = arith.addf %364, %365 : vector<16x128xf32>
    %367 = arith.truncf %366 : vector<16x128xf32> to vector<16x128xbf16>
    %c1_165 = arith.constant 1 : index
    %c0_166 = arith.constant 0 : index
    %c0_167 = arith.constant 0 : index
    %368 = vector.load %arg10[%c1_165, %c0_166, %c0_167] : memref<2x128x256xbf16, #tpu.memory_space<vmem>>, vector<1x128x256xbf16>
    %369 = vector.shape_cast %368 : vector<1x128x256xbf16> to vector<128x256xbf16>
    %cst_168 = arith.constant dense<0.000000e+00> : vector<16x256xf32>
    %370 = tpu.matmul %367, %369, %cst_168 {dimension_numbers = #tpu.dot_dimension_numbers<[1], [0], [0], [1], [0, 0, 1, 1], [], []>} : vector<16x128xbf16>, vector<128x256xbf16>, vector<16x256xf32> -> vector<16x256xf32>
    %c1_169 = arith.constant 1 : index
    %c0_170 = arith.constant 0 : index
    %c0_171 = arith.constant 0 : index
    %371 = vector.load %arg11[%c1_169, %c0_170, %c0_171] : memref<2x1x256xf32, #tpu.memory_space<vmem>>, vector<1x1x256xf32>
    %372 = vector.shape_cast %371 : vector<1x1x256xf32> to vector<1x256xf32>
    %373 = vector.broadcast %372 : vector<1x256xf32> to vector<16x256xf32>
    %374 = arith.addf %370, %373 : vector<16x256xf32>
    %cst_172 = arith.constant 5.000000e-01 : f32
    %375 = vector.broadcast %cst_172 : f32 to vector<16x256xf32>
    %376 = arith.mulf %375, %374 : vector<16x256xf32>
    %cst_173 = arith.constant 4.471500e-02 : f32
    %377 = vector.broadcast %cst_173 : f32 to vector<16x256xf32>
    %378 = arith.mulf %377, %374 : vector<16x256xf32>
    %379 = arith.mulf %378, %374 : vector<16x256xf32>
    %380 = arith.mulf %379, %374 : vector<16x256xf32>
    %381 = arith.addf %374, %380 : vector<16x256xf32>
    %cst_174 = arith.constant 0.797884583 : f32
    %382 = vector.broadcast %cst_174 : f32 to vector<16x256xf32>
    %383 = arith.mulf %382, %381 : vector<16x256xf32>
    %384 = math.tanh %383 : vector<16x256xf32>
    %cst_175 = arith.constant 1.000000e+00 : f32
    %385 = vector.broadcast %cst_175 : f32 to vector<16x256xf32>
    %386 = arith.addf %385, %384 : vector<16x256xf32>
    %387 = arith.mulf %376, %386 : vector<16x256xf32>
    %388 = arith.truncf %387 : vector<16x256xf32> to vector<16x256xbf16>
    %c1_176 = arith.constant 1 : index
    %c0_177 = arith.constant 0 : index
    %c0_178 = arith.constant 0 : index
    %389 = vector.load %arg12[%c1_176, %c0_177, %c0_178] : memref<2x256x128xbf16, #tpu.memory_space<vmem>>, vector<1x256x128xbf16>
    %390 = vector.shape_cast %389 : vector<1x256x128xbf16> to vector<256x128xbf16>
    %cst_179 = arith.constant dense<0.000000e+00> : vector<16x128xf32>
    %391 = tpu.matmul %388, %390, %cst_179 {dimension_numbers = #tpu.dot_dimension_numbers<[1], [0], [0], [1], [0, 0, 1, 1], [], []>} : vector<16x256xbf16>, vector<256x128xbf16>, vector<16x128xf32> -> vector<16x128xf32>
    %c1_180 = arith.constant 1 : index
    %c0_181 = arith.constant 0 : index
    %c0_182 = arith.constant 0 : index
    %392 = vector.load %arg13[%c1_180, %c0_181, %c0_182] : memref<2x1x128xf32, #tpu.memory_space<vmem>>, vector<1x1x128xf32>
    %393 = vector.shape_cast %392 : vector<1x1x128xf32> to vector<1x128xf32>
    %394 = vector.broadcast %393 : vector<1x128xf32> to vector<16x128xf32>
    %395 = arith.addf %391, %394 : vector<16x128xf32>
    %396 = arith.addf %366, %395 : vector<16x128xf32>
    %c1_183 = arith.constant 1 : index
    %c0_184 = arith.constant 0 : index
    %c0_185 = arith.constant 0 : index
    %397 = vector.load %arg14[%c1_183, %c0_184, %c0_185] : memref<2x1x128xf32, #tpu.memory_space<vmem>>, vector<1x1x128xf32>
    %398 = vector.shape_cast %397 : vector<1x1x128xf32> to vector<1x128xf32>
    %c1_186 = arith.constant 1 : index
    %c0_187 = arith.constant 0 : index
    %c0_188 = arith.constant 0 : index
    %399 = vector.load %arg15[%c1_186, %c0_187, %c0_188] : memref<2x1x128xf32, #tpu.memory_space<vmem>>, vector<1x1x128xf32>
    %400 = vector.shape_cast %399 : vector<1x1x128xf32> to vector<1x128xf32>
    %cst_189 = arith.constant dense<0.000000e+00> : vector<16xf32>
    %401 = vector.multi_reduction <add>, %396, %cst_189 [1] : vector<16x128xf32> to vector<16xf32>
    %402 = vector.shape_cast %401 : vector<16xf32> to vector<16x1xf32>
    %cst_190 = arith.constant 1.280000e+02 : f32
    %403 = vector.broadcast %cst_190 : f32 to vector<16x1xf32>
    %404 = arith.divf %402, %403 : vector<16x1xf32>
    %405 = vector.broadcast %404 : vector<16x1xf32> to vector<16x128xf32>
    %406 = arith.subf %396, %405 : vector<16x128xf32>
    %407 = arith.mulf %406, %406 : vector<16x128xf32>
    %cst_191 = arith.constant dense<0.000000e+00> : vector<16xf32>
    %408 = vector.multi_reduction <add>, %407, %cst_191 [1] : vector<16x128xf32> to vector<16xf32>
    %409 = vector.shape_cast %408 : vector<16xf32> to vector<16x1xf32>
    %cst_192 = arith.constant 1.280000e+02 : f32
    %410 = vector.broadcast %cst_192 : f32 to vector<16x1xf32>
    %411 = arith.divf %409, %410 : vector<16x1xf32>
    %412 = vector.broadcast %404 : vector<16x1xf32> to vector<16x128xf32>
    %413 = arith.subf %396, %412 : vector<16x128xf32>
    %cst_193 = arith.constant 9.99999996E-13 : f32
    %414 = vector.broadcast %cst_193 : f32 to vector<16x1xf32>
    %415 = arith.addf %411, %414 : vector<16x1xf32>
    %416 = math.rsqrt %415 : vector<16x1xf32>
    %417 = vector.broadcast %416 : vector<16x1xf32> to vector<16x128xf32>
    %418 = arith.mulf %413, %417 : vector<16x128xf32>
    %419 = vector.broadcast %398 : vector<1x128xf32> to vector<16x128xf32>
    %420 = arith.mulf %418, %419 : vector<16x128xf32>
    %421 = vector.broadcast %400 : vector<1x128xf32> to vector<16x128xf32>
    %422 = arith.addf %420, %421 : vector<16x128xf32>
    %423 = vector.extract_strided_slice %422 {offsets = [0, 0], sizes = [1, 128], strides = [1, 1]} : vector<16x128xf32> to vector<1x128xf32>
    %424 = vector.extract_strided_slice %422 {offsets = [8, 0], sizes = [1, 128], strides = [1, 1]} : vector<16x128xf32> to vector<1x128xf32>
    %425 = tpu.concatenate %423, %424 in 0 : vector<1x128xf32>, vector<1x128xf32> -> vector<2x128xf32>
    %426 = arith.truncf %425 : vector<2x128xf32> to vector<2x128xbf16>
    %c0_194 = arith.constant 0 : index
    %c0_195 = arith.constant 0 : index
    %427 = vector.load %arg16[%c0_194, %c0_195] : memref<128x128xbf16, #tpu.memory_space<vmem>>, vector<128x128xbf16>
    %cst_196 = arith.constant dense<0.000000e+00> : vector<2x128xf32>
    %428 = tpu.matmul %426, %427, %cst_196 {dimension_numbers = #tpu.dot_dimension_numbers<[1], [0], [0], [1], [0, 0, 1, 1], [], []>} : vector<2x128xbf16>, vector<128x128xbf16>, vector<2x128xf32> -> vector<2x128xf32>
    %c0_197 = arith.constant 0 : index
    %c0_198 = arith.constant 0 : index
    %429 = vector.load %arg17[%c0_197, %c0_198] : memref<1x128xf32, #tpu.memory_space<vmem>>, vector<1x128xf32>
    %430 = vector.broadcast %429 : vector<1x128xf32> to vector<2x128xf32>
    %431 = arith.addf %428, %430 : vector<2x128xf32>
    %432 = math.tanh %431 : vector<2x128xf32>
    %c0_199 = arith.constant 0 : index
    %c0_200 = arith.constant 0 : index
    %433 = vector.load %arg18[%c0_199, %c0_200] : memref<2x128xf32, #tpu.memory_space<vmem>>, vector<2x128xf32>
    tpu.vector_store %arg18[%c0_199, %c0_200], %432 {strides = array<i32>} : memref<2x128xf32, #tpu.memory_space<vmem>>, vector<2x128xf32>,
    return
  }
}

</mosaic_0001>

<bundles_post_ra>
// kernel: tpu_custom_call.1
= control target key start
LH: loop header
LB: loop body
LE: loop exit
PB: predicated region body
PF: predicated region fallthrough
CT: control target
= control target key end

     0   :  { %s5873_s0 = inlined_call_operand.hbm [shape: f32[16,128], index: 0, kind: input, shape index: {}]   ;;  %s5874_s1 = inlined_call_operand.hbm [shape: f32[1,16], index: 1, kind: input, shape index: {}]   ;;  %s5875_s2 = inlined_call_operand.hbm [shape: f32[1,128], index: 2, kind: input, shape index: {}]   ;;  %s5876_s3 = inlined_call_operand.hbm [shape: f32[1,128], index: 3, kind: input, shape index: {}]   ;;  %s5877_s4 = inlined_call_operand.hbm [shape: bf16[2,128,384], index: 4, kind: input, shape index: {}]   ;;  %s5878_s5 = inlined_call_operand.vmem [shape: f32[2,1,384], index: 5, kind: input, shape index: {}]   ;;  %s5879_s6 = inlined_call_operand.hbm [shape: bf16[2,4,32,128], index: 6, kind: input, shape index: {}]   ;;  %s5880_s7 = inlined_call_operand.vmem [shape: f32[2,1,128], index: 7, kind: input, shape index: {}]   ;;  %s5881_s8 = inlined_call_operand.vmem [shape: f32[2,1,128], index: 8, kind: input, shape index: {}]   ;;  %s5882_s9 = inlined_call_operand.vmem [shape: f32[2,1,128], index: 9, kind: input, shape index: {}]   ;;  %s5883_s10 = inlined_call_operand.hbm [shape: bf16[2,128,256], index: 10, kind: input, shape index: {}]   ;;  %s5884_s11 = inlined_call_operand.vmem [shape: f32[2,1,256], index: 11, kind: input, shape index: {}]   ;;  %s5885_s12 = inlined_call_operand.hbm [shape: bf16[2,256,128], index: 12, kind: input, shape index: {}]   ;;  %s5886_s13 = inlined_call_operand.vmem [shape: f32[2,1,128], index: 13, kind: input, shape index: {}]   ;;  %s5887_s14 = inlined_call_operand.vmem [shape: f32[2,1,128], index: 14, kind: input, shape index: {}]   ;;  %s5888_s15 = inlined_call_operand.vmem [shape: f32[2,1,128], index: 15, kind: input, shape index: {}]   ;;  %s5889_s16 = inlined_call_operand.hbm [shape: bf16[128,128], index: 16, kind: input, shape index: {}]   ;;  %s5890_s17 = inlined_call_operand.vmem [shape: f32[1,128], index: 17, kind: input, shape index: {}]   ;;  %s5891_s18 = inlined_call_operand.hbm [shape: f32[2,128], index: 18, kind: output, shape index: {}]  }
   0x1   :  { %5898 = sst [smem:[#allocation24_spill]] %s5873_s0 }
   0x2   :  { %5899 = sst [smem:[#allocation25_spill]] %s5874_s1 }
   0x3   :  { %5900 = sst [smem:[#allocation26_spill]] %s5875_s2 }
   0x4   :  { %23 = vsyncpa [#allocation3], 0 }
   0x5   :  { %24 = vsyncpa [#allocation6], 0 }
   0x6   :  { %25 = vsyncpa [#allocation9], 0 }
   0x7   :  { %26 = vsyncpa [#allocation12], 0 }
   0x8   :  { %27 = vsyncpa [#allocation15], 0 }
   0x9   :  { %28 = vsyncpa [#allocation4], 0  ;;  %s5229_s27 = smov [#allocation5]   ;;  %s5230_s29 = smov [#allocation8]  }
   0xa   :  { %s47_s28 = sshll.u32 %s5229_s27, 4  ;;  %s67_s30 = sshll.u32 %s5230_s29, 4  ;;  %s48_s28 = int_to_ptr.vmem [resolvable:$true] %s47_s28  ;;  %s68_s30 = int_to_ptr.vmem [resolvable:$true] %s67_s30 }
   0xb   :  { %s5901_s1 = sld [smem:[#allocation25_spill]] }
  0x11   :  { %s4997_s20 = scalar_lea.hbm %s5901_s1, 16 }
  0x12   :  { %p4998_p0 = scmp.ne.s32.totalorder %s5901_s1, %s4997_s20  ;;  %p5001_p1 = scmp.lt.u32.totalorder %s4997_s20, %s5901_s1 }
  0x14   :  { %p5003_p2 = pnand %p5001_p1, %p4998_p0 }
  0x16   :  { %5006 = shalt.err (!%p5003_p2)
}
  0x17   :  { %s5007_s24 = scalar_lea.vmem %s48_s28, 16  ;;  %s5011_s25 = scalar_lea.vmem %s48_s28, 32 }
  0x18   :  { %p5008_p3 = scmp.ne.s32.totalorder %s48_s28, %s5007_s24  ;;  %p5012_p4 = scmp.lt.s32.totalorder %s48_s28, %s48_s28 }
  0x19   :  { %p5013_p5 = scmp.lt.s32.totalorder %s5011_s25, %s5007_s24 }
  0x1b   :  { %p5014_p6 = por %p5013_p5, %p5012_p4 }
  0x1d   :  { %p5015_p7 = pnand %p5014_p6, %p5008_p3 }
  0x1f   :  { %5018 = shalt.err (!%p5015_p7)
}
  0x20   :  { %50 = dma.hbm_to_vmem [thread:$0]  %s5901_s1, 16, %s48_s28, [#allocation6]  }
  0x21   :  { %s5019_s19 = scalar_lea.hbm %s5876_s3, 16 }
  0x22   :  { %p5020_p8 = scmp.ne.s32.totalorder %s5876_s3, %s5019_s19  ;;  %p5023_p9 = scmp.lt.u32.totalorder %s5019_s19, %s5876_s3 }
  0x24   :  { %p5025_p10 = pnand %p5023_p9, %p5020_p8 }
  0x26   :  { %5028 = shalt.err (!%p5025_p10)
}
  0x27   :  { %s5029_s23 = scalar_lea.vmem %s68_s30, 16  ;;  %s5033_s24 = scalar_lea.vmem %s68_s30, 32 }
  0x28   :  { %p5030_p11 = scmp.ne.s32.totalorder %s68_s30, %s5029_s23  ;;  %p5034_p12 = scmp.lt.s32.totalorder %s68_s30, %s68_s30 }
  0x29   :  { %p5035_p13 = scmp.lt.s32.totalorder %s5033_s24, %s5029_s23 }
  0x2b   :  { %p5036_p0 = por %p5035_p13, %p5034_p12 }
  0x2d   :  { %p5037_p1 = pnand %p5036_p0, %p5030_p11 }
  0x2f   :  { %5040 = shalt.err (!%p5037_p1)
}
  0x30   :  { %70 = dma.hbm_to_vmem [thread:$0]  %s5876_s3, 16, %s68_s30, [#allocation9]  }
  0x31   :  { %s5231_s25 = smov [#allocation11]   ;;  %s5041_s0 = scalar_lea.hbm %s5879_s6, 2048 }
  0x32   :  { %s90_s26 = sshll.u32 %s5231_s25, 4  ;;  %p5042_p2 = scmp.ne.s32.totalorder %s5879_s6, %s5041_s0  ;;  %s91_s26 = int_to_ptr.vmem [resolvable:$true] %s90_s26 }
  0x33   :  { %p5045_p3 = scmp.lt.u32.totalorder %s5041_s0, %s5879_s6 }
  0x35   :  { %p5047_p4 = pnand %p5045_p3, %p5042_p2 }
  0x37   :  { %5050 = shalt.err (!%p5047_p4)
}
  0x38   :  { %s5051_s2 = scalar_lea.vmem %s91_s26, 2048  ;;  %p5056_p6 = scmp.lt.s32.totalorder %s91_s26, %s91_s26 }
  0x39   :  { %p5052_p5 = scmp.ne.s32.totalorder %s91_s26, %s5051_s2  ;;  %p5057_p7 = scmp.lt.s32.totalorder %s5051_s2, %s5051_s2 }
  0x3b   :  { %p5058_p8 = por %p5057_p7, %p5056_p6 }
  0x3d   :  { %p5059_p9 = pnand %p5058_p8, %p5052_p5 }
  0x3f   :  { %5062 = shalt.err (!%p5059_p9)
}
  0x40   :  { %s5895_s3 = smov 64   ;;  %s5897_s30 = smov 4  }
  0x41   :  { %96 = dma.hbm_to_vmem [thread:$0]  %s5879_s6, 2048, %s91_s26, [#allocation12], %s5895_s3, %s5895_s3, %s5897_s30  }
  0x42   :  { %s5234_s28 = smov [#allocation14]   ;;  %s5235_s25 = smov [#allocation2]  }
  0x43   :  { %s122_s1 = sshll.u32 %s5234_s28, 4  ;;  %s34_s27 = sshll.u32 %s5235_s25, 4  ;;  %s123_s1 = int_to_ptr.vmem [resolvable:$true] %s122_s1  ;;  %s35_s27 = int_to_ptr.vmem [resolvable:$true] %s34_s27 }
  0x44   :  { %s5063_s19 = scalar_lea.hbm %s5885_s12, 4096 }
  0x45   :  { %p5064_p10 = scmp.ne.s32.totalorder %s5885_s12, %s5063_s19  ;;  %p5067_p11 = scmp.lt.u32.totalorder %s5063_s19, %s5885_s12 }
  0x47   :  { %p5069_p12 = pnand %p5067_p11, %p5064_p10 }
  0x49   :  { %5072 = shalt.err (!%p5069_p12)
}
  0x4a   :  { %s5073_s6 = scalar_lea.vmem %s123_s1, 4096  ;;  %p5078_p0 = scmp.lt.s32.totalorder %s123_s1, %s123_s1 }
  0x4b   :  { %p5074_p13 = scmp.ne.s32.totalorder %s123_s1, %s5073_s6  ;;  %p5079_p1 = scmp.lt.s32.totalorder %s5073_s6, %s5073_s6 }
  0x4d   :  { %p5080_p2 = por %p5079_p1, %p5078_p0 }
  0x4f   :  { %p5081_p3 = pnand %p5080_p2, %p5074_p13 }
  0x51   :  { %5084 = shalt.err (!%p5081_p3)
}
  0x52   :  { %128 = dma.hbm_to_vmem [thread:$0]  %s5885_s12, 4096, %s123_s1, [#allocation15], %s5895_s3, %s5895_s3, %s5897_s30  }
  0x53   :  { %s5902_s25 = sld [smem:[#allocation24_spill]] }
  0x59   :  { %s5085_s29 = scalar_lea.hbm %s5902_s25, 256 }
  0x5a   :  { %p5086_p4 = scmp.ne.s32.totalorder %s5902_s25, %s5085_s29  ;;  %p5089_p5 = scmp.lt.u32.totalorder %s5085_s29, %s5902_s25 }
  0x5c   :  { %p5091_p6 = pnand %p5089_p5, %p5086_p4 }
  0x5e   :  { %5094 = shalt.err (!%p5091_p6)
}
  0x5f   :  { %s5095_s22 = scalar_lea.vmem %s35_s27, 256  ;;  %p5100_p8 = scmp.lt.s32.totalorder %s35_s27, %s35_s27 }
  0x60   :  { %p5096_p7 = scmp.ne.s32.totalorder %s35_s27, %s5095_s22  ;;  %p5101_p9 = scmp.lt.s32.totalorder %s5095_s22, %s5095_s22 }
  0x62   :  { %p5102_p10 = por %p5101_p9, %p5100_p8 }
  0x64   :  { %p5103_p11 = pnand %p5102_p10, %p5096_p7 }
  0x66   :  { %5106 = shalt.err (!%p5103_p11)
}
  0x67   :  { %s5236_s12 = smov 128   ;;  %s5237_s1 = smov 8  }
  0x68   :  { %40 = dma.hbm_to_vmem [thread:$0]  %s5902_s25, 256, %s35_s27, [#allocation3], %s5236_s12, %s5236_s12, %s5237_s1  }
  0x69   :  { %s5238_s26 = smov [#allocation7]   ;;  %s5239_s24 = smov [#allocation10]  }
  0x6a   :  { %s57_s23 = sshll.u32 %s5238_s26, 4  ;;  %s76_s28 = sshll.u32 %s5239_s24, 4  ;;  %s58_s23 = int_to_ptr.vmem [resolvable:$true] %s57_s23  ;;  %s77_s28 = int_to_ptr.vmem [resolvable:$true] %s76_s28 }
  0x6b   :  { %s5903_s19 = sld [smem:[#allocation26_spill]] }
  0x71   :  { %s5107_s21 = scalar_lea.hbm %s5903_s19, 16 }
  0x72   :  { %p5108_p12 = scmp.ne.s32.totalorder %s5903_s19, %s5107_s21  ;;  %p5111_p13 = scmp.lt.u32.totalorder %s5107_s21, %s5903_s19 }
  0x74   :  { %p5113_p0 = pnand %p5111_p13, %p5108_p12 }
  0x76   :  { %5116 = shalt.err (!%p5113_p0)
}
  0x77   :  { %s5117_s27 = scalar_lea.vmem %s58_s23, 16  ;;  %s5121_s25 = scalar_lea.vmem %s58_s23, 32 }
  0x78   :  { %p5118_p1 = scmp.ne.s32.totalorder %s58_s23, %s5117_s27  ;;  %p5122_p2 = scmp.lt.s32.totalorder %s58_s23, %s58_s23 }
  0x79   :  { %p5123_p3 = scmp.lt.s32.totalorder %s5121_s25, %s5117_s27 }
  0x7b   :  { %p5124_p4 = por %p5123_p3, %p5122_p2 }
  0x7d   :  { %p5125_p5 = pnand %p5124_p4, %p5118_p1 }
  0x7f   :  { %5128 = shalt.err (!%p5125_p5)
}
  0x80   :  { %60 = dma.hbm_to_vmem [thread:$0]  %s5903_s19, 16, %s58_s23, [#allocation6]  }
  0x81   :  { %s5129_s3 = scalar_lea.hbm %s5877_s4, 6144 }
  0x82   :  { %p5130_p6 = scmp.ne.s32.totalorder %s5877_s4, %s5129_s3  ;;  %p5133_p7 = scmp.lt.u32.totalorder %s5129_s3, %s5877_s4 }
  0x84   :  { %p5135_p8 = pnand %p5133_p7, %p5130_p6 }
  0x86   :  { %5138 = shalt.err (!%p5135_p8)
}
  0x87   :  { %s5139_s20 = scalar_lea.vmem %s77_s28, 6144  ;;  %p5144_p10 = scmp.lt.s32.totalorder %s77_s28, %s77_s28 }
  0x88   :  { %p5140_p9 = scmp.ne.s32.totalorder %s77_s28, %s5139_s20  ;;  %p5145_p11 = scmp.lt.s32.totalorder %s5139_s20, %s5139_s20 }
  0x8a   :  { %p5146_p12 = por %p5145_p11, %p5144_p10 }
  0x8c   :  { %p5147_p13 = pnand %p5146_p12, %p5140_p9 }
  0x8e   :  { %5150 = shalt.err (!%p5147_p13)
}
  0x8f   :  { %s5240_s23 = smov 192   ;;  %s5241_s19 = smov 12  }
  0x90   :  { %82 = dma.hbm_to_vmem [thread:$0]  %s5877_s4, 6144, %s77_s28, [#allocation9], %s5240_s23, %s5240_s23, %s5241_s19  }
  0x91   :  { %s5242_s25 = smov [#allocation13]   ;;  %s5243_s6 = smov [#allocation16]  }
  0x92   :  { %s108_s2 = sshll.u32 %s5242_s25, 4  ;;  %s140_s26 = sshll.u32 %s5243_s6, 4  ;;  %s109_s2 = int_to_ptr.vmem [resolvable:$true] %s108_s2  ;;  %s141_s26 = int_to_ptr.vmem [resolvable:$true] %s140_s26 }
  0x93   :  { %s5151_s30 = scalar_lea.hbm %s5883_s10, 4096 }
  0x94   :  { %p5152_p0 = scmp.ne.s32.totalorder %s5883_s10, %s5151_s30  ;;  %p5155_p1 = scmp.lt.u32.totalorder %s5151_s30, %s5883_s10 }
  0x96   :  { %p5157_p2 = pnand %p5155_p1, %p5152_p0 }
  0x98   :  { %5160 = shalt.err (!%p5157_p2)
}
  0x99   :  { %s5161_s4 = scalar_lea.vmem %s109_s2, 4096  ;;  %p5166_p4 = scmp.lt.s32.totalorder %s109_s2, %s109_s2 }
  0x9a   :  { %p5162_p3 = scmp.ne.s32.totalorder %s109_s2, %s5161_s4  ;;  %p5167_p5 = scmp.lt.s32.totalorder %s5161_s4, %s5161_s4 }
  0x9c   :  { %p5168_p6 = por %p5167_p5, %p5166_p4 }
  0x9e   :  { %p5169_p7 = pnand %p5168_p6, %p5162_p3 }
  0xa0   :  { %5172 = shalt.err (!%p5169_p7)
}
  0xa1   :  { %114 = dma.hbm_to_vmem [thread:$0]  %s5883_s10, 4096, %s109_s2, [#allocation12], %s5236_s12, %s5236_s12, %s5237_s1  }
  0xa2   :  { %s5173_s27 = scalar_lea.hbm %s5889_s16, 1024 }
  0xa3   :  { %p5174_p8 = scmp.ne.s32.totalorder %s5889_s16, %s5173_s27  ;;  %p5177_p9 = scmp.lt.u32.totalorder %s5173_s27, %s5889_s16 }
  0xa5   :  { %p5179_p10 = pnand %p5177_p9, %p5174_p8 }
  0xa7   :  { %5182 = shalt.err (!%p5179_p10)
}
  0xa8   :  { %s5183_s30 = scalar_lea.vmem %s141_s26, 1024  ;;  %p5188_p12 = scmp.lt.s32.totalorder %s141_s26, %s141_s26 }
  0xa9   :  { %p5184_p11 = scmp.ne.s32.totalorder %s141_s26, %s5183_s30  ;;  %p5189_p13 = scmp.lt.s32.totalorder %s5183_s30, %s5183_s30 }
  0xab   :  { %p5190_p0 = por %p5189_p13, %p5188_p12 }
  0xad   :  { %p5191_p1 = pnand %p5190_p0, %p5184_p11 }
  0xaf   :  { %5194 = shalt.err (!%p5191_p1)
}
  0xb0   :  { %s5904_s10 = smov 4   ;;  %s5905_s12 = smov 64  }
  0xb1   :  { %146 = dma.hbm_to_vmem [thread:$0]  %s5889_s16, 1024, %s141_s26, [#allocation15], %s5905_s12, %s5905_s12, %s5904_s10  }
  0xb2   :  { %5217 = dma.done.wait [#allocation3], 256  }
  0xb3   :  { %5218 = vsyncadd [#allocation3], 4294967040 }
  0xb4   :  { %5219 = dma.done.wait [#allocation6], 32  }
  0xb5   :  { %5220 = vsyncadd [#allocation6], 4294967264 }
  0xb6   :  { %5221 = dma.done.wait [#allocation9], 6160  }
  0xb7   :  { %5222 = vsyncadd [#allocation9], 4294961136 }
  0xb8   :  { %5223 = dma.done.wait [#allocation12], 6144  }
  0xb9   :  { %5224 = vsyncadd [#allocation12], 4294961152 }
  0xba   :  { %5225 = dma.done.wait [#allocation15], 5120  }
  0xbb   :  { %5226 = vsyncadd [#allocation15], 4294962176  ;;  %v177_v0 = vld [vmem:[#allocation2] sm:$0xff]  ;;  %v178_v1 = vld [vmem:[#allocation2 + $0x8] sm:$0xff]  ;;  %v5244_v4 = vmov 0.0   ;;  %v5245_v30 = vmov 0   ;;  %v220_v53 = vlaneseq }
  0xbc   :  { %181 = vadd.xlane.f32.xlu0 %v177_v0  ;;  %v4727_v2 = vld [vmem:[#allocation10 + $0x4] ss:$12 sps:$4 sm:$0xff]   ;;  %v4729_v3 = vld [vmem:[#allocation10] ss:$12 sps:$4 sm:$0xff]   ;;  %4329 = vmatprep.subr.bf16.mxu1 %v5244_v4  ;;  %v4730_v5 = vld [vmem:[#allocation10 + $0x8] ss:$12 sps:$4 sm:$0xff]  }
  0xbd   :  { %v4731_v6 = vld [vmem:[#allocation10 + $0x1c] ss:$12 sps:$4 sm:$0xff]   ;;  %420 = vmatprep.subr.bf16.mxu0 %v4727_v2  ;;  %4330 = vmatpush3.bf16.msra.mxu1 %v4730_v5  ;;  %v4733_v15 = vld [vmem:[#allocation10 + $0x18] ss:$12 sps:$4 sm:$0xff]   ;;  %v4734_v16 = vld [vmem:[#allocation10 + $0x20] ss:$12 sps:$4 sm:$0xff]  }
  0xbe   :  { %421 = vmatpush1.bf16.msra.mxu0 %v4729_v3  ;;  %4331 = vmatprep.subr.bf16.mxu1 %v5244_v4  ;;  %v4735_v17 = vld [vmem:[#allocation10 + $0x34] ss:$12 sps:$4 sm:$0xff]   ;;  %v4737_v18 = vld [vmem:[#allocation10 + $0x30] ss:$12 sps:$4 sm:$0xff]   ;;  %v4738_v19 = vld [vmem:[#allocation10 + $0x38] ss:$12 sps:$4 sm:$0xff]  }
  0xbf   :  { %422 = vmatprep.subr.bf16.mxu0 %v4731_v6  ;;  %v4739_v20 = vld [vmem:[#allocation10 + $0x4c] ss:$12 sps:$4 sm:$0xff]   ;;  %v4741_v21 = vld [vmem:[#allocation10 + $0x48] ss:$12 sps:$4 sm:$0xff]   ;;  %v4742_v22 = vld [vmem:[#allocation10 + $0x50] ss:$12 sps:$4 sm:$0xff]   ;;  %452 = vmatprep.mubr.bf16.mxu0 %v5245_v30 }
  0xc0   :  { %183 = vadd.xlane.f32.xlu0 %v178_v1  ;;  %v4743_v23 = vld [vmem:[#allocation10 + $0x64] ss:$12 sps:$4 sm:$0xff]   ;;  %v4745_v24 = vld [vmem:[#allocation10 + $0x60] ss:$12 sps:$4 sm:$0xff]   ;;  %v4746_v25 = vld [vmem:[#allocation10 + $0x68] ss:$12 sps:$4 sm:$0xff]  }
  0xc1   :  { %4332 = vmatpush3.bf16.msra.mxu1 %v4734_v16  ;;  %v4747_v26 = vld [vmem:[#allocation10 + $0x7c] ss:$12 sps:$4 sm:$0xff]   ;;  %v4749_v27 = vld [vmem:[#allocation10 + $0x78] ss:$12 sps:$4 sm:$0xff]   ;;  %v4750_v28 = vld [vmem:[#allocation10 + $0x80] ss:$12 sps:$4 sm:$0xff]  }
  0xc2   :  { %423 = vmatpush1.bf16.msra.mxu0 %v4733_v15  ;;  %4333 = vmatprep.subr.bf16.mxu1 %v5244_v4  ;;  %v4751_v29 = vld [vmem:[#allocation10 + $0x94] ss:$12 sps:$4 sm:$0xff]   ;;  %vm5246_vm0 = vmmov 0   ;;  %v4753_v31 = vld [vmem:[#allocation10 + $0x90] ss:$12 sps:$4 sm:$0xff]   ;;  %v5496_v54 = vshrl.u32 %v220_v53, 7 }
  0xc3   :  { %424 = vmatprep.subr.bf16.mxu0 %v4735_v17  ;;  %4345 = vmatprep.mubr.msk.bf16.mxu1 %vm5246_vm0, %v5244_v4  ;;  %v4754_v32 = vld [vmem:[#allocation10 + $0x98] ss:$12 sps:$4 sm:$0xff]   ;;  %v4757_v34 = vld [vmem:[#allocation10 + $0xa8] ss:$12 sps:$4 sm:$0xff]   ;;  %v4758_v35 = vld [vmem:[#allocation10 + $0xb0] ss:$12 sps:$4 sm:$0xff]  }
  0xc4   :  { %v4755_v33 = vld [vmem:[#allocation10 + $0xac] ss:$12 sps:$4 sm:$0xff]   ;;  %v3954_v44 = vld [vmem:[#allocation7] ss:$0 sm:$0xff]  ;;  %v3955_v48 = vld [vmem:[#allocation8] ss:$0 sm:$0xff] }
  0xc5   :  { %4334 = vmatpush3.bf16.msra.mxu1 %v4738_v19  ;;  %v5499_v55 = vsub.s32 0, %v5496_v54  ;;  %v275_v56 = vld [vmem:[%s5878_s5] sm:$0x7]  ;;  %v287_v57 = vsub.s32 2, %v5496_v54  ;;  %v5506_v58 = vsub.s32 1, %v5496_v54  ;;  %vm504_vm1 = vcmask 261120  }
  0xc6   :  { %425 = vmatpush1.bf16.msra.mxu0 %v4737_v18  ;;  %4335 = vmatprep.subr.bf16.mxu1 %v5244_v4  ;;  %s5247_s29 = smov 96   ;;  %vm5522_vm2 = vmpackc.low %vm504_vm1, %vm504_vm1  ;;  %vm596_vm8 = vcmask 130048   ;;  %s5249_s0 = smov 32   ;;  %vm3819_vm9 = vcmask 1040384  }
  0xc7   :  { %426 = vmatprep.subr.bf16.mxu0 %v4739_v20  ;;  %v280_v59 = vrot.slane %v275_v56, %v5499_v55  ;;  %v288_v60 = vrot.slane %v275_v56, %v287_v57  ;;  %v284_v63 = vrot.slane %v275_v56, %v5506_v58 }
  0xc9   :  { %4336 = vmatpush3.bf16.msra.mxu1 %v4742_v22 }
  0xca   :  { %427 = vmatpush1.bf16.msra.mxu0 %v4741_v21  ;;  %4337 = vmatprep.subr.bf16.mxu1 %v5244_v4 }
  0xcb   :  { %428 = vmatprep.subr.bf16.mxu0 %v4743_v23 }
  0xcd   :  { %4338 = vmatpush3.bf16.msra.mxu1 %v4746_v25  ;;  %v224_v25 = vand.u32 127, %v220_v53 }
  0xce   :  { %429 = vmatpush1.bf16.msra.mxu0 %v4745_v24  ;;  %4339 = vmatprep.subr.bf16.mxu1 %v5244_v4  ;;  %v222_v24 = vadd.s32 8, %v5496_v54 }
  0xcf   :  { %430 = vmatprep.subr.bf16.mxu0 %v4747_v26 }
  0xd0   :  { %v226_v26 = vshra.s32 %v222_v24, 3 }
  0xd1   :  { %4340 = vmatpush3.bf16.msra.mxu1 %v4750_v28  ;;  %v3956_v28 = vld [vmem:[#allocation5] ss:$0 sm:$0xff] }
  0xd2   :  { %431 = vmatpush1.bf16.msra.mxu0 %v4749_v27  ;;  %4341 = vmatprep.subr.bf16.mxu1 %v5244_v4  ;;  %v227_v27 = vshra.s32 %v224_v25, 3  ;;  %vm237_vm4 = vcmp.gt.f32.partialorder %v3956_v28, 0.5 }
  0xd3   :  { %432 = vmatprep.subr.bf16.mxu0 %v4751_v29  ;;  %v225_v29 = vshra.s32 %v5496_v54, 3 }
  0xd4   :  { %vm229_vm3 = vcmp.eq.s32.totalorder %v226_v26, %v227_v27 }
  0xd5   :  { %4342 = vmatpush3.bf16.msra.mxu1 %v4754_v32  ;;  %vm228_vm5 = vcmp.eq.s32.totalorder %v225_v29, %v227_v27  ;;  %vm239_vm6 = vmand %vm229_vm3, %vm237_vm4  ;;  %v5248_v32 = vmov -1e+09  }
  0xd6   :  { %433 = vmatpush1.bf16.msra.mxu0 %v4753_v31  ;;  %4343 = vmatprep.subr.bf16.mxu1 %v5244_v4  ;;  %vm238_vm7 = vmand %vm228_vm5, %vm237_vm4 }
  0xd7   :  { %434 = vmatprep.subr.bf16.mxu0 %v4755_v33  ;;  %v5548_v33 = vsel %vm239_vm6, 0.0, %v5248_v32 }
  0xd9   :  { %4344 = vmatpush3.bf16.msra.mxu1 %v4758_v35 }
  0xda   :  { %435 = vmatpush1.bf16.msra.mxu0 %v4757_v34 }
 0x149   :  { %v182_v7 = vpop.xlane.xlu0 %181 }
 0x14a   :  { %v186_v8 = vmul.f32 0.0078125, %v182_v7 }
 0x14c   :  { %v5471_v9 = vsub.f32 %v177_v0, %v186_v8 }
 0x14d   :  { %v184_v10 = vpop.xlane.xlu0 %183 }
 0x14e   :  { %v187_v11 = vmul.f32 0.0078125, %v184_v10  ;;  %v190_v12 = vmul.f32 %v5471_v9, %v5471_v9 }
 0x150   :  { %v5475_v13 = vsub.f32 %v178_v1, %v187_v11  ;;  %192 = vadd.xlane.f32.xlu1 %v190_v12 }
 0x152   :  { %v191_v14 = vmul.f32 %v5475_v13, %v5475_v13 }
 0x154   :  { %194 = vadd.xlane.f32.xlu1 %v191_v14 }
 0x1dd   :  { %v193_v36 = vpop.xlane.xlu1 %192 }
 0x1de   :  { %v196_v37 = vmul.f32 0.0078125, %v193_v36  ;;  %v5550_v36 = vsel %vm238_vm7, 0.0, %v5248_v32 }
 0x1e0   :  { %v198_v38 = vadd.f32 1e-12, %v196_v37 }
 0x1e1   :  { %v195_v39 = vpop.xlane.xlu1 %194 }
 0x1e2   :  { %4895 = vrsqrt.f32 %v198_v38  ;;  %v197_v40 = vmul.f32 0.0078125, %v195_v39 }
 0x1e4   :  { %v199_v41 = vadd.f32 1e-12, %v197_v40 }
 0x1e6   :  { %4897 = vrsqrt.f32 %v199_v41 }
 0x1ec   :  { %v4896_v42 = vpop.eup %4895 }
 0x1ed   :  { %v202_v43 = vmul.f32 %v4896_v42, %v5471_v9 }
 0x1ef   :  { %v210_v47 = vmul.f32 %v3954_v44, %v202_v43 }
 0x1f0   :  { %v4898_v45 = vpop.eup %4897 }
 0x1f1   :  { %v203_v46 = vmul.f32 %v4898_v45, %v5475_v13  ;;  %v5490_v50 = vadd.f32 %v3955_v48, %v210_v47 }
 0x1f3   :  { %v211_v49 = vmul.f32 %v3954_v44, %v203_v46 }
 0x1f5   :  { %v5492_v51 = vadd.f32 %v3955_v48, %v211_v49 }
 0x1f7   :  { %v242_v52 = vpack.c.bf16 %v5492_v51, %v5490_v50 }
 0x1f9   :  { %453 = vmatmul.mubr.bf16.vlgmr.msra.gmra.mrb[0].mxu0 %v242_v52  ;;  %4346 = vmatmul.mubr.bf16.vlgmr.msra.gmra.mrb[0].mxu1 %v242_v52 }
 0x2cc   :  { %v454_v61 = vpop.f32.mrb[0].mxu0  ;;  %v497_v62 = vpop.f32.mrb[0].mxu1 }
 0x2cd   :  { %v5512_v0 = vadd.f32 %v454_v61, %v280_v59  ;;  %v456_v1 = vpop.f32.mrb[1].mxu0  ;;  %v4347_v2 = vpop.f32.mrb[1].mxu1  ;;  %v498_v6 = vadd.f32 %v497_v62, %v288_v60 }
 0x2ce   :  { %v458_v3 = vpop.f32.mrb[2].mxu0  ;;  %v500_v5 = vpop.f32.mrb[2].mxu1  ;;  %v457_v10 = vadd.f32 %v456_v1, %v284_v63 }
 0x2cf   :  { %v501_v7 = vadd.f32 %v500_v5, %v288_v60  ;;  %v460_v8 = vpop.f32.mrb[3].mxu0  ;;  %v4348_v9 = vpop.f32.mrb[3].mxu1  ;;  %705 = vrot.lane.b32.xlu1 %v5512_v0, %s5247_s29  ;;  %4353 = vmatprep.mubr.msk.f32.mxu1 %vm504_vm1, %v5512_v0  ;;  %v5518_v11 = vadd.f32 %v458_v3, %v280_v59 }
 0x2d0   :  { %v461_v12 = vadd.f32 %v460_v8, %v284_v63 }
 0x2d1   :  { %v4571_v14 = vpack.c.bf16 %v501_v7, %v498_v6  ;;  %v5526_v15 = vpack.i.bf16 %v501_v7, %v498_v6 }
 0x2d2   :  { %v5528_v16 = vpack.i.bf16 %v461_v12, %v457_v10  ;;  %v4565_v17 = vpack.c.bf16 %v461_v12, %v457_v10 }
 0x2d3   :  { %707 = vrot.lane.b32.xlu1 %v5518_v11, %s5247_s29 }
 0x2d4   :  { %4668 = vrot.lane.b32.xlu0 %v5528_v16, %s5247_s29  ;;  %4567 = vmatprep.subr.msk.bf16.mxu1 %vm5522_vm2, %v4565_v17 }
 0x2d5   :  { %4570 = vmatpush3.bf16.xpose.msk.msra.mxu1 %vm5522_vm2, %v4565_v17 }
 0x2d6   :  { %4572 = vmatprep.subr.bf16.mxu1 %v4571_v14 }
 0x2dc   :  { %4354 = vmatmul.mubr.msk.f32.vlgmr.msra.gmra.mrb[4].mxu1 %vm504_vm1, %v5518_v11 }
 0x2dd   :  { %4574 = vmatpush3.bf16.msra.mxu1 %v4571_v14 }
 0x341   :  { %v706_v18 = vpop.permute.xlu1 %705 }
 0x342   :  { %4367 = vmatprep.mubr.msk.f32.mxu0 %vm504_vm1, %v706_v18 }
 0x345   :  { %v708_v23 = vpop.permute.xlu1 %707 }
 0x346   :  { %v4669_v19 = vpop.permute.xlu0 %4668 }
 0x347   :  { %v4671_v20 = vunpack.i.h.bf16 %v4669_v19  ;;  %v4670_v21 = vunpack.i.l.bf16 %v4669_v19 }
 0x349   :  { %v4575_v22 = vpack.c.bf16 %v4671_v20, %v4670_v21 }
 0x34b   :  { %4577 = vmatprep.subr.msk.bf16.mxu0 %vm5522_vm2, %v4575_v22 }
 0x34c   :  { %4580 = vmatpush3.bf16.xpose.msk.msra.mxu0 %vm5522_vm2, %v4575_v22 }
 0x353   :  { %4368 = vmatmul.mubr.msk.f32.vlgmr.msra.gmra.mrb[4].mxu0 %vm504_vm1, %v708_v23 }
 0x3af   :  { %v4355_v31 = vpop.f32.mrb[4].mxu1 }
 0x3b0   :  { %v593_v34 = vmul.f32 0.17677669, %v4355_v31  ;;  %v583_v35 = vpop.f32.mrb[5].mxu1 }
 0x3b1   :  { %v592_v37 = vmul.f32 0.17677669, %v583_v35  ;;  %v4759_v35 = vld [vmem:[#allocation11 + $0x10] sm:$0xff]  }
 0x3b2   :  { %v595_v38 = vadd.f32 %v593_v34, %v5548_v33 }
 0x3b3   :  { %v594_v39 = vadd.f32 %v592_v37, %v5550_v36 }
 0x3b4   :  { %v600_v40 = vsel %vm596_vm8, %v595_v38, -inf }
 0x3b5   :  { %601 = vmax.xlane.f32.xlu0 %v600_v40  ;;  %v597_v41 = vsel %vm596_vm8, %v594_v39, -inf }
 0x3b6   :  { %598 = vmax.xlane.f32.xlu1 %v597_v41 }
 0x426   :  { %v4369_v42 = vpop.f32.mrb[4].mxu0 }
 0x427   :  { %v787_v43 = vpop.f32.mrb[5].mxu0  ;;  %v797_v44 = vmul.f32 0.17677669, %v4369_v42 }
 0x428   :  { %v796_v45 = vmul.f32 0.17677669, %v787_v43 }
 0x429   :  { %v799_v48 = vadd.f32 %v797_v44, %v5548_v33 }
 0x42a   :  { %v798_v46 = vadd.f32 %v796_v45, %v5550_v36  ;;  %v4761_v45 = vld [vmem:[#allocation11] sm:$0xff]  }
 0x42b   :  { %v803_v49 = vsel %vm596_vm8, %v799_v48, -inf }
 0x42c   :  { %v800_v47 = vsel %vm596_vm8, %v798_v46, -inf }
 0x42d   :  { %801 = vmax.xlane.f32.xlu0 %v800_v47 }
 0x431   :  { %804 = vmax.xlane.f32.xlu0 %v803_v49  ;;  %v4762_v49 = vld [vmem:[#allocation11 + $0x8] sm:$0xff]  }
 0x442   :  { %v602_v52 = vpop.xlane.xlu0 %601 }
 0x443   :  { %v604_v53 = vsub.f32 %v595_v38, %v602_v52  ;;  %v599_v56 = vpop.xlane.xlu1 %598  ;;  %v4760_v38 = vld [vmem:[#allocation11 + $0x18] sm:$0xff]  }
 0x444   :  { %v603_v59 = vsub.f32 %v594_v39, %v599_v56 }
 0x445   :  { %v607_v60 = vmul.f32 1.442695, %v604_v53 }
 0x446   :  { %v605_v61 = vmul.f32 1.442695, %v603_v59 }
 0x447   :  { %4899 = vpow2.f32 %v607_v60 }
 0x448   :  { %4901 = vpow2.f32 %v605_v61 }
 0x451   :  { %v4900_v62 = vpop.eup %4899 }
 0x452   :  { %v4902_v63 = vpop.eup %4901  ;;  %v612_v1 = vsel %vm596_vm8, %v4900_v62, 0.0 }
 0x453   :  { %613 = vadd.xlane.f32.xlu0 %v612_v1  ;;  %v609_v2 = vsel %vm596_vm8, %v4902_v63, 0.0 }
 0x454   :  { %610 = vadd.xlane.f32.xlu1 %v609_v2 }
 0x4ba   :  { %v802_v3 = vpop.xlane.xlu0 %801 }
 0x4bb   :  { %v806_v5 = vsub.f32 %v798_v46, %v802_v3 }
 0x4bd   :  { %v808_v6 = vmul.f32 1.442695, %v806_v5 }
 0x4be   :  { %v805_v7 = vpop.xlane.xlu0 %804 }
 0x4bf   :  { %4903 = vpow2.f32 %v808_v6  ;;  %v807_v8 = vsub.f32 %v799_v48, %v805_v7 }
 0x4c1   :  { %v810_v9 = vmul.f32 1.442695, %v807_v8 }
 0x4c3   :  { %4905 = vpow2.f32 %v810_v9 }
 0x4c9   :  { %v4904_v10 = vpop.eup %4903 }
 0x4ca   :  { %v812_v12 = vsel %vm596_vm8, %v4904_v10, 0.0 }
 0x4cb   :  { %813 = vadd.xlane.f32.xlu1 %v812_v12 }
 0x4cd   :  { %v4906_v14 = vpop.eup %4905 }
 0x4ce   :  { %v815_v17 = vsel %vm596_vm8, %v4906_v14, 0.0 }
 0x4cf   :  { %816 = vadd.xlane.f32.xlu0 %v815_v17 }
 0x4dc   :  { %4673 = vrot.lane.b32.xlu1 %v5526_v15, %s5247_s29 }
 0x4e0   :  { %v614_v18 = vpop.xlane.xlu0 %613  ;;  %1029 = vrot.lane.b32.xlu1 %v5512_v0, %s5905_s12 }
 0x4e1   :  { %4907 = vrcp.f32 %v614_v18  ;;  %v611_v19 = vpop.xlane.xlu1 %610 }
 0x4e2   :  { %4909 = vrcp.f32 %v611_v19 }
 0x4e4   :  { %1031 = vrot.lane.b32.xlu1 %v5518_v11, %s5905_s12 }
 0x4e5   :  { %4678 = vrot.lane.b32.xlu0 %v5528_v16, %s5905_s12 }
 0x4eb   :  { %v4908_v20 = vpop.eup %4907 }
 0x4ec   :  { %v4910_v21 = vpop.eup %4909  ;;  %v618_v23 = vmul.f32 %v4908_v20, %v4900_v62 }
 0x4ed   :  { %v617_v22 = vmul.f32 %v4910_v21, %v4902_v63 }
 0x4ef   :  { %4360 = vmatprep.mubr.msk.f32.mxu1 %vm596_vm8, %v617_v22 }
 0x4f0   :  { %4361 = vmatmul.mubr.msk.f32.vlgmr.msra.gmra.mrb[6].mxu1 %vm596_vm8, %v618_v23 }
 0x558   :  { %v814_v24 = vpop.xlane.xlu1 %813 }
 0x559   :  { %4911 = vrcp.f32 %v814_v24 }
 0x55c   :  { %v817_v25 = vpop.xlane.xlu0 %816  ;;  %v4674_v26 = vpop.permute.xlu1 %4673 }
 0x55d   :  { %4913 = vrcp.f32 %v817_v25  ;;  %v4676_v27 = vunpack.i.h.bf16 %v4674_v26  ;;  %v4675_v28 = vunpack.i.l.bf16 %v4674_v26 }
 0x55f   :  { %v4581_v29 = vpack.c.bf16 %v4676_v27, %v4675_v28 }
 0x560   :  { %v4679_v43 = vpop.permute.xlu0 %4678  ;;  %v1030_v53 = vpop.permute.xlu1 %1029 }
 0x561   :  { %4582 = vmatprep.subr.bf16.mxu1 %v4581_v29  ;;  %v4681_v47 = vunpack.i.h.bf16 %v4679_v43  ;;  %v4680_v48 = vunpack.i.l.bf16 %v4679_v43 }
 0x562   :  { %4584 = vmatpush3.bf16.msra.mxu1 %v4581_v29 }
 0x563   :  { %v4912_v31 = vpop.eup %4911  ;;  %4377 = vmatprep.subr.bf16.mxu1 %v5244_v4  ;;  %v4585_v52 = vpack.c.bf16 %v4681_v47, %v4680_v48 }
 0x564   :  { %v820_v32 = vmul.f32 %v4912_v31, %v4904_v10  ;;  %v1032_v56 = vpop.permute.xlu1 %1031 }
 0x566   :  { %4374 = vmatprep.mubr.msk.f32.mxu1 %vm596_vm8, %v820_v32  ;;  %v4763_v32 = vld [vmem:[#allocation11 + $0x20] sm:$0xff]  }
 0x567   :  { %v4914_v34 = vpop.eup %4913 }
 0x568   :  { %v821_v37 = vmul.f32 %v4914_v34, %v4906_v14 }
 0x56a   :  { %4375 = vmatmul.mubr.msk.f32.vlgmr.msra.gmra.mrb[8].mxu1 %vm596_vm8, %v821_v37 }
 0x56b   :  { %4378 = vmatpush3.bf16.msra.mxu1 %v4759_v35  ;;  %4381 = vmatprep.mubr.msk.bf16.mxu1 %vm5246_vm0, %v5244_v4 }
 0x56c   :  { %4379 = vmatprep.subr.bf16.mxu1 %v5244_v4 }
 0x56f   :  { %4380 = vmatpush3.bf16.msra.mxu1 %v4760_v38 }
 0x570   :  { %4385 = vmatprep.subr.bf16.mxu1 %v5244_v4 }
 0x5c3   :  { %v4362_v39 = vpop.f32.mrb[6].mxu1 }
 0x5c4   :  { %v691_v40 = vpop.f32.mrb[7].mxu1 }
 0x5c5   :  { %v700_v41 = vpack.c.bf16 %v4362_v39, %v691_v40 }
 0x63d   :  { %v4376_v42 = vpop.f32.mrb[8].mxu1 }
 0x63e   :  { %v902_v44 = vpop.f32.mrb[9].mxu1 }
 0x63f   :  { %v911_v46 = vpack.c.bf16 %v4376_v42, %v902_v44 }
 0x641   :  { %4382 = vmatmul.mubr.msk.bf16.vlgmr.msra.gmra.mrb[12].mxu1 %vm504_vm1, %v911_v46  ;;  %v4764_v46 = vld [vmem:[#allocation11 + $0x28] sm:$0xff]  }
 0x642   :  { %4386 = vmatpush3.bf16.msra.mxu1 %v4761_v45  ;;  %4389 = vmatprep.mubr.msk.bf16.mxu1 %vm5246_vm0, %v5244_v4 }
 0x643   :  { %4387 = vmatprep.subr.bf16.mxu1 %v5244_v4 }
 0x646   :  { %4388 = vmatpush3.bf16.msra.mxu1 %v4762_v49 }
 0x647   :  { %4587 = vmatprep.subr.msk.bf16.mxu1 %vm5522_vm2, %v4585_v52 }
 0x649   :  { %4390 = vmatmul.mubr.msk.bf16.vlgmr.msra.gmra.mrb[16].mxu1 %vm504_vm1, %v700_v41 }
 0x64a   :  { %4397 = vmatprep.mubr.msk.f32.mxu1 %vm504_vm1, %v1030_v53 }
 0x64f   :  { %4590 = vmatpush3.bf16.xpose.msk.msra.mxu1 %vm5522_vm2, %v4585_v52 }
 0x650   :  { %4407 = vmatprep.subr.bf16.mxu1 %v5244_v4 }
 0x656   :  { %4398 = vmatmul.mubr.msk.f32.vlgmr.msra.gmra.mrb[10].mxu1 %vm504_vm1, %v1032_v56 }
 0x657   :  { %4411 = vmatprep.mubr.msk.bf16.mxu1 %vm5246_vm0, %v5244_v4  ;;  %4408 = vmatpush3.bf16.msra.mxu1 %v4763_v32 }
 0x658   :  { %4409 = vmatprep.subr.bf16.mxu1 %v5244_v4 }
 0x65b   :  { %4410 = vmatpush3.bf16.msra.mxu1 %v4764_v46 }
 0x65c   :  { %4429 = vmatprep.subr.bf16.mxu1 %v5244_v4 }
 0x714   :  { %v966_v59 = vpop.f32.mrb[12].mxu1 }
 0x715   :  { %v4383_v60 = vpop.f32.mrb[13].mxu1 }
 0x716   :  { %v969_v61 = vpop.f32.mrb[14].mxu1 }
 0x717   :  { %v4384_v62 = vpop.f32.mrb[15].mxu1 }
 0x71c   :  { %v1022_v63 = vpop.f32.mrb[16].mxu1 }
 0x71d   :  { %v5595_v1 = vadd.f32 %v1022_v63, %v966_v59  ;;  %v4391_v2 = vpop.f32.mrb[17].mxu1 }
 0x71e   :  { %v1025_v3 = vpop.f32.mrb[18].mxu1 }
 0x71f   :  { %v5597_v5 = vadd.f32 %v1025_v3, %v969_v61  ;;  %v4392_v6 = vpop.f32.mrb[19].mxu1 }
 0x729   :  { %v4399_v7 = vpop.f32.mrb[10].mxu1 }
 0x72a   :  { %v1121_v8 = vmul.f32 0.17677669, %v4399_v7  ;;  %v1111_v9 = vpop.f32.mrb[11].mxu1 }
 0x72b   :  { %v1120_v10 = vmul.f32 0.17677669, %v1111_v9 }
 0x72c   :  { %v1123_v12 = vadd.f32 %v1121_v8, %v5548_v33 }
 0x72d   :  { %v1122_v14 = vadd.f32 %v1120_v10, %v5550_v36 }
 0x72e   :  { %v1127_v17 = vsel %vm596_vm8, %v1123_v12, -inf }
 0x72f   :  { %1128 = vmax.xlane.f32.xlu0 %v1127_v17  ;;  %v1124_v18 = vsel %vm596_vm8, %v1122_v14, -inf }
 0x730   :  { %1125 = vmax.xlane.f32.xlu1 %v1124_v18 }
 0x741   :  { %4683 = vrot.lane.b32.xlu1 %v5526_v15, %s5905_s12 }
 0x745   :  { %1297 = vrot.lane.b32.xlu1 %v5512_v0, %s5249_s0 }
 0x749   :  { %1299 = vrot.lane.b32.xlu1 %v5518_v11, %s5249_s0 }
 0x7bc   :  { %v1129_v19 = vpop.xlane.xlu0 %1128 }
 0x7bd   :  { %v1131_v20 = vsub.f32 %v1123_v12, %v1129_v19  ;;  %v1126_v21 = vpop.xlane.xlu1 %1125 }
 0x7be   :  { %v1130_v22 = vsub.f32 %v1122_v14, %v1126_v21  ;;  %v4765_v21 = vld [vmem:[#allocation11 + $0x30] sm:$0xff]  }
 0x7bf   :  { %v1134_v23 = vmul.f32 1.442695, %v1131_v20 }
 0x7c0   :  { %v1132_v24 = vmul.f32 1.442695, %v1130_v22 }
 0x7c1   :  { %4915 = vpow2.f32 %v1134_v23  ;;  %v4684_v25 = vpop.permute.xlu1 %4683 }
 0x7c2   :  { %v4686_v26 = vunpack.i.h.bf16 %v4684_v25  ;;  %v4685_v27 = vunpack.i.l.bf16 %v4684_v25  ;;  %4917 = vpow2.f32 %v1132_v24 }
 0x7c4   :  { %v4591_v28 = vpack.c.bf16 %v4686_v26, %v4685_v27 }
 0x7c6   :  { %4592 = vmatprep.subr.bf16.mxu0 %v4591_v28 }
 0x7c7   :  { %4594 = vmatpush3.bf16.msra.mxu0 %v4591_v28 }
 0x7cb   :  { %v4916_v29 = vpop.eup %4915 }
 0x7cc   :  { %v1139_v0 = vsel %vm596_vm8, %v4916_v29, 0.0  ;;  %v4918_v31 = vpop.eup %4917 }
 0x7cd   :  { %1140 = vadd.xlane.f32.xlu0 %v1139_v0  ;;  %v1136_v11 = vsel %vm596_vm8, %v4918_v31, 0.0 }
 0x7d1   :  { %1137 = vadd.xlane.f32.xlu0 %v1136_v11 }
 0x7e7   :  { %4688 = vrot.lane.b32.xlu0 %v5528_v16, %s5249_s0  ;;  %v1298_v16 = vpop.permute.xlu1 %1297 }
 0x7eb   :  { %v1300_v45 = vpop.permute.xlu1 %1299 }
 0x85a   :  { %v1141_v34 = vpop.xlane.xlu0 %1140 }
 0x85b   :  { %4919 = vrcp.f32 %v1141_v34 }
 0x85e   :  { %v1138_v35 = vpop.xlane.xlu0 %1137 }
 0x85f   :  { %4921 = vrcp.f32 %v1138_v35 }
 0x862   :  { %v4689_v37 = vpop.permute.xlu0 %4688 }
 0x863   :  { %v4691_v38 = vunpack.i.h.bf16 %v4689_v37  ;;  %v4690_v39 = vunpack.i.l.bf16 %v4689_v37 }
 0x865   :  { %v4595_v40 = vpack.c.bf16 %v4691_v38, %v4690_v39  ;;  %v4920_v41 = vpop.eup %4919  ;;  %v4017_v38 = vld [vmem:[%s5880_s7] ss:$0 sm:$0xff] }
 0x866   :  { %v1145_v44 = vmul.f32 %v4920_v41, %v4916_v29 }
 0x867   :  { %4597 = vmatprep.subr.msk.bf16.mxu0 %vm5522_vm2, %v4595_v40 }
 0x869   :  { %v4922_v42 = vpop.eup %4921 }
 0x86a   :  { %v1144_v43 = vmul.f32 %v4922_v42, %v4918_v31 }
 0x86c   :  { %4404 = vmatprep.mubr.msk.f32.mxu0 %vm596_vm8, %v1144_v43 }
 0x86d   :  { %4405 = vmatmul.mubr.msk.f32.vlgmr.msra.gmra.mrb[6].mxu0 %vm596_vm8, %v1145_v44 }
 0x86e   :  { %4600 = vmatpush3.bf16.xpose.msk.msra.mxu0 %vm5522_vm2, %v4595_v40  ;;  %4419 = vmatprep.mubr.msk.f32.mxu0 %vm504_vm1, %v1298_v16 }
 0x875   :  { %4420 = vmatmul.mubr.msk.f32.vlgmr.msra.gmra.mrb[8].mxu0 %vm504_vm1, %v1300_v45 }
 0x940   :  { %v4406_v47 = vpop.f32.mrb[6].mxu0 }
 0x941   :  { %v1224_v48 = vpop.f32.mrb[7].mxu0 }
 0x942   :  { %v1233_v49 = vpack.c.bf16 %v4406_v47, %v1224_v48  ;;  %v4767_v47 = vld [vmem:[#allocation13] ss:$8 sps:$4 sm:$0xff]   ;;  %v4769_v48 = vld [vmem:[#allocation13 + $0x4] ss:$8 sps:$4 sm:$0xff]  }
 0x944   :  { %4412 = vmatmul.mubr.msk.bf16.vlgmr.msra.gmra.mrb[20].mxu1 %vm504_vm1, %v1233_v49  ;;  %v4772_v49 = vld [vmem:[#allocation13 + $0x14] ss:$8 sps:$4 sm:$0xff]  }
 0x945   :  { %4433 = vmatprep.mubr.msk.bf16.mxu1 %vm5246_vm0, %v5244_v4  ;;  %4430 = vmatpush3.bf16.msra.mxu1 %v4765_v21 }
 0x946   :  { %4431 = vmatprep.subr.bf16.mxu1 %v5244_v4 }
 0x948   :  { %v4421_v52 = vpop.f32.mrb[8].mxu0 }
 0x949   :  { %v1389_v53 = vmul.f32 0.17677669, %v4421_v52  ;;  %v1379_v56 = vpop.f32.mrb[9].mxu0  ;;  %v4770_v52 = vld [vmem:[#allocation13 + $0x10] ss:$8 sps:$4 sm:$0xff]  }
 0x94a   :  { %v1388_v59 = vmul.f32 0.17677669, %v1379_v56 }
 0x94b   :  { %v1391_v60 = vadd.f32 %v1389_v53, %v5548_v33 }
 0x94c   :  { %v1390_v61 = vadd.f32 %v1388_v59, %v5550_v36 }
 0x94d   :  { %v1395_v62 = vsel %vm596_vm8, %v1391_v60, -inf }
 0x94e   :  { %1396 = vmax.xlane.f32.xlu0 %v1395_v62  ;;  %v1392_v63 = vsel %vm596_vm8, %v1390_v61, -inf }
 0x94f   :  { %1393 = vmax.xlane.f32.xlu1 %v1392_v63 }
 0x960   :  { %4693 = vrot.lane.b32.xlu1 %v5526_v15, %s5249_s0 }
 0x9db   :  { %v1397_v2 = vpop.xlane.xlu0 %1396 }
 0x9dc   :  { %v1399_v3 = vsub.f32 %v1391_v60, %v1397_v2  ;;  %v1394_v6 = vpop.xlane.xlu1 %1393  ;;  %v4773_v2 = vld [vmem:[#allocation13 + $0x20] ss:$8 sps:$4 sm:$0xff]  }
 0x9dd   :  { %v1398_v7 = vsub.f32 %v1390_v61, %v1394_v6  ;;  %v4776_v6 = vld [vmem:[#allocation13 + $0x30] ss:$8 sps:$4 sm:$0xff]  }
 0x9de   :  { %v1402_v8 = vmul.f32 1.442695, %v1399_v3  ;;  %v4778_v3 = vld [vmem:[#allocation13 + $0x34] ss:$8 sps:$4 sm:$0xff]  }
 0x9df   :  { %v1400_v9 = vmul.f32 1.442695, %v1398_v7  ;;  %v4781_v7 = vld [vmem:[#allocation13 + $0x44] ss:$8 sps:$4 sm:$0xff]  }
 0x9e0   :  { %v4694_v10 = vpop.permute.xlu1 %4693 }
 0x9e1   :  { %4923 = vpow2.f32 %v1400_v9  ;;  %v4696_v12 = vunpack.i.h.bf16 %v4694_v10  ;;  %v4695_v14 = vunpack.i.l.bf16 %v4694_v10  ;;  %v4784_v9 = vld [vmem:[#allocation13 + $0x54] ss:$8 sps:$4 sm:$0xff]   ;;  %v4782_v10 = vld [vmem:[#allocation13 + $0x50] ss:$8 sps:$4 sm:$0xff]  }
 0x9e2   :  { %4925 = vpow2.f32 %v1402_v8  ;;  %v4779_v8 = vld [vmem:[#allocation13 + $0x40] ss:$8 sps:$4 sm:$0xff]  }
 0x9e3   :  { %v4601_v17 = vpack.c.bf16 %v4696_v12, %v4695_v14  ;;  %v4787_v12 = vld [vmem:[#allocation13 + $0x64] ss:$8 sps:$4 sm:$0xff]   ;;  %v4785_v14 = vld [vmem:[#allocation13 + $0x60] ss:$8 sps:$4 sm:$0xff]  }
 0x9e5   :  { %4602 = vmatprep.subr.bf16.mxu0 %v4601_v17 }
 0x9e6   :  { %4604 = vmatpush3.bf16.msra.mxu0 %v4601_v17  ;;  %v4790_v17 = vld [vmem:[#allocation13 + $0x74] ss:$8 sps:$4 sm:$0xff]  }
 0x9e7   :  { %1725 = vmatprep.subr.bf16.mxu0 %v4769_v48  ;;  %v4806_v48 = vld [vmem:[#allocation14 + $0x38] sm:$0xff]  }
 0x9eb   :  { %v4924_v18 = vpop.eup %4923 }
 0x9ec   :  { %v1404_v19 = vsel %vm596_vm8, %v4924_v18, 0.0  ;;  %v4926_v20 = vpop.eup %4925 }
 0x9ed   :  { %1405 = vadd.xlane.f32.xlu0 %v1404_v19  ;;  %v1407_v15 = vsel %vm596_vm8, %v4926_v20, 0.0 }
 0x9f1   :  { %1408 = vadd.xlane.f32.xlu0 %v1407_v15 }
 0xa17   :  { %v1288_v22 = vpop.f32.mrb[20].mxu1 }
 0xa18   :  { %v1295_v23 = vadd.f32 %v1288_v22, %v5595_v1  ;;  %v4413_v24 = vpop.f32.mrb[21].mxu1  ;;  %v4766_v1 = vld [vmem:[#allocation11 + $0x38] sm:$0xff]  }
 0xa19   :  { %v1291_v25 = vpop.f32.mrb[22].mxu1  ;;  %4432 = vmatpush3.bf16.msra.mxu1 %v4766_v1 }
 0xa1a   :  { %v1296_v26 = vadd.f32 %v1291_v25, %v5597_v5  ;;  %v4414_v27 = vpop.f32.mrb[23].mxu1 }
 0xa7a   :  { %v1406_v28 = vpop.xlane.xlu0 %1405 }
 0xa7b   :  { %4927 = vrcp.f32 %v1406_v28 }
 0xa7e   :  { %v1409_v29 = vpop.xlane.xlu0 %1408 }
 0xa7f   :  { %4929 = vrcp.f32 %v1409_v29 }
 0xa85   :  { %v4928_v0 = vpop.eup %4927 }
 0xa86   :  { %v1412_v31 = vmul.f32 %v4928_v0, %v4924_v18  ;;  %v4788_v18 = vld [vmem:[#allocation13 + $0x70] ss:$8 sps:$4 sm:$0xff]   ;;  %v4019_v0 = vld [vmem:[%s5882_s9] ss:$0 sm:$0xff] }
 0xa88   :  { %4426 = vmatprep.mubr.msk.f32.mxu0 %vm596_vm8, %v1412_v31 }
 0xa89   :  { %v4930_v11 = vpop.eup %4929 }
 0xa8a   :  { %v1413_v32 = vmul.f32 %v4930_v11, %v4926_v20 }
 0xa8c   :  { %4427 = vmatmul.mubr.msk.f32.vlgmr.msra.gmra.mrb[10].mxu0 %vm596_vm8, %v1413_v32 }
 0xa8d   :  { %1757 = vmatprep.mubr.bf16.mxu0 %v5245_v30  ;;  %1726 = vmatpush1.bf16.msra.mxu0 %v4767_v47  ;;  %v4805_v47 = vld [vmem:[#allocation14 + $0x78] sm:$0xff]  }
 0xa8e   :  { %1727 = vmatprep.subr.bf16.mxu0 %v4772_v49  ;;  %v1633_v49 = vld [vmem:[%s5884_s11] sm:$0x3] }
 0xa91   :  { %1728 = vmatpush1.bf16.msra.mxu0 %v4770_v52  ;;  %v1638_v52 = vrot.slane %v1633_v49, %v5499_v55 }
 0xb5f   :  { %v4428_v34 = vpop.f32.mrb[10].mxu0 }
 0xb60   :  { %v1492_v35 = vpop.f32.mrb[11].mxu0 }
 0xb61   :  { %v1501_v5 = vpack.c.bf16 %v4428_v34, %v1492_v35  ;;  %v4791_v34 = vld [vmem:[#allocation14 + $0x40] sm:$0xff]  }
 0xb62   :  { %v4792_v35 = vld [vmem:[#allocation14] sm:$0xff]   ;;  %4223 = vmatprep.subr.bf16.mxu1 %v4791_v34 }
 0xb63   :  { %4434 = vmatmul.mubr.msk.bf16.vlgmr.msra.gmra.mrb[24].mxu1 %vm504_vm1, %v1501_v5  ;;  %v4793_v5 = vld [vmem:[#allocation14 + $0x48] sm:$0xff]  }
 0xb64   :  { %4224 = vmatpush3.bf16.msra.mxu1 %v4792_v35 }
 0xb65   :  { %4225 = vmatprep.subr.bf16.mxu1 %v4793_v5 }
 0xc36   :  { %v1556_v37 = vpop.f32.mrb[24].mxu1 }
 0xc37   :  { %v1563_v39 = vadd.f32 %v1556_v37, %v1295_v23  ;;  %v4435_v40 = vpop.f32.mrb[25].mxu1  ;;  %v4794_v37 = vld [vmem:[#allocation14 + $0x8] sm:$0xff]  }
 0xc38   :  { %v1559_v41 = vpop.f32.mrb[26].mxu1  ;;  %4226 = vmatpush3.bf16.msra.mxu1 %v4794_v37  ;;  %v4797_v40 = vld [vmem:[#allocation14 + $0x58] sm:$0xff]  }
 0xc39   :  { %v1572_v42 = vadd.f32 %v4017_v38, %v1563_v39  ;;  %v1564_v43 = vadd.f32 %v1559_v41, %v1296_v26  ;;  %v4436_v44 = vpop.f32.mrb[27].mxu1  ;;  %v4018_v26 = vld [vmem:[%s5881_s8] ss:$0 sm:$0xff]  ;;  %v4796_v39 = vld [vmem:[#allocation14 + $0x10] sm:$0xff]   ;;  %v4798_v41 = vld [vmem:[#allocation14 + $0x18] sm:$0xff]  }
 0xc3a   :  { %v4801_v44 = vld [vmem:[#allocation14 + $0x68] sm:$0xff]  }
 0xc3b   :  { %v1573_v16 = vadd.f32 %v4017_v38, %v1564_v43  ;;  %v1574_v45 = vadd.f32 %v1572_v42, %v5490_v50  ;;  %v4795_v38 = vld [vmem:[#allocation14 + $0x50] sm:$0xff]   ;;  %v4799_v42 = vld [vmem:[#allocation14 + $0x60] sm:$0xff]  }
 0xc3c   :  { %4227 = vmatprep.subr.bf16.mxu1 %v4795_v38  ;;  %v4800_v43 = vld [vmem:[#allocation14 + $0x20] sm:$0xff]  }
 0xc3d   :  { %1578 = vadd.xlane.f32.xlu0 %v1574_v45  ;;  %v1575_v46 = vadd.f32 %v1573_v16, %v5492_v51  ;;  %v4775_v51 = vld [vmem:[#allocation13 + $0x24] ss:$8 sps:$4 sm:$0xff]   ;;  %4228 = vmatpush3.bf16.msra.mxu1 %v4796_v39 }
 0xc3e   :  { %1729 = vmatprep.subr.bf16.mxu0 %v4775_v51  ;;  %4229 = vmatprep.subr.bf16.mxu1 %v4797_v40  ;;  %v4802_v16 = vld [vmem:[#allocation14 + $0x28] sm:$0xff]  }
 0xc3f   :  { %1730 = vmatpush1.bf16.msra.mxu0 %v4773_v2 }
 0xc40   :  { %1731 = vmatprep.subr.bf16.mxu0 %v4778_v3 }
 0xc41   :  { %1580 = vadd.xlane.f32.xlu0 %v1575_v46  ;;  %4230 = vmatpush3.bf16.msra.mxu1 %v4798_v41 }
 0xc42   :  { %4231 = vmatprep.subr.bf16.mxu1 %v4799_v42 }
 0xc43   :  { %1732 = vmatpush1.bf16.msra.mxu0 %v4776_v6 }
 0xc44   :  { %1733 = vmatprep.subr.bf16.mxu0 %v4781_v7 }
 0xc45   :  { %4232 = vmatpush3.bf16.msra.mxu1 %v4800_v43 }
 0xc46   :  { %4233 = vmatprep.subr.bf16.mxu1 %v4801_v44 }
 0xc47   :  { %1734 = vmatpush1.bf16.msra.mxu0 %v4779_v8 }
 0xc48   :  { %1735 = vmatprep.subr.bf16.mxu0 %v4784_v9 }
 0xc49   :  { %4234 = vmatpush3.bf16.msra.mxu1 %v4802_v16 }
 0xc4b   :  { %1736 = vmatpush1.bf16.msra.mxu0 %v4782_v10 }
 0xc4c   :  { %1737 = vmatprep.subr.bf16.mxu0 %v4787_v12 }
 0xc4f   :  { %1738 = vmatpush1.bf16.msra.mxu0 %v4785_v14 }
 0xc50   :  { %1739 = vmatprep.subr.bf16.mxu0 %v4790_v17 }
 0xc53   :  { %1740 = vmatpush1.bf16.msra.mxu0 %v4788_v18 }
 0xcca   :  { %v1579_v53 = vpop.xlane.xlu0 %1578 }
 0xccb   :  { %v1582_v56 = vmul.f32 0.0078125, %v1579_v53  ;;  %v1642_v53 = vrot.slane %v1633_v49, %v5506_v58 }
 0xccd   :  { %v1584_v59 = vsub.f32 %v1574_v45, %v1582_v56  ;;  %v4803_v45 = vld [vmem:[#allocation14 + $0x70] sm:$0xff]  }
 0xcce   :  { %v1581_v60 = vpop.xlane.xlu0 %1580  ;;  %4235 = vmatprep.subr.bf16.mxu1 %v4803_v45 }
 0xccf   :  { %v1583_v61 = vmul.f32 0.0078125, %v1581_v60  ;;  %v1586_v62 = vmul.f32 %v1584_v59, %v1584_v59 }
 0xcd1   :  { %v1585_v63 = vsub.f32 %v1575_v46, %v1583_v61  ;;  %1588 = vadd.xlane.f32.xlu0 %v1586_v62  ;;  %v4804_v46 = vld [vmem:[#allocation14 + $0x30] sm:$0xff]  }
 0xcd2   :  { %4236 = vmatpush3.bf16.msra.mxu1 %v4804_v46  ;;  %v4036_v46 = vld [vmem:[%s5886_s13] ss:$0 sm:$0xff] }
 0xcd3   :  { %v1587_v50 = vmul.f32 %v1585_v63, %v1585_v63  ;;  %4237 = vmatprep.subr.bf16.mxu1 %v4805_v47 }
 0xcd5   :  { %1590 = vadd.xlane.f32.xlu0 %v1587_v50 }
 0xcd6   :  { %4238 = vmatpush3.bf16.msra.mxu1 %v4806_v48 }
 0xcd7   :  { %4437 = vmatprep.subr.bf16.mxu1 %v5244_v4 }
 0xd5e   :  { %v1589_v19 = vpop.xlane.xlu0 %1588 }
 0xd5f   :  { %v1592_v20 = vmul.f32 0.0078125, %v1589_v19 }
 0xd61   :  { %v1594_v15 = vadd.f32 1e-12, %v1592_v20 }
 0xd62   :  { %v1591_v21 = vpop.xlane.xlu0 %1590 }
 0xd63   :  { %4931 = vrsqrt.f32 %v1594_v15  ;;  %v1593_v22 = vmul.f32 0.0078125, %v1591_v21 }
 0xd65   :  { %v1595_v23 = vadd.f32 1e-12, %v1593_v22 }
 0xd67   :  { %4933 = vrsqrt.f32 %v1595_v23 }
 0xd6d   :  { %v4932_v24 = vpop.eup %4931 }
 0xd6e   :  { %v1598_v25 = vmul.f32 %v4932_v24, %v1584_v59 }
 0xd70   :  { %v1606_v29 = vmul.f32 %v4018_v26, %v1598_v25 }
 0xd71   :  { %v4934_v27 = vpop.eup %4933 }
 0xd72   :  { %v1599_v28 = vmul.f32 %v4934_v27, %v1585_v63  ;;  %v5652_v11 = vadd.f32 %v4019_v0, %v1606_v29 }
 0xd74   :  { %v1607_v31 = vmul.f32 %v4018_v26, %v1599_v28 }
 0xd76   :  { %v5654_v32 = vadd.f32 %v4019_v0, %v1607_v31 }
 0xd78   :  { %v1616_v1 = vpack.c.bf16 %v5654_v32, %v5652_v11 }
 0xd7a   :  { %1758 = vmatmul.mubr.bf16.vlgmr.msra.gmra.mrb[12].mxu0 %v1616_v1 }
 0xd7b   :  { %2236 = vmatprep.mubr.bf16.mxu0 %v5245_v30 }
 0xe4d   :  { %v1759_v56 = vpop.f32.mrb[12].mxu0 }
 0xe4e   :  { %v1760_v59 = vadd.f32 %v1759_v56, %v1638_v52  ;;  %v1761_v60 = vpop.f32.mrb[13].mxu0 }
 0xe4f   :  { %v1762_v61 = vadd.f32 %v1761_v60, %v1642_v53  ;;  %v1763_v62 = vpop.f32.mrb[14].mxu0 }
 0xe50   :  { %v1772_v63 = vmul.f32 0.044715, %v1760_v59  ;;  %v1764_v50 = vadd.f32 %v1763_v62, %v1638_v52  ;;  %v1765_v51 = vpop.f32.mrb[15].mxu0  ;;  %v1768_v34 = vmul.f32 0.5, %v1760_v59  ;;  %v4807_v62 = vld [vmem:[#allocation10 + $0xc0] ss:$12 sps:$4 sm:$0xff]  }
 0xe51   :  { %v1773_v2 = vmul.f32 0.044715, %v1762_v61  ;;  %v1766_v3 = vadd.f32 %v1765_v51, %v1642_v53  ;;  %v1769_v37 = vmul.f32 0.5, %v1762_v61  ;;  %v4813_v51 = vld [vmem:[#allocation10 + $0xdc] ss:$12 sps:$4 sm:$0xff]  }
 0xe52   :  { %v1776_v6 = vmul.f32 %v1772_v63, %v1760_v59  ;;  %v1774_v7 = vmul.f32 0.044715, %v1764_v50  ;;  %v1770_v35 = vmul.f32 0.5, %v1764_v50  ;;  %v4809_v63 = vld [vmem:[#allocation10 + $0xc4] ss:$12 sps:$4 sm:$0xff]  }
 0xe53   :  { %v1777_v8 = vmul.f32 %v1773_v2, %v1762_v61  ;;  %v1775_v9 = vmul.f32 0.044715, %v1766_v3  ;;  %v1771_v38 = vmul.f32 0.5, %v1766_v3  ;;  %2204 = vmatprep.subr.bf16.mxu0 %v4809_v63  ;;  %v4811_v2 = vld [vmem:[#allocation10 + $0xd8] ss:$12 sps:$4 sm:$0xff]  }
 0xe54   :  { %v1780_v10 = vmul.f32 %v1776_v6, %v1760_v59  ;;  %v1778_v12 = vmul.f32 %v1774_v7, %v1764_v50  ;;  %2205 = vmatpush1.bf16.msra.mxu0 %v4807_v62 }
 0xe55   :  { %v1781_v14 = vmul.f32 %v1777_v8, %v1762_v61  ;;  %v1779_v17 = vmul.f32 %v1775_v9, %v1766_v3  ;;  %2206 = vmatprep.subr.bf16.mxu0 %v4813_v51 }
 0xe56   :  { %v1784_v18 = vadd.f32 %v1780_v10, %v1760_v59  ;;  %v1782_v19 = vmul.f32 %v1778_v12, %v1764_v50  ;;  %v4814_v12 = vld [vmem:[#allocation10 + $0xe0] ss:$12 sps:$4 sm:$0xff]  }
 0xe57   :  { %v1783_v20 = vmul.f32 %v1779_v17, %v1766_v3  ;;  %v1785_v15 = vadd.f32 %v1781_v14, %v1762_v61  ;;  %v4817_v14 = vld [vmem:[#allocation10 + $0xf4] ss:$12 sps:$4 sm:$0xff]   ;;  %v4815_v17 = vld [vmem:[#allocation10 + $0xf0] ss:$12 sps:$4 sm:$0xff]  }
 0xe58   :  { %v1788_v21 = vmul.f32 0.7978846, %v1784_v18  ;;  %v1786_v22 = vadd.f32 %v1782_v19, %v1764_v50  ;;  %v4810_v50 = vld [vmem:[#allocation10 + $0xc8] ss:$12 sps:$4 sm:$0xff]   ;;  %2207 = vmatpush1.bf16.msra.mxu0 %v4811_v2  ;;  %v4818_v18 = vld [vmem:[#allocation10 + $0xf8] ss:$12 sps:$4 sm:$0xff]  }
 0xe59   :  { %v1787_v23 = vadd.f32 %v1783_v20, %v1766_v3  ;;  %v1789_v24 = vmul.f32 0.7978846, %v1785_v15  ;;  %2208 = vmatprep.subr.bf16.mxu0 %v4817_v14  ;;  %v4821_v19 = vld [vmem:[#allocation10 + $0x10c] ss:$12 sps:$4 sm:$0xff]   ;;  %v4819_v20 = vld [vmem:[#allocation10 + $0x108] ss:$12 sps:$4 sm:$0xff]  }
 0xe5a   :  { %4935 = vtanh.f32 %v1788_v21  ;;  %v1790_v25 = vmul.f32 0.7978846, %v1786_v22  ;;  %v4822_v15 = vld [vmem:[#allocation10 + $0x110] ss:$12 sps:$4 sm:$0xff]   ;;  %v4823_v22 = vld [vmem:[#allocation10 + $0x120] ss:$12 sps:$4 sm:$0xff]  }
 0xe5b   :  { %v1791_v26 = vmul.f32 0.7978846, %v1787_v23  ;;  %4937 = vtanh.f32 %v1789_v24  ;;  %v4825_v21 = vld [vmem:[#allocation10 + $0x124] ss:$12 sps:$4 sm:$0xff]   ;;  %v4826_v23 = vld [vmem:[#allocation10 + $0x128] ss:$12 sps:$4 sm:$0xff]  }
 0xe5c   :  { %4939 = vtanh.f32 %v1790_v25  ;;  %2209 = vmatpush1.bf16.msra.mxu0 %v4815_v17  ;;  %v4829_v24 = vld [vmem:[#allocation10 + $0x13c] ss:$12 sps:$4 sm:$0xff]   ;;  %v4827_v25 = vld [vmem:[#allocation10 + $0x138] ss:$12 sps:$4 sm:$0xff]  }
 0xe5d   :  { %4941 = vtanh.f32 %v1791_v26  ;;  %2210 = vmatprep.subr.bf16.mxu0 %v4821_v19  ;;  %v4830_v26 = vld [vmem:[#allocation10 + $0x140] ss:$12 sps:$4 sm:$0xff]  }
 0xe60   :  { %2211 = vmatpush1.bf16.msra.mxu0 %v4819_v20 }
 0xe61   :  { %2212 = vmatprep.subr.bf16.mxu0 %v4825_v21 }
 0xe64   :  { %v4936_v27 = vpop.eup %4935  ;;  %2213 = vmatpush1.bf16.msra.mxu0 %v4823_v22 }
 0xe65   :  { %v4938_v28 = vpop.eup %4937  ;;  %v1796_v29 = vadd.f32 1.0, %v4936_v27  ;;  %2214 = vmatprep.subr.bf16.mxu0 %v4829_v24  ;;  %v4833_v27 = vld [vmem:[#allocation10 + $0x154] ss:$12 sps:$4 sm:$0xff]  }
 0xe66   :  { %v4940_v0 = vpop.eup %4939  ;;  %v1797_v31 = vadd.f32 1.0, %v4938_v28  ;;  %v4831_v28 = vld [vmem:[#allocation10 + $0x150] ss:$12 sps:$4 sm:$0xff]  }
 0xe67   :  { %v4942_v1 = vpop.eup %4941  ;;  %v1798_v5 = vadd.f32 1.0, %v4940_v0  ;;  %v1800_v40 = vmul.f32 %v1796_v29, %v1768_v34  ;;  %v4834_v29 = vld [vmem:[#allocation10 + $0x158] ss:$12 sps:$4 sm:$0xff]  }
 0xe68   :  { %v1799_v39 = vadd.f32 1.0, %v4942_v1  ;;  %v1801_v42 = vmul.f32 %v1797_v31, %v1769_v37  ;;  %2215 = vmatpush1.bf16.msra.mxu0 %v4827_v25  ;;  %v4837_v0 = vld [vmem:[#allocation10 + $0x16c] ss:$12 sps:$4 sm:$0xff]   ;;  %v4835_v31 = vld [vmem:[#allocation10 + $0x168] ss:$12 sps:$4 sm:$0xff]  }
 0xe69   :  { %v1802_v41 = vmul.f32 %v1798_v5, %v1770_v35  ;;  %2216 = vmatprep.subr.bf16.mxu0 %v4833_v27  ;;  %v4838_v1 = vld [vmem:[#allocation10 + $0x170] ss:$12 sps:$4 sm:$0xff]  }
 0xe6a   :  { %v1803_v43 = vmul.f32 %v1799_v39, %v1771_v38 }
 0xe6b   :  { %v1804_v44 = vpack.c.bf16 %v1802_v41, %v1800_v40 }
 0xe6c   :  { %v1805_v16 = vpack.c.bf16 %v1803_v43, %v1801_v42  ;;  %2217 = vmatpush1.bf16.msra.mxu0 %v4831_v28  ;;  %v4053_v42 = vld [vmem:[%s5887_s14] ss:$0 sm:$0xff] }
 0xe6d   :  { %2218 = vmatprep.subr.bf16.mxu0 %v4837_v0 }
 0xe6e   :  { %1973 = vmatprep.mubr.bf16.mxu1 %v1805_v16 }
 0xe6f   :  { %1974 = vmatmul.mubr.bf16.vlgmr.msra.gmra.mrb[28].mxu1 %v1804_v44 }
 0xe70   :  { %4453 = vmatprep.mubr.msk.bf16.mxu1 %vm5246_vm0, %v5244_v4  ;;  %4438 = vmatpush3.bf16.msra.mxu1 %v4810_v50 }
 0xe71   :  { %4439 = vmatprep.subr.bf16.mxu1 %v5244_v4  ;;  %2219 = vmatpush1.bf16.msra.mxu0 %v4835_v31 }
 0xe74   :  { %4440 = vmatpush3.bf16.msra.mxu1 %v4814_v12 }
 0xe75   :  { %4441 = vmatprep.subr.bf16.mxu1 %v5244_v4 }
 0xe78   :  { %4442 = vmatpush3.bf16.msra.mxu1 %v4818_v18 }
 0xe79   :  { %4443 = vmatprep.subr.bf16.mxu1 %v5244_v4 }
 0xe7c   :  { %4444 = vmatpush3.bf16.msra.mxu1 %v4822_v15 }
 0xe7d   :  { %4445 = vmatprep.subr.bf16.mxu1 %v5244_v4 }
 0xe80   :  { %4446 = vmatpush3.bf16.msra.mxu1 %v4826_v23 }
 0xe81   :  { %4447 = vmatprep.subr.bf16.mxu1 %v5244_v4 }
 0xe84   :  { %4448 = vmatpush3.bf16.msra.mxu1 %v4830_v26 }
 0xe85   :  { %4449 = vmatprep.subr.bf16.mxu1 %v5244_v4 }
 0xe88   :  { %4450 = vmatpush3.bf16.msra.mxu1 %v4834_v29 }
 0xe89   :  { %4451 = vmatprep.subr.bf16.mxu1 %v5244_v4 }
 0xe8c   :  { %4452 = vmatpush3.bf16.msra.mxu1 %v4838_v1 }
 0xf42   :  { %v4239_v45 = vpop.f32.mrb[28].mxu1 }
 0xf43   :  { %v4240_v47 = vpop.f32.mrb[29].mxu1 }
 0xf44   :  { %v4241_v48 = vadd.f32 %v4240_v47, %v4239_v45  ;;  %v4242_v49 = vpop.f32.mrb[30].mxu1  ;;  %v4054_v45 = vld [vmem:[%s5888_s15] ss:$0 sm:$0xff] }
 0xf45   :  { %v4243_v52 = vpop.f32.mrb[31].mxu1 }
 0xf46   :  { %v1976_v53 = vadd.f32 %v4241_v48, %v4036_v46  ;;  %v4244_v56 = vadd.f32 %v4243_v52, %v4242_v49  ;;  %v4055_v52 = vld [vmem:[%s5878_s5 + $0x3] sm:$0x7] }
 0xf48   :  { %v1979_v59 = vadd.f32 %v4244_v56, %v4036_v46  ;;  %v1982_v60 = vadd.f32 %v1976_v53, %v5652_v11  ;;  %v2064_v53 = vrot.slane %v4055_v52, %v5499_v55  ;;  %v2072_v56 = vrot.slane %v4055_v52, %v287_v57 }
 0xf4a   :  { %1986 = vadd.xlane.f32.xlu1 %v1982_v60  ;;  %v1983_v61 = vadd.f32 %v1979_v59, %v5654_v32 }
 0xf4c   :  { %1988 = vadd.xlane.f32.xlu0 %v1983_v61 }
 0xfd7   :  { %v1987_v3 = vpop.xlane.xlu1 %1986 }
 0xfd8   :  { %v1990_v6 = vmul.f32 0.0078125, %v1987_v3 }
 0xfd9   :  { %v1989_v7 = vpop.xlane.xlu0 %1988 }
 0xfda   :  { %v1992_v11 = vsub.f32 %v1982_v60, %v1990_v6  ;;  %v1991_v8 = vmul.f32 0.0078125, %v1989_v7 }
 0xfdc   :  { %v1993_v9 = vsub.f32 %v1983_v61, %v1991_v8  ;;  %v1994_v32 = vmul.f32 %v1992_v11, %v1992_v11  ;;  %v2068_v61 = vrot.slane %v4055_v52, %v5506_v58 }
 0xfde   :  { %1996 = vadd.xlane.f32.xlu0 %v1994_v32  ;;  %v1995_v10 = vmul.f32 %v1993_v9, %v1993_v9 }
 0xfe2   :  { %1998 = vadd.xlane.f32.xlu0 %v1995_v10 }
0x106b   :  { %v1997_v34 = vpop.xlane.xlu0 %1996 }
0x106c   :  { %v2000_v35 = vmul.f32 0.0078125, %v1997_v34 }
0x106e   :  { %v2002_v5 = vadd.f32 1e-12, %v2000_v35 }
0x106f   :  { %v1999_v37 = vpop.xlane.xlu0 %1998 }
0x1070   :  { %4943 = vrsqrt.f32 %v2002_v5  ;;  %v2001_v38 = vmul.f32 0.0078125, %v1999_v37 }
0x1072   :  { %v2003_v39 = vadd.f32 1e-12, %v2001_v38 }
0x1074   :  { %4945 = vrsqrt.f32 %v2003_v39 }
0x107a   :  { %v4944_v40 = vpop.eup %4943 }
0x107b   :  { %v2006_v41 = vmul.f32 %v4944_v40, %v1992_v11 }
0x107d   :  { %v2014_v16 = vmul.f32 %v4053_v42, %v2006_v41 }
0x107e   :  { %v4946_v43 = vpop.eup %4945 }
0x107f   :  { %v2007_v44 = vmul.f32 %v4946_v43, %v1993_v9  ;;  %v5685_v47 = vadd.f32 %v4054_v45, %v2014_v16 }
0x1081   :  { %v2015_v46 = vmul.f32 %v4053_v42, %v2007_v44 }
0x1083   :  { %v5687_v48 = vadd.f32 %v4054_v45, %v2015_v46 }
0x1085   :  { %v2024_v49 = vpack.c.bf16 %v5687_v48, %v5685_v47 }
0x1087   :  { %2237 = vmatmul.mubr.bf16.vlgmr.msra.gmra.mrb[16].mxu0 %v2024_v49  ;;  %4454 = vmatmul.mubr.bf16.vlgmr.msra.gmra.mrb[32].mxu1 %v2024_v49 }
0x115a   :  { %v2238_v59 = vpop.f32.mrb[16].mxu0  ;;  %v2281_v60 = vpop.f32.mrb[32].mxu1 }
0x115b   :  { %v5698_v62 = vadd.f32 %v2238_v59, %v2064_v53  ;;  %v2240_v63 = vpop.f32.mrb[17].mxu0  ;;  %v4455_v50 = vpop.f32.mrb[33].mxu1  ;;  %v2282_v3 = vadd.f32 %v2281_v60, %v2072_v56 }
0x115c   :  { %v2242_v51 = vpop.f32.mrb[18].mxu0  ;;  %v2284_v2 = vpop.f32.mrb[34].mxu1  ;;  %v2241_v54 = vadd.f32 %v2240_v63, %v2068_v61 }
0x115d   :  { %v2285_v6 = vadd.f32 %v2284_v2, %v2072_v56  ;;  %v2244_v7 = vpop.f32.mrb[19].mxu0  ;;  %v4456_v11 = vpop.f32.mrb[35].mxu1  ;;  %2488 = vrot.lane.b32.xlu1 %v5698_v62, %s5247_s29  ;;  %4461 = vmatprep.mubr.msk.f32.mxu0 %vm504_vm1, %v5698_v62  ;;  %v5712_v12 = vadd.f32 %v2242_v51, %v2064_v53 }
0x115e   :  { %v2245_v57 = vadd.f32 %v2244_v7, %v2068_v61  ;;  %v4841_v11 = vld [vmem:[#allocation11 + $0x40] sm:$0xff]  }
0x115f   :  { %v4611_v8 = vpack.c.bf16 %v2285_v6, %v2282_v3  ;;  %v5704_v9 = vpack.i.bf16 %v2285_v6, %v2282_v3 }
0x1160   :  { %v5706_v32 = vpack.i.bf16 %v2245_v57, %v2241_v54  ;;  %v4605_v10 = vpack.c.bf16 %v2245_v57, %v2241_v54 }
0x1161   :  { %4612 = vmatprep.subr.bf16.mxu1 %v4611_v8 }
0x1162   :  { %4614 = vmatpush3.bf16.msra.mxu1 %v4611_v8  ;;  %4698 = vrot.lane.b32.xlu0 %v5706_v32, %s5247_s29  ;;  %v4842_v8 = vld [vmem:[#allocation11 + $0x48] sm:$0xff]  }
0x1163   :  { %4607 = vmatprep.subr.msk.bf16.mxu0 %vm5522_vm2, %v4605_v10 }
0x1164   :  { %4610 = vmatpush3.bf16.xpose.msk.msra.mxu0 %vm5522_vm2, %v4605_v10 }
0x1166   :  { %2490 = vrot.lane.b32.xlu0 %v5712_v12, %s5247_s29 }
0x116b   :  { %4462 = vmatmul.mubr.msk.f32.vlgmr.msra.gmra.mrb[20].mxu0 %vm504_vm1, %v5712_v12 }
0x11cf   :  { %v2489_v14 = vpop.permute.xlu1 %2488 }
0x11d0   :  { %4475 = vmatprep.mubr.msk.f32.mxu0 %vm504_vm1, %v2489_v14 }
0x11d4   :  { %v4699_v17 = vpop.permute.xlu0 %4698 }
0x11d5   :  { %v4701_v18 = vunpack.i.h.bf16 %v4699_v17  ;;  %v4700_v19 = vunpack.i.l.bf16 %v4699_v17 }
0x11d7   :  { %v4615_v20 = vpack.c.bf16 %v4701_v18, %v4700_v19 }
0x11d8   :  { %v2491_v15 = vpop.permute.xlu0 %2490 }
0x11d9   :  { %4617 = vmatprep.subr.msk.bf16.mxu0 %vm5522_vm2, %v4615_v20 }
0x11da   :  { %4620 = vmatpush3.bf16.xpose.msk.msra.mxu0 %vm5522_vm2, %v4615_v20 }
0x11db   :  { %4493 = vmatprep.subr.bf16.mxu0 %v5244_v4 }
0x11e1   :  { %4476 = vmatmul.mubr.msk.f32.vlgmr.msra.gmra.mrb[22].mxu0 %vm504_vm1, %v2491_v15 }
0x11e2   :  { %4497 = vmatprep.mubr.msk.bf16.mxu0 %vm5246_vm0, %v5244_v4  ;;  %4494 = vmatpush3.bf16.msra.mxu0 %v4841_v11 }
0x11e3   :  { %4495 = vmatprep.subr.bf16.mxu0 %v5244_v4 }
0x11e6   :  { %4496 = vmatpush3.bf16.msra.mxu0 %v4842_v8 }
0x123e   :  { %v4463_v21 = vpop.f32.mrb[20].mxu0 }
0x123f   :  { %v2376_v22 = vmul.f32 0.17677669, %v4463_v21  ;;  %v2366_v23 = vpop.f32.mrb[21].mxu0 }
0x1240   :  { %v2375_v24 = vmul.f32 0.17677669, %v2366_v23 }
0x1241   :  { %v2378_v25 = vadd.f32 %v2376_v22, %v5548_v33 }
0x1242   :  { %v2377_v26 = vadd.f32 %v2375_v24, %v5550_v36  ;;  %v4839_v24 = vld [vmem:[#allocation11 + $0x50] sm:$0xff]  }
0x1243   :  { %v2382_v27 = vsel %vm596_vm8, %v2378_v25, -inf }
0x1244   :  { %2383 = vmax.xlane.f32.xlu1 %v2382_v27  ;;  %v2379_v28 = vsel %vm596_vm8, %v2377_v26, -inf }
0x1245   :  { %2380 = vmax.xlane.f32.xlu0 %v2379_v28  ;;  %v4840_v28 = vld [vmem:[#allocation11 + $0x58] sm:$0xff]  }
0x12b4   :  { %v4477_v29 = vpop.f32.mrb[22].mxu0 }
0x12b5   :  { %v2570_v0 = vpop.f32.mrb[23].mxu0  ;;  %v2580_v31 = vmul.f32 0.17677669, %v4477_v29 }
0x12b6   :  { %v2579_v1 = vmul.f32 0.17677669, %v2570_v0 }
0x12b7   :  { %v2582_v5 = vadd.f32 %v2580_v31, %v5548_v33 }
0x12b8   :  { %v2581_v34 = vadd.f32 %v2579_v1, %v5550_v36 }
0x12b9   :  { %v2586_v37 = vsel %vm596_vm8, %v2582_v5, -inf }
0x12ba   :  { %v2583_v35 = vsel %vm596_vm8, %v2581_v34, -inf }
0x12bb   :  { %2584 = vmax.xlane.f32.xlu0 %v2583_v35 }
0x12bf   :  { %2587 = vmax.xlane.f32.xlu0 %v2586_v37 }
0x12d1   :  { %v2384_v38 = vpop.xlane.xlu1 %2383 }
0x12d2   :  { %v2386_v39 = vsub.f32 %v2378_v25, %v2384_v38  ;;  %v2381_v40 = vpop.xlane.xlu0 %2380 }
0x12d3   :  { %v2385_v41 = vsub.f32 %v2377_v26, %v2381_v40 }
0x12d4   :  { %v2389_v42 = vmul.f32 1.442695, %v2386_v39 }
0x12d5   :  { %v2387_v43 = vmul.f32 1.442695, %v2385_v41 }
0x12d6   :  { %4947 = vpow2.f32 %v2389_v42 }
0x12d7   :  { %4949 = vpow2.f32 %v2387_v43 }
0x12e0   :  { %v4948_v44 = vpop.eup %4947 }
0x12e1   :  { %v2394_v16 = vsel %vm596_vm8, %v4948_v44, 0.0  ;;  %v4950_v45 = vpop.eup %4949 }
0x12e2   :  { %2395 = vadd.xlane.f32.xlu0 %v2394_v16  ;;  %v2391_v46 = vsel %vm596_vm8, %v4950_v45, 0.0 }
0x12e6   :  { %2392 = vadd.xlane.f32.xlu0 %v2391_v46 }
0x1348   :  { %v2585_v49 = vpop.xlane.xlu0 %2584 }
0x1349   :  { %v2589_v52 = vsub.f32 %v2581_v34, %v2585_v49 }
0x134b   :  { %v2591_v53 = vmul.f32 1.442695, %v2589_v52 }
0x134c   :  { %v2588_v56 = vpop.xlane.xlu0 %2587 }
0x134d   :  { %4951 = vpow2.f32 %v2591_v53  ;;  %v2590_v59 = vsub.f32 %v2582_v5, %v2588_v56 }
0x134f   :  { %v2593_v60 = vmul.f32 1.442695, %v2590_v59 }
0x1351   :  { %4953 = vpow2.f32 %v2593_v60 }
0x1357   :  { %v4952_v61 = vpop.eup %4951 }
0x1358   :  { %v2595_v63 = vsel %vm596_vm8, %v4952_v61, 0.0 }
0x1359   :  { %2596 = vadd.xlane.f32.xlu0 %v2595_v63 }
0x135b   :  { %v4954_v50 = vpop.eup %4953 }
0x135c   :  { %v2598_v51 = vsel %vm596_vm8, %v4954_v50, 0.0 }
0x135d   :  { %2599 = vadd.xlane.f32.xlu1 %v2598_v51 }
0x136e   :  { %4708 = vrot.lane.b32.xlu1 %v5706_v32, %s5905_s12 }
0x136f   :  { %v2396_v2 = vpop.xlane.xlu0 %2395  ;;  %4703 = vrot.lane.b32.xlu0 %v5704_v9, %s5247_s29 }
0x1370   :  { %4955 = vrcp.f32 %v2396_v2 }
0x1372   :  { %2812 = vrot.lane.b32.xlu1 %v5698_v62, %s5905_s12 }
0x1373   :  { %v2393_v3 = vpop.xlane.xlu0 %2392  ;;  %2814 = vrot.lane.b32.xlu0 %v5712_v12, %s5905_s12 }
0x1374   :  { %4957 = vrcp.f32 %v2393_v3 }
0x137a   :  { %v4956_v6 = vpop.eup %4955 }
0x137b   :  { %v2400_v57 = vmul.f32 %v4956_v6, %v4948_v44 }
0x137e   :  { %v4958_v7 = vpop.eup %4957 }
0x137f   :  { %v2399_v54 = vmul.f32 %v4958_v7, %v4950_v45 }
0x1381   :  { %4468 = vmatprep.mubr.msk.f32.mxu1 %vm596_vm8, %v2399_v54 }
0x1382   :  { %4469 = vmatmul.mubr.msk.f32.vlgmr.msra.gmra.mrb[36].mxu1 %vm596_vm8, %v2400_v57 }
0x13e6   :  { %v2597_v10 = vpop.xlane.xlu0 %2596 }
0x13e7   :  { %4959 = vrcp.f32 %v2597_v10 }
0x13ea   :  { %v2600_v14 = vpop.xlane.xlu1 %2599  ;;  %v4704_v17 = vpop.permute.xlu0 %4703 }
0x13eb   :  { %4961 = vrcp.f32 %v2600_v14  ;;  %v4706_v18 = vunpack.i.h.bf16 %v4704_v17  ;;  %v4705_v19 = vunpack.i.l.bf16 %v4704_v17  ;;  %v4843_v14 = vld [vmem:[#allocation11 + $0x60] sm:$0xff]  }
0x13ed   :  { %v4621_v20 = vpack.c.bf16 %v4706_v18, %v4705_v19 }
0x13ee   :  { %v4709_v23 = vpop.permute.xlu1 %4708  ;;  %v2815_v38 = vpop.permute.xlu0 %2814 }
0x13ef   :  { %4622 = vmatprep.subr.bf16.mxu1 %v4621_v20  ;;  %v4711_v26 = vunpack.i.h.bf16 %v4709_v23  ;;  %v4710_v27 = vunpack.i.l.bf16 %v4709_v23 }
0x13f0   :  { %4624 = vmatpush3.bf16.msra.mxu1 %v4621_v20 }
0x13f1   :  { %v4960_v15 = vpop.eup %4959  ;;  %4485 = vmatprep.subr.bf16.mxu1 %v5244_v4  ;;  %v4625_v29 = vpack.c.bf16 %v4711_v26, %v4710_v27 }
0x13f2   :  { %v2603_v21 = vmul.f32 %v4960_v15, %v4952_v61  ;;  %v2813_v37 = vpop.permute.xlu1 %2812 }
0x13f4   :  { %4482 = vmatprep.mubr.msk.f32.mxu1 %vm596_vm8, %v2603_v21 }
0x13f5   :  { %v4962_v22 = vpop.eup %4961 }
0x13f6   :  { %v2604_v25 = vmul.f32 %v4962_v22, %v4954_v50 }
0x13f8   :  { %4483 = vmatmul.mubr.msk.f32.vlgmr.msra.gmra.mrb[38].mxu1 %vm596_vm8, %v2604_v25 }
0x13f9   :  { %4486 = vmatpush3.bf16.msra.mxu1 %v4839_v24  ;;  %4489 = vmatprep.mubr.msk.bf16.mxu1 %vm5246_vm0, %v5244_v4 }
0x13fa   :  { %4487 = vmatprep.subr.bf16.mxu1 %v5244_v4 }
0x13fd   :  { %4488 = vmatpush3.bf16.msra.mxu1 %v4840_v28 }
0x13fe   :  { %4627 = vmatprep.subr.msk.bf16.mxu1 %vm5522_vm2, %v4625_v29 }
0x1455   :  { %v4470_v0 = vpop.f32.mrb[36].mxu1 }
0x1456   :  { %v2473_v31 = vpop.f32.mrb[37].mxu1 }
0x1457   :  { %v2482_v1 = vpack.c.bf16 %v4470_v0, %v2473_v31 }
0x1459   :  { %4498 = vmatmul.mubr.msk.bf16.vlgmr.msra.gmra.mrb[24].mxu0 %vm504_vm1, %v2482_v1 }
0x14cb   :  { %v4484_v34 = vpop.f32.mrb[38].mxu1 }
0x14cc   :  { %v2685_v35 = vpop.f32.mrb[39].mxu1 }
0x14cd   :  { %v2694_v5 = vpack.c.bf16 %v4484_v34, %v2685_v35 }
0x14cf   :  { %4490 = vmatmul.mubr.msk.bf16.vlgmr.msra.gmra.mrb[40].mxu1 %vm504_vm1, %v2694_v5 }
0x14d0   :  { %4630 = vmatpush3.bf16.xpose.msk.msra.mxu1 %vm5522_vm2, %v4625_v29  ;;  %4505 = vmatprep.mubr.msk.f32.mxu1 %vm504_vm1, %v2813_v37  ;;  %v4844_v29 = vld [vmem:[#allocation11 + $0x68] sm:$0xff]  }
0x14d1   :  { %4515 = vmatprep.subr.bf16.mxu1 %v5244_v4 }
0x14d7   :  { %4506 = vmatmul.mubr.msk.f32.vlgmr.msra.gmra.mrb[44].mxu1 %vm504_vm1, %v2815_v38 }
0x14d8   :  { %4519 = vmatprep.mubr.msk.bf16.mxu1 %vm5246_vm0, %v5244_v4  ;;  %4516 = vmatpush3.bf16.msra.mxu1 %v4843_v14 }
0x14d9   :  { %4517 = vmatprep.subr.bf16.mxu1 %v5244_v4 }
0x14dc   :  { %4518 = vmatpush3.bf16.msra.mxu1 %v4844_v29 }
0x14dd   :  { %4537 = vmatprep.subr.bf16.mxu1 %v5244_v4 }
0x152c   :  { %v2805_v39 = vpop.f32.mrb[24].mxu0 }
0x152d   :  { %v4499_v40 = vpop.f32.mrb[25].mxu0 }
0x152e   :  { %v2808_v41 = vpop.f32.mrb[26].mxu0 }
0x152f   :  { %v4500_v42 = vpop.f32.mrb[27].mxu0 }
0x15a2   :  { %v2749_v43 = vpop.f32.mrb[40].mxu1 }
0x15a3   :  { %v5769_v44 = vadd.f32 %v2805_v39, %v2749_v43  ;;  %v4491_v16 = vpop.f32.mrb[41].mxu1 }
0x15a4   :  { %v2752_v45 = vpop.f32.mrb[42].mxu1 }
0x15a5   :  { %v5771_v46 = vadd.f32 %v2808_v41, %v2752_v45  ;;  %v4492_v49 = vpop.f32.mrb[43].mxu1 }
0x15aa   :  { %v4507_v52 = vpop.f32.mrb[44].mxu1 }
0x15ab   :  { %v2904_v53 = vmul.f32 0.17677669, %v4507_v52  ;;  %v2894_v56 = vpop.f32.mrb[45].mxu1 }
0x15ac   :  { %v2903_v59 = vmul.f32 0.17677669, %v2894_v56  ;;  %v4845_v56 = vld [vmem:[#allocation11 + $0x70] sm:$0xff]  }
0x15ad   :  { %v2906_v60 = vadd.f32 %v2904_v53, %v5548_v33 }
0x15ae   :  { %v2905_v61 = vadd.f32 %v2903_v59, %v5550_v36 }
0x15af   :  { %v2910_v63 = vsel %vm596_vm8, %v2906_v60, -inf }
0x15b0   :  { %2911 = vmax.xlane.f32.xlu0 %v2910_v63  ;;  %v2907_v50 = vsel %vm596_vm8, %v2905_v61, -inf }
0x15b1   :  { %2908 = vmax.xlane.f32.xlu1 %v2907_v50 }
0x163d   :  { %v2912_v51 = vpop.xlane.xlu0 %2911 }
0x163e   :  { %v2914_v2 = vsub.f32 %v2906_v60, %v2912_v51  ;;  %v2909_v3 = vpop.xlane.xlu1 %2908 }
0x163f   :  { %v2913_v6 = vsub.f32 %v2905_v61, %v2909_v3 }
0x1640   :  { %v2917_v7 = vmul.f32 1.442695, %v2914_v2 }
0x1641   :  { %v2915_v11 = vmul.f32 1.442695, %v2913_v6 }
0x1642   :  { %4963 = vpow2.f32 %v2917_v7 }
0x1643   :  { %4965 = vpow2.f32 %v2915_v11 }
0x164c   :  { %v4964_v54 = vpop.eup %4963 }
0x164d   :  { %v4966_v57 = vpop.eup %4965  ;;  %v2922_v8 = vsel %vm596_vm8, %v4964_v54, 0.0 }
0x164e   :  { %2923 = vadd.xlane.f32.xlu1 %v2922_v8  ;;  %v2919_v10 = vsel %vm596_vm8, %v4966_v57, 0.0 }
0x164f   :  { %2920 = vadd.xlane.f32.xlu0 %v2919_v10 }
0x165f   :  { %4718 = vrot.lane.b32.xlu1 %v5706_v32, %s5249_s0 }
0x1663   :  { %3080 = vrot.lane.b32.xlu1 %v5698_v62, %s5249_s0 }
0x1665   :  { %4713 = vrot.lane.b32.xlu0 %v5704_v9, %s5905_s12 }
0x1669   :  { %3082 = vrot.lane.b32.xlu0 %v5712_v12, %s5249_s0 }
0x16db   :  { %v2924_v17 = vpop.xlane.xlu1 %2923 }
0x16dc   :  { %4967 = vrcp.f32 %v2924_v17  ;;  %v2921_v18 = vpop.xlane.xlu0 %2920 }
0x16dd   :  { %4969 = vrcp.f32 %v2921_v18 }
0x16df   :  { %v4719_v19 = vpop.permute.xlu1 %4718 }
0x16e0   :  { %v4714_v20 = vpop.permute.xlu0 %4713  ;;  %v4721_v32 = vunpack.i.h.bf16 %v4719_v19  ;;  %v4720_v15 = vunpack.i.l.bf16 %v4719_v19  ;;  %v4117_v19 = vld [vmem:[%s5880_s7 + $0x1] ss:$0 sm:$0xff] }
0x16e1   :  { %v4716_v21 = vunpack.i.h.bf16 %v4714_v20  ;;  %v4715_v62 = vunpack.i.l.bf16 %v4714_v20 }
0x16e2   :  { %v4635_v23 = vpack.c.bf16 %v4721_v32, %v4720_v15 }
0x16e3   :  { %v4631_v22 = vpack.c.bf16 %v4716_v21, %v4715_v62  ;;  %v3081_v27 = vpop.permute.xlu1 %3080 }
0x16e4   :  { %v3083_v28 = vpop.permute.xlu0 %3082 }
0x16e5   :  { %4632 = vmatprep.subr.bf16.mxu0 %v4631_v22 }
0x16e6   :  { %v4968_v24 = vpop.eup %4967  ;;  %4634 = vmatpush3.bf16.msra.mxu0 %v4631_v22 }
0x16e7   :  { %v4970_v12 = vpop.eup %4969  ;;  %4637 = vmatprep.subr.msk.bf16.mxu0 %vm5522_vm2, %v4635_v23  ;;  %v2928_v26 = vmul.f32 %v4968_v24, %v4964_v54 }
0x16e8   :  { %v2927_v25 = vmul.f32 %v4970_v12, %v4966_v57  ;;  %v4847_v12 = vld [vmem:[#allocation13 + $0x80] ss:$8 sps:$4 sm:$0xff]  }
0x16ea   :  { %4512 = vmatprep.mubr.msk.f32.mxu0 %vm596_vm8, %v2927_v25  ;;  %v4849_v25 = vld [vmem:[#allocation13 + $0x84] ss:$8 sps:$4 sm:$0xff]  }
0x16eb   :  { %4513 = vmatmul.mubr.msk.f32.vlgmr.msra.gmra.mrb[28].mxu0 %vm596_vm8, %v2928_v26  ;;  %v4852_v26 = vld [vmem:[#allocation13 + $0x94] ss:$8 sps:$4 sm:$0xff]  }
0x16ec   :  { %4527 = vmatprep.mubr.msk.f32.mxu0 %vm504_vm1, %v3081_v27  ;;  %v4850_v27 = vld [vmem:[#allocation13 + $0x90] ss:$8 sps:$4 sm:$0xff]  }
0x16ef   :  { %4640 = vmatpush3.bf16.xpose.msk.msra.mxu0 %vm5522_vm2, %v4635_v23 }
0x16f6   :  { %4528 = vmatmul.mubr.msk.f32.vlgmr.msra.gmra.mrb[30].mxu0 %vm504_vm1, %v3083_v28 }
0x17be   :  { %v4514_v0 = vpop.f32.mrb[28].mxu0 }
0x17bf   :  { %v3007_v31 = vpop.f32.mrb[29].mxu0 }
0x17c0   :  { %v3016_v1 = vpack.c.bf16 %v4514_v0, %v3007_v31 }
0x17c2   :  { %4520 = vmatmul.mubr.msk.bf16.vlgmr.msra.gmra.mrb[48].mxu1 %vm504_vm1, %v3016_v1 }
0x17c3   :  { %4541 = vmatprep.mubr.msk.bf16.mxu1 %vm5246_vm0, %v5244_v4  ;;  %4538 = vmatpush3.bf16.msra.mxu1 %v4845_v56 }
0x17c4   :  { %4539 = vmatprep.subr.bf16.mxu1 %v5244_v4 }
0x17c9   :  { %v4529_v34 = vpop.f32.mrb[30].mxu0 }
0x17ca   :  { %v3172_v35 = vmul.f32 0.17677669, %v4529_v34  ;;  %v3162_v5 = vpop.f32.mrb[31].mxu0 }
0x17cb   :  { %v3171_v13 = vmul.f32 0.17677669, %v3162_v5  ;;  %v4853_v5 = vld [vmem:[#allocation13 + $0xa0] ss:$8 sps:$4 sm:$0xff]  }
0x17cc   :  { %v3174_v37 = vadd.f32 %v3172_v35, %v5548_v33 }
0x17cd   :  { %v3173_v38 = vadd.f32 %v3171_v13, %v5550_v36  ;;  %v4858_v13 = vld [vmem:[#allocation13 + $0xb4] ss:$8 sps:$4 sm:$0xff]  }
0x17ce   :  { %v3178_v39 = vsel %vm596_vm8, %v3174_v37, -inf }
0x17cf   :  { %3179 = vmax.xlane.f32.xlu0 %v3178_v39  ;;  %v3175_v40 = vsel %vm596_vm8, %v3173_v38, -inf  ;;  %v4859_v39 = vld [vmem:[#allocation13 + $0xc0] ss:$8 sps:$4 sm:$0xff]  }
0x17d0   :  { %3176 = vmax.xlane.f32.xlu1 %v3175_v40  ;;  %v4864_v40 = vld [vmem:[#allocation13 + $0xd4] ss:$8 sps:$4 sm:$0xff]  }
0x185c   :  { %v3180_v41 = vpop.xlane.xlu0 %3179 }
0x185d   :  { %v3182_v42 = vsub.f32 %v3174_v37, %v3180_v41  ;;  %v3177_v43 = vpop.xlane.xlu1 %3176  ;;  %v4856_v37 = vld [vmem:[#allocation13 + $0xb0] ss:$8 sps:$4 sm:$0xff]  }
0x185e   :  { %v3181_v16 = vsub.f32 %v3173_v38, %v3177_v43  ;;  %v4861_v38 = vld [vmem:[#allocation13 + $0xc4] ss:$8 sps:$4 sm:$0xff]   ;;  %v4862_v41 = vld [vmem:[#allocation13 + $0xd0] ss:$8 sps:$4 sm:$0xff]   ;;  %v4865_v43 = vld [vmem:[#allocation13 + $0xe0] ss:$8 sps:$4 sm:$0xff]  }
0x185f   :  { %v3185_v45 = vmul.f32 1.442695, %v3182_v42  ;;  %v4867_v42 = vld [vmem:[#allocation13 + $0xe4] ss:$8 sps:$4 sm:$0xff]  }
0x1860   :  { %v3183_v49 = vmul.f32 1.442695, %v3181_v16  ;;  %v4870_v16 = vld [vmem:[#allocation13 + $0xf4] ss:$8 sps:$4 sm:$0xff]  }
0x1861   :  { %4971 = vpow2.f32 %v3185_v45  ;;  %v4868_v45 = vld [vmem:[#allocation13 + $0xf0] ss:$8 sps:$4 sm:$0xff]  }
0x1862   :  { %4973 = vpow2.f32 %v3183_v49 }
0x186b   :  { %v4972_v52 = vpop.eup %4971 }
0x186c   :  { %v4974_v53 = vpop.eup %4973  ;;  %v3190_v33 = vsel %vm596_vm8, %v4972_v52, 0.0 }
0x186d   :  { %3191 = vadd.xlane.f32.xlu1 %v3190_v33  ;;  %v3187_v36 = vsel %vm596_vm8, %v4974_v53, 0.0 }
0x186e   :  { %3188 = vadd.xlane.f32.xlu0 %v3187_v36 }
0x1884   :  { %4723 = vrot.lane.b32.xlu0 %v5704_v9, %s5249_s0 }
0x1895   :  { %v3071_v59 = vpop.f32.mrb[48].mxu1 }
0x1896   :  { %v3078_v60 = vadd.f32 %v3071_v59, %v5769_v44  ;;  %v4521_v61 = vpop.f32.mrb[49].mxu1  ;;  %v4846_v44 = vld [vmem:[#allocation11 + $0x78] sm:$0xff]  }
0x1897   :  { %v3074_v63 = vpop.f32.mrb[50].mxu1  ;;  %4540 = vmatpush3.bf16.msra.mxu1 %v4846_v44  ;;  %v4120_v61 = vld [vmem:[%s5881_s8 + $0x1] ss:$0 sm:$0xff]  ;;  %v4876_v44 = vld [vmem:[#allocation14 + $0x90] sm:$0xff]  }
0x1898   :  { %v3079_v50 = vadd.f32 %v3074_v63, %v5771_v46  ;;  %v4522_v51 = vpop.f32.mrb[51].mxu1 }
0x18fa   :  { %v3192_v2 = vpop.xlane.xlu1 %3191 }
0x18fb   :  { %4975 = vrcp.f32 %v3192_v2  ;;  %v3189_v3 = vpop.xlane.xlu0 %3188  ;;  %v4121_v2 = vld [vmem:[%s5882_s9 + $0x1] ss:$0 sm:$0xff] }
0x18fc   :  { %4977 = vrcp.f32 %v3189_v3 }
0x18ff   :  { %v4724_v6 = vpop.permute.xlu0 %4723 }
0x1900   :  { %v4726_v7 = vunpack.i.h.bf16 %v4724_v6  ;;  %v4725_v11 = vunpack.i.l.bf16 %v4724_v6 }
0x1902   :  { %v4641_v9 = vpack.c.bf16 %v4726_v7, %v4725_v11 }
0x1904   :  { %4642 = vmatprep.subr.bf16.mxu0 %v4641_v9 }
0x1905   :  { %v4976_v54 = vpop.eup %4975  ;;  %4644 = vmatpush3.bf16.msra.mxu0 %v4641_v9  ;;  %v4871_v9 = vld [vmem:[#allocation14 + $0xc0] sm:$0xff]  }
0x1906   :  { %v4978_v57 = vpop.eup %4977  ;;  %v3196_v10 = vmul.f32 %v4976_v54, %v4972_v52  ;;  %3513 = vmatprep.subr.bf16.mxu0 %v4849_v25  ;;  %v4872_v54 = vld [vmem:[#allocation14 + $0x80] sm:$0xff]   ;;  %4298 = vmatprep.subr.bf16.mxu1 %v4871_v9 }
0x1907   :  { %v3195_v8 = vmul.f32 %v4978_v57, %v4974_v53  ;;  %v4873_v57 = vld [vmem:[#allocation14 + $0xc8] sm:$0xff]  }
0x1909   :  { %4534 = vmatprep.mubr.msk.f32.mxu0 %vm596_vm8, %v3195_v8  ;;  %v4874_v8 = vld [vmem:[#allocation14 + $0x88] sm:$0xff]  }
0x190a   :  { %4535 = vmatmul.mubr.msk.f32.vlgmr.msra.gmra.mrb[32].mxu0 %vm596_vm8, %v3196_v10  ;;  %v4875_v10 = vld [vmem:[#allocation14 + $0xd0] sm:$0xff]  }
0x190b   :  { %3545 = vmatprep.mubr.bf16.mxu0 %v5245_v30  ;;  %3514 = vmatpush1.bf16.msra.mxu0 %v4847_v12 }
0x190c   :  { %3515 = vmatprep.subr.bf16.mxu0 %v4852_v26 }
0x190f   :  { %3516 = vmatpush1.bf16.msra.mxu0 %v4850_v27 }
0x19dd   :  { %v4536_v46 = vpop.f32.mrb[32].mxu0 }
0x19de   :  { %v3275_v14 = vpop.f32.mrb[33].mxu0 }
0x19df   :  { %v3284_v17 = vpack.c.bf16 %v4536_v46, %v3275_v14  ;;  %v4877_v46 = vld [vmem:[#allocation14 + $0xd8] sm:$0xff]  }
0x19e0   :  { %v4878_v14 = vld [vmem:[#allocation14 + $0x98] sm:$0xff]  }
0x19e1   :  { %4542 = vmatmul.mubr.msk.bf16.vlgmr.msra.gmra.mrb[52].mxu1 %vm504_vm1, %v3284_v17  ;;  %v4879_v17 = vld [vmem:[#allocation14 + $0xe0] sm:$0xff]  }
0x19e2   :  { %4299 = vmatpush3.bf16.msra.mxu1 %v4872_v54 }
0x19e3   :  { %4300 = vmatprep.subr.bf16.mxu1 %v4873_v57 }
0x19e6   :  { %4301 = vmatpush3.bf16.msra.mxu1 %v4874_v8 }
0x19e7   :  { %4302 = vmatprep.subr.bf16.mxu1 %v4875_v10 }
0x19ea   :  { %4303 = vmatpush3.bf16.msra.mxu1 %v4876_v44 }
0x19eb   :  { %4304 = vmatprep.subr.bf16.mxu1 %v4877_v46 }
0x19ee   :  { %4305 = vmatpush3.bf16.msra.mxu1 %v4878_v14 }
0x19ef   :  { %4306 = vmatprep.subr.bf16.mxu1 %v4879_v17 }
0x1ab4   :  { %v3339_v18 = vpop.f32.mrb[52].mxu1 }
0x1ab5   :  { %v3346_v20 = vadd.f32 %v3339_v18, %v3078_v60  ;;  %v4543_v32 = vpop.f32.mrb[53].mxu1  ;;  %v4880_v18 = vld [vmem:[#allocation14 + $0xa0] sm:$0xff]  }
0x1ab6   :  { %v3342_v15 = vpop.f32.mrb[54].mxu1  ;;  %4307 = vmatpush3.bf16.msra.mxu1 %v4880_v18  ;;  %v4883_v32 = vld [vmem:[#allocation14 + $0xf0] sm:$0xff]  }
0x1ab7   :  { %v3356_v21 = vadd.f32 %v4117_v19, %v3346_v20  ;;  %v3347_v62 = vadd.f32 %v3342_v15, %v3079_v50  ;;  %v4544_v22 = vpop.f32.mrb[55].mxu1  ;;  %v4882_v20 = vld [vmem:[#allocation14 + $0xa8] sm:$0xff]   ;;  %v4884_v15 = vld [vmem:[#allocation14 + $0xb0] sm:$0xff]  }
0x1ab8   :  { %v4122_v22 = vld [vmem:[%s5884_s11 + $0x2] sm:$0x3] }
0x1ab9   :  { %v3357_v23 = vadd.f32 %v4117_v19, %v3347_v62  ;;  %v3358_v30 = vadd.f32 %v3356_v21, %v5685_v47  ;;  %v4881_v19 = vld [vmem:[#allocation14 + $0xe8] sm:$0xff]   ;;  %v4885_v21 = vld [vmem:[#allocation14 + $0xf8] sm:$0xff]  }
0x1aba   :  { %4308 = vmatprep.subr.bf16.mxu1 %v4881_v19  ;;  %v4886_v62 = vld [vmem:[#allocation14 + $0xb8] sm:$0xff]   ;;  %v4140_v19 = vld [vmem:[%s5886_s13 + $0x1] ss:$0 sm:$0xff] }
0x1abb   :  { %3364 = vadd.xlane.f32.xlu1 %v3358_v30  ;;  %v3359_v24 = vadd.f32 %v3357_v23, %v5687_v48  ;;  %v4855_v48 = vld [vmem:[#allocation13 + $0xa4] ss:$8 sps:$4 sm:$0xff]   ;;  %4309 = vmatpush3.bf16.msra.mxu1 %v4882_v20  ;;  %v3426_v23 = vrot.slane %v4122_v22, %v5499_v55 }
0x1abc   :  { %3517 = vmatprep.subr.bf16.mxu0 %v4855_v48  ;;  %4310 = vmatprep.subr.bf16.mxu1 %v4883_v32 }
0x1abd   :  { %3518 = vmatpush1.bf16.msra.mxu0 %v4853_v5 }
0x1abe   :  { %3519 = vmatprep.subr.bf16.mxu0 %v4858_v13 }
0x1abf   :  { %3366 = vadd.xlane.f32.xlu1 %v3359_v24  ;;  %4311 = vmatpush3.bf16.msra.mxu1 %v4884_v15 }
0x1ac0   :  { %4312 = vmatprep.subr.bf16.mxu1 %v4885_v21 }
0x1ac1   :  { %3520 = vmatpush1.bf16.msra.mxu0 %v4856_v37 }
0x1ac2   :  { %3521 = vmatprep.subr.bf16.mxu0 %v4861_v38 }
0x1ac3   :  { %4313 = vmatpush3.bf16.msra.mxu1 %v4886_v62  ;;  %v4887_v62 = vld [vmem:[#allocation16] sm:$0xff]  }
0x1ac5   :  { %3522 = vmatpush1.bf16.msra.mxu0 %v4859_v39 }
0x1ac6   :  { %3523 = vmatprep.subr.bf16.mxu0 %v4864_v40 }
0x1ac9   :  { %3524 = vmatpush1.bf16.msra.mxu0 %v4862_v41 }
0x1aca   :  { %3525 = vmatprep.subr.bf16.mxu0 %v4867_v42 }
0x1acd   :  { %3526 = vmatpush1.bf16.msra.mxu0 %v4865_v43 }
0x1ace   :  { %3527 = vmatprep.subr.bf16.mxu0 %v4870_v16 }
0x1ad1   :  { %3528 = vmatpush1.bf16.msra.mxu0 %v4868_v45 }
0x1ad2   :  { %4545 = vmatprep.subr.bf16.mxu0 %v5244_v4 }
0x1b48   :  { %v3365_v28 = vpop.xlane.xlu1 %3364 }
0x1b49   :  { %v3368_v29 = vmul.f32 0.0078125, %v3365_v28 }
0x1b4b   :  { %v3370_v0 = vsub.f32 %v3358_v30, %v3368_v29  ;;  %v3430_v30 = vrot.slane %v4122_v22, %v5506_v58 }
0x1b4c   :  { %v3367_v31 = vpop.xlane.xlu1 %3366 }
0x1b4d   :  { %v3369_v1 = vmul.f32 0.0078125, %v3367_v31  ;;  %v3372_v34 = vmul.f32 %v3370_v0, %v3370_v0 }
0x1b4f   :  { %v3371_v35 = vsub.f32 %v3359_v24, %v3369_v1  ;;  %3374 = vadd.xlane.f32.xlu1 %v3372_v34 }
0x1b51   :  { %v3373_v47 = vmul.f32 %v3371_v35, %v3371_v35 }
0x1b53   :  { %3376 = vadd.xlane.f32.xlu1 %v3373_v47 }
0x1bdc   :  { %v3375_v49 = vpop.xlane.xlu1 %3374 }
0x1bdd   :  { %v3378_v52 = vmul.f32 0.0078125, %v3375_v49 }
0x1bdf   :  { %v3380_v53 = vadd.f32 1e-12, %v3378_v52 }
0x1be0   :  { %v3377_v33 = vpop.xlane.xlu1 %3376 }
0x1be1   :  { %4979 = vrsqrt.f32 %v3380_v53  ;;  %v3379_v36 = vmul.f32 0.0078125, %v3377_v33 }
0x1be3   :  { %v3381_v56 = vadd.f32 1e-12, %v3379_v36 }
0x1be5   :  { %4981 = vrsqrt.f32 %v3381_v56 }
0x1beb   :  { %v4980_v59 = vpop.eup %4979 }
0x1bec   :  { %v3384_v60 = vmul.f32 %v4980_v59, %v3370_v0 }
0x1bee   :  { %v3392_v51 = vmul.f32 %v4120_v61, %v3384_v60 }
0x1bef   :  { %v4982_v63 = vpop.eup %4981 }
0x1bf0   :  { %v3385_v50 = vmul.f32 %v4982_v63, %v3371_v35  ;;  %v5827_v6 = vadd.f32 %v4121_v2, %v3392_v51 }
0x1bf2   :  { %v3393_v3 = vmul.f32 %v4120_v61, %v3385_v50 }
0x1bf4   :  { %v5829_v7 = vadd.f32 %v4121_v2, %v3393_v3 }
0x1bf6   :  { %v3402_v11 = vpack.c.bf16 %v5829_v7, %v5827_v6 }
0x1bf8   :  { %3546 = vmatmul.mubr.bf16.vlgmr.msra.gmra.mrb[36].mxu0 %v3402_v11 }
0x1bf9   :  { %4561 = vmatprep.mubr.msk.bf16.mxu0 %vm5246_vm0, %v5244_v4  ;;  %4546 = vmatpush3.bf16.msra.mxu0 %v4887_v62 }
0x1bfa   :  { %4547 = vmatprep.subr.bf16.mxu0 %v5244_v4 }
0x1ccb   :  { %v3547_v24 = vpop.f32.mrb[36].mxu0 }
0x1ccc   :  { %v3548_v12 = vadd.f32 %v3547_v24, %v3426_v23  ;;  %v3549_v25 = vpop.f32.mrb[37].mxu0 }
0x1ccd   :  { %v3550_v26 = vadd.f32 %v3549_v25, %v3430_v30  ;;  %v3551_v27 = vpop.f32.mrb[38].mxu0 }
0x1cce   :  { %v3560_v28 = vmul.f32 0.044715, %v3548_v12  ;;  %v3552_v29 = vadd.f32 %v3551_v27, %v3426_v23  ;;  %v3553_v0 = vpop.f32.mrb[39].mxu0  ;;  %v3556_v60 = vmul.f32 0.5, %v3548_v12 }
0x1ccf   :  { %v3561_v31 = vmul.f32 0.044715, %v3550_v26  ;;  %v3554_v1 = vadd.f32 %v3553_v0, %v3430_v30  ;;  %v3557_v50 = vmul.f32 0.5, %v3550_v26  ;;  %v4892_v0 = vld [vmem:[#allocation16 + $0x28] sm:$0xff]  }
0x1cd0   :  { %v3564_v34 = vmul.f32 %v3560_v28, %v3548_v12  ;;  %v3562_v35 = vmul.f32 0.044715, %v3552_v29  ;;  %v3558_v61 = vmul.f32 0.5, %v3552_v29  ;;  %v4888_v28 = vld [vmem:[#allocation16 + $0x8] sm:$0xff]  }
0x1cd1   :  { %v3565_v47 = vmul.f32 %v3561_v31, %v3550_v26  ;;  %v3563_v48 = vmul.f32 0.044715, %v3554_v1  ;;  %v3559_v51 = vmul.f32 0.5, %v3554_v1  ;;  %4548 = vmatpush3.bf16.msra.mxu0 %v4888_v28  ;;  %v4893_v31 = vld [vmem:[#allocation16 + $0x30] sm:$0xff]  }
0x1cd2   :  { %v3568_v5 = vmul.f32 %v3564_v34, %v3548_v12  ;;  %v3566_v13 = vmul.f32 %v3562_v35, %v3552_v29  ;;  %4549 = vmatprep.subr.bf16.mxu0 %v5244_v4 }
0x1cd3   :  { %v3569_v37 = vmul.f32 %v3565_v47, %v3550_v26  ;;  %v3567_v55 = vmul.f32 %v3563_v48, %v3554_v1 }
0x1cd4   :  { %v3572_v38 = vadd.f32 %v3568_v5, %v3548_v12  ;;  %v3570_v58 = vmul.f32 %v3566_v13, %v3552_v29 }
0x1cd5   :  { %v3571_v39 = vmul.f32 %v3567_v55, %v3554_v1  ;;  %v3573_v40 = vadd.f32 %v3569_v37, %v3550_v26  ;;  %v4159_v55 = vld [vmem:[%s5887_s14 + $0x1] ss:$0 sm:$0xff]  ;;  %s5250_s14 = smov [#allocation17]  }
0x1cd6   :  { %v3576_v41 = vmul.f32 0.7978846, %v3572_v38  ;;  %v3574_v42 = vadd.f32 %v3570_v58, %v3552_v29  ;;  %v4891_v29 = vld [vmem:[#allocation16 + $0x20] sm:$0xff]   ;;  %v4160_v58 = vld [vmem:[%s5888_s15 + $0x1] ss:$0 sm:$0xff]  ;;  %s3941_s15 = sshll.u32 %s5250_s14, 4  ;;  %s3942_s15 = int_to_ptr.vmem [resolvable:$true] %s3941_s15 }
0x1cd7   :  { %v3575_v43 = vadd.f32 %v3571_v39, %v3554_v1  ;;  %v3577_v16 = vmul.f32 0.7978846, %v3573_v40  ;;  %v4894_v1 = vld [vmem:[#allocation16 + $0x38] sm:$0xff]   ;;  %s5195_s19 = scalar_lea.vmem %s3942_s15, 32  ;;  %p5200_p3 = scmp.lt.s32.totalorder %s3942_s15, %s3942_s15 }
0x1cd8   :  { %4983 = vtanh.f32 %v3576_v41  ;;  %v3578_v45 = vmul.f32 0.7978846, %v3574_v42  ;;  %p5196_p2 = scmp.ne.s32.totalorder %s3942_s15, %s5195_s19  ;;  %p5201_p4 = scmp.lt.s32.totalorder %s5195_s19, %s5195_s19 }
0x1cd9   :  { %v3579_v49 = vmul.f32 0.7978846, %v3575_v43  ;;  %4985 = vtanh.f32 %v3577_v16 }
0x1cda   :  { %4987 = vtanh.f32 %v3578_v45  ;;  %p5202_p5 = por %p5201_p4, %p5200_p3 }
0x1cdb   :  { %4989 = vtanh.f32 %v3579_v49 }
0x1cdc   :  { %p5203_p6 = pnand %p5202_p5, %p5196_p2 }
0x1ce2   :  { %v4984_v52 = vpop.eup %4983 }
0x1ce3   :  { %v4986_v53 = vpop.eup %4985  ;;  %v3584_v33 = vadd.f32 1.0, %v4984_v52  ;;  %v4161_v52 = vld [vmem:[%s5890_s17] ss:$0 sm:$0xff] }
0x1ce4   :  { %v4988_v36 = vpop.eup %4987  ;;  %v3585_v56 = vadd.f32 1.0, %v4986_v53 }
0x1ce5   :  { %v4990_v59 = vpop.eup %4989  ;;  %v3586_v63 = vadd.f32 1.0, %v4988_v36  ;;  %v3588_v3 = vmul.f32 %v3584_v33, %v3556_v60 }
0x1ce6   :  { %v3587_v2 = vadd.f32 1.0, %v4990_v59  ;;  %v3589_v9 = vmul.f32 %v3585_v56, %v3557_v50 }
0x1ce7   :  { %v3590_v11 = vmul.f32 %v3586_v63, %v3558_v61 }
0x1ce8   :  { %v3591_v54 = vmul.f32 %v3587_v2, %v3559_v51 }
0x1ce9   :  { %v3592_v57 = vpack.c.bf16 %v3590_v11, %v3588_v3 }
0x1cea   :  { %v3593_v8 = vpack.c.bf16 %v3591_v54, %v3589_v9 }
0x1cec   :  { %3763 = vmatprep.mubr.bf16.mxu1 %v3593_v8 }
0x1ced   :  { %3764 = vmatmul.mubr.bf16.vlgmr.msra.gmra.mrb[56].mxu1 %v3592_v57 }
0x1dc0   :  { %v4314_v10 = vpop.f32.mrb[56].mxu1 }
0x1dc1   :  { %v4315_v44 = vpop.f32.mrb[57].mxu1 }
0x1dc2   :  { %v4316_v46 = vadd.f32 %v4315_v44, %v4314_v10  ;;  %v4317_v14 = vpop.f32.mrb[58].mxu1 }
0x1dc3   :  { %v4318_v17 = vpop.f32.mrb[59].mxu1 }
0x1dc4   :  { %v4319_v18 = vadd.f32 %v4318_v17, %v4317_v14  ;;  %v3766_v32 = vadd.f32 %v4316_v46, %v4140_v19 }
0x1dc6   :  { %v3769_v20 = vadd.f32 %v4319_v18, %v4140_v19  ;;  %v3772_v21 = vadd.f32 %v3766_v32, %v5827_v6  ;;  %v4889_v6 = vld [vmem:[#allocation16 + $0x10] sm:$0xff]  }
0x1dc7   :  { %4550 = vmatpush3.bf16.msra.mxu0 %v4889_v6 }
0x1dc8   :  { %v3773_v15 = vadd.f32 %v3769_v20, %v5829_v7  ;;  %4551 = vmatprep.subr.bf16.mxu0 %v5244_v4  ;;  %v4890_v7 = vld [vmem:[#allocation16 + $0x18] sm:$0xff]  }
0x1dca   :  { %3780 = vadd.xlane.f32.xlu1 %v3773_v15 }
0x1dcb   :  { %4552 = vmatpush3.bf16.msra.mxu0 %v4890_v7 }
0x1dcc   :  { %4553 = vmatprep.subr.bf16.mxu0 %v5244_v4 }
0x1dce   :  { %3778 = vadd.xlane.f32.xlu1 %v3772_v21 }
0x1dcf   :  { %4554 = vmatpush3.bf16.msra.mxu0 %v4891_v29 }
0x1dd0   :  { %4555 = vmatprep.subr.bf16.mxu0 %v5244_v4 }
0x1dd3   :  { %4556 = vmatpush3.bf16.msra.mxu0 %v4892_v0 }
0x1dd4   :  { %4557 = vmatprep.subr.bf16.mxu0 %v5244_v4 }
0x1dd7   :  { %4558 = vmatpush3.bf16.msra.mxu0 %v4893_v31 }
0x1dd8   :  { %4559 = vmatprep.subr.bf16.mxu0 %v5244_v4 }
0x1ddb   :  { %4560 = vmatpush3.bf16.msra.mxu0 %v4894_v1 }
0x1e57   :  { %v3781_v22 = vpop.xlane.xlu1 %3780 }
0x1e58   :  { %v3783_v23 = vmul.f32 0.0078125, %v3781_v22 }
0x1e5a   :  { %v3785_v30 = vsub.f32 %v3773_v15, %v3783_v23 }
0x1e5b   :  { %v3779_v24 = vpop.xlane.xlu1 %3778 }
0x1e5c   :  { %v3782_v12 = vmul.f32 0.0078125, %v3779_v24  ;;  %v3787_v25 = vmul.f32 %v3785_v30, %v3785_v30 }
0x1e5e   :  { %v3784_v26 = vsub.f32 %v3772_v21, %v3782_v12  ;;  %3790 = vadd.xlane.f32.xlu0 %v3787_v25 }
0x1e60   :  { %v3786_v27 = vmul.f32 %v3784_v26, %v3784_v26 }
0x1e62   :  { %3788 = vadd.xlane.f32.xlu1 %v3786_v27 }
0x1eeb   :  { %v3791_v34 = vpop.xlane.xlu0 %3790 }
0x1eec   :  { %v3793_v35 = vmul.f32 0.0078125, %v3791_v34 }
0x1eee   :  { %v3795_v47 = vadd.f32 1e-12, %v3793_v35 }
0x1eef   :  { %v3789_v48 = vpop.xlane.xlu1 %3788 }
0x1ef0   :  { %4991 = vrsqrt.f32 %v3795_v47  ;;  %v3792_v5 = vmul.f32 0.0078125, %v3789_v48 }
0x1ef2   :  { %v3794_v13 = vadd.f32 1e-12, %v3792_v5 }
0x1ef4   :  { %4993 = vrsqrt.f32 %v3794_v13 }
0x1efa   :  { %v4992_v37 = vpop.eup %4991 }
0x1efb   :  { %v3799_v38 = vmul.f32 %v4992_v37, %v3785_v30 }
0x1efd   :  { %v3807_v4 = vmul.f32 %v4159_v55, %v3799_v38 }
0x1efe   :  { %v4994_v39 = vpop.eup %4993 }
0x1eff   :  { %v3798_v40 = vmul.f32 %v4994_v39, %v3784_v26  ;;  %v3815_v41 = vadd.f32 %v4160_v58, %v3807_v4 }
0x1f01   :  { %v3806_v42 = vmul.f32 %v4159_v55, %v3798_v40  ;;  %v3817_v16 = vrot.slane %v3815_v41, 7 }
0x1f03   :  { %v3814_v43 = vadd.f32 %v4160_v58, %v3806_v42 }
0x1f05   :  { %v3820_v45 = vsel %vm3819_vm9, %v3814_v43, %v3817_v16 }
0x1f06   :  { %v3821_v49 = vpack.c.bf16 %v3820_v45, %v3820_v45 }
0x1f08   :  { %4562 = vmatmul.mubr.bf16.vlgmr.msra.gmra.mrb[40].mxu0 %v3821_v49 }
0x1fdb   :  { %v3927_v53 = vpop.f32.mrb[40].mxu0 }
0x1fdc   :  { %v3928_v33 = vadd.f32 %v4161_v52, %v3927_v53  ;;  %v4563_v36 = vpop.f32.mrb[41].mxu0 }
0x1fdd   :  { %v3930_v56 = vpop.f32.mrb[42].mxu0 }
0x1fde   :  { %4995 = vtanh.f32 %v3928_v33  ;;  %v4564_v59 = vpop.f32.mrb[43].mxu0 }
0x1fe8   :  { %v4996_v60 = vpop.eup %4995 }
0x1fe9   :  { %3934 = vst [vmem:[#allocation17] sm:$0x3] %v4996_v60 }
0x1fea   :  { %5206 = shalt.err (!%p5203_p6)
}
0x1feb   :  { %s5207_s27 = scalar_lea.hbm %s5891_s18, 32 }
0x1fec   :  { %p5208_p7 = scmp.ne.s32.totalorder %s5891_s18, %s5207_s27  ;;  %p5211_p8 = scmp.lt.u32.totalorder %s5207_s27, %s5891_s18 }
0x1fee   :  { %p5213_p9 = pnand %p5211_p8, %p5208_p7 }
0x1ff0   :  { %5216 = shalt.err (!%p5213_p9)
}
0x1ff1   :  { %3944 = dma.vmem_to_hbm [thread:$0]  %s3942_s15, 32, %s5891_s18, [#allocation4]  }
0x1ff2   :  { %5227 = dma.done.wait [#allocation4], 32  }
0x1ff3   :  { %5228 = vsyncadd [#allocation4], 4294967264 }
0x1ff4   :  { %3948 = vsyncpa [#allocation3], 1 }
0x1ff5   :  { %3949 = vsyncpa [#allocation6], 1 }
0x1ff6   :  { %3950 = vsyncpa [#allocation9], 1 }
0x1ff7   :  { %3951 = vsyncpa [#allocation12], 1 }
0x1ff8   :  { %3952 = vsyncpa [#allocation15], 1 }
0x1ff9   :  { %3953 = vsyncpa [#allocation4], 1 }

</bundles_post_ra>
